<compile_context>
chip_gen: v6e
topology: v6e:2x2x1
jax: 0.10.0
libtpu: 0.0.40
codegen_flags: <defaults>
</compile_context>

<pallas_src>
import functools

import jax
import jax.numpy as jnp
from jax import lax
from jax.experimental import pallas as pl
from jax.experimental.pallas import tpu as pltpu


# ------------------------------ Pallas kernel ------------------------------- #

def _resblock_kernel(x_ref, w1_ref, w2_ref, s1_ref, s2_ref, mask_ref, o_ref,
                     *, wp, c):
    """Fused ResBlock3D body for one batch element.

    x_ref   : (1, (D+2)*C, SP)          bf16  padded input slab (depth-major rows)
    w1_ref  : (9, (D+2)*C, (D+2)*C)     f32   banded conv1 weight (BN1 folded)
    w2_ref  : (9, D*C,     (D+2)*C)     f32   banded conv2 weight (BN2 folded)
    s1_ref  : ((D+2)*C, 1)              f32   BN1 shift (zero on depth-pad rows)
    s2_ref  : (D*C, 1)                  f32   BN2 shift
    mask_ref: (1, SP)                   f32   1.0 at interior padded-plane positions
    o_ref   : (1, D*C, SP)              f32   output slab
    """
    x = x_ref[0].astype(jnp.float32)            # ((D+2)*C, SP), one cast
    mask = mask_ref[...]                        # (1, SP)
    pc = x.shape[0]

    def conv(w_ref, src):
        # 3x3x3 conv as nine accumulated banded matmuls, one per (kh, kw).
        # The lane shift off moves the padded H*W plane by (kh-1, kw-1);
        # interior output positions never touch the circular wrap (all
        # non-interior positions are masked / discarded).
        acc = None
        taps = [(kh, kw) for kh in range(3) for kw in range(3)]
        for g, (kh, kw) in enumerate(taps):
            off = (kh - 1) * wp + (kw - 1)
            rhs = src if off == 0 else jnp.roll(src, -off, axis=1)
            part = jnp.dot(w_ref[g], rhs, preferred_element_type=jnp.float32)
            acc = part if acc is None else acc + part
        return acc

    # conv1 -> bn1 -> relu; the mask zeroes y1's in-plane (H/W) padding and the
    # lane tail (depth-pad rows stay zero because their weight/shift rows are 0).
    y1 = jnp.maximum(conv(w1_ref, x) + s1_ref[...], 0.0) * mask   # ((D+2)*C, SP)

    # conv2 -> bn2 -> +identity -> relu.  Identity = interior rows of x (already
    # resident).  Non-interior output positions are discarded by the wrapper, so
    # no final mask is needed.
    res = x[c:pc - c, :]                                          # (D*C, SP)
    y2 = jnp.maximum(conv(w2_ref, y1) + s2_ref[...] + res, 0.0)
    o_ref[0] = y2.astype(o_ref.dtype)


# ------------------------------- JAX glue ----------------------------------- #

def _fold_bn(gamma, beta, mean, var, eps=1e-5):
    scale = gamma / jnp.sqrt(var + eps)
    shift = beta - mean * scale
    return scale, shift


def _banded_weight(w_oidhw, scale, d, out_pad):
    """(C_out, C_in, 3, 3, 3) conv weight -> 9 block-banded matrices.

    Returns (9, R, (d+2)*C_in), g = kh*3 + kw.  Output row r = dp*C_out + co
    (dp over the d interior depth planes, plus one all-zero pad plane on each
    side when out_pad=True) contracts against rows (dp+kd)*C_in + ci of the
    padded depth-major activation matrix.  BN scale is folded into the weight.
    """
    c_out, c_in = w_oidhw.shape[:2]
    wf = (w_oidhw * scale[:, None, None, None, None]).astype(jnp.float32)
    eye = jnp.eye(d, dtype=jnp.float32)
    bands = []
    for kh in range(3):
        for kw in range(3):
            m = jnp.zeros((d * c_out, (d + 2) * c_in), jnp.float32)
            for kd in range(3):
                blk = jnp.kron(eye, wf[:, :, kd, kh, kw])      # (d*C_out, d*C_in)
                m = m + jnp.pad(blk, ((0, 0), (kd * c_in, (2 - kd) * c_in)))
            if out_pad:
                m = jnp.pad(m, ((c_out, c_out), (0, 0)))
            bands.append(m)
    return jnp.stack(bands)


def _to_padded_rows(x_ncdhw, sp):
    """NCDHW -> (N, (D+2)*C, SP) bf16: zero-pad D/H/W by 1, flatten the padded
    H*W plane onto lanes (zero-padded up to SP), depth-major rows dp*C + c."""
    n, c, d, h, w = x_ncdhw.shape
    xp = jnp.pad(x_ncdhw, ((0, 0), (0, 0), (1, 1), (1, 1), (1, 1)))
    xp = jnp.transpose(xp, (0, 2, 1, 3, 4)).reshape(
        n, (d + 2) * c, (h + 2) * (w + 2))
    xp = jnp.pad(xp, ((0, 0), (0, 0), (0, sp - (h + 2) * (w + 2))))
    return xp.astype(jnp.bfloat16)


def _interior_mask(h, w, sp):
    m = jnp.pad(jnp.ones((h, w), jnp.float32), ((1, 1), (1, 1)))
    m = m.reshape(1, (h + 2) * (w + 2))
    return jnp.pad(m, ((0, 0), (0, sp - (h + 2) * (w + 2))))


def init_params(key, channels):
    ks = jax.random.split(key, 10)
    C = channels
    p = {}
    p["w1"] = 0.1 * jax.random.normal(ks[0], (C, C, 3, 3, 3), jnp.float32)
    p["w2"] = 0.1 * jax.random.normal(ks[1], (C, C, 3, 3, 3), jnp.float32)
    # BatchNorm params + running stats (deterministic, non-trivial).
    p["gamma1"] = 1.0 + 0.1 * jax.random.normal(ks[2], (C,), jnp.float32)
    p["beta1"] = 0.1 * jax.random.normal(ks[3], (C,), jnp.float32)
    p["mean1"] = 0.1 * jax.random.normal(ks[4], (C,), jnp.float32)
    p["var1"] = 0.5 + jnp.abs(jax.random.normal(ks[5], (C,), jnp.float32)) * 0.5
    p["gamma2"] = 1.0 + 0.1 * jax.random.normal(ks[6], (C,), jnp.float32)
    p["beta2"] = 0.1 * jax.random.normal(ks[7], (C,), jnp.float32)
    p["mean2"] = 0.1 * jax.random.normal(ks[8], (C,), jnp.float32)
    p["var2"] = 0.5 + jnp.abs(jax.random.normal(ks[9], (C,), jnp.float32)) * 0.5
    return p


def resblock3d_forward(x_ncdhw, params):
    """Pallas implementation of ResBlock3D.forward.  Input/output in NCDHW."""
    x = x_ncdhw.astype(jnp.float32)
    n, c, d, h, w = x.shape
    wp = w + 2
    phw = (h + 2) * wp
    sp = ((phw + 127) // 128) * 128        # lane-dense padded-plane length
    pc = (d + 2) * c                       # padded depth-major row count (mult of 8 here)
    dc = d * c                             # output row count

    scale1, shift1 = _fold_bn(params["gamma1"], params["beta1"],
                              params["mean1"], params["var1"])
    scale2, shift2 = _fold_bn(params["gamma2"], params["beta2"],
                              params["mean2"], params["var2"])
    w1b = _banded_weight(params["w1"], scale1, d, out_pad=True)     # (9, pc, pc)
    w2b = _banded_weight(params["w2"], scale2, d, out_pad=False)    # (9, dc, pc)
    s1 = jnp.pad(jnp.tile(shift1, d), (c, c)).reshape(pc, 1).astype(jnp.float32)
    s2 = jnp.tile(shift2, d).reshape(dc, 1).astype(jnp.float32)
    mask = _interior_mask(h, w, sp)                                 # (1, sp)
    xb = _to_padded_rows(x, sp)                                     # (n, pc, sp) bf16

    kernel = functools.partial(_resblock_kernel, wp=wp, c=c)
    y2 = pl.pallas_call(
        kernel,
        out_shape=jax.ShapeDtypeStruct((n, dc, sp), jnp.float32),
        grid_spec=pltpu.PrefetchScalarGridSpec(
            num_scalar_prefetch=0,
            grid=(n,),
            in_specs=[
                pl.BlockSpec((1, pc, sp), lambda i: (i, 0, 0)),
                pl.BlockSpec((9, pc, pc), lambda i: (0, 0, 0)),
                pl.BlockSpec((9, dc, pc), lambda i: (0, 0, 0)),
                pl.BlockSpec((pc, 1), lambda i: (0, 0)),
                pl.BlockSpec((dc, 1), lambda i: (0, 0)),
                pl.BlockSpec((1, sp), lambda i: (0, 0)),
            ],
            out_specs=pl.BlockSpec((1, dc, sp), lambda i: (i, 0, 0)),
        ),
        compiler_params=pltpu.CompilerParams(
            dimension_semantics=("parallel",)),
    )(xb, w1b, w2b, s1, s2, mask)

    out = y2[..., :phw].reshape(n, d, c, h + 2, wp)[:, :, :, 1:h + 1, 1:w + 1]
    return jnp.transpose(out, (0, 2, 1, 3, 4))                      # NCDHW


# -------------------------- pure-JAX reference ------------------------------ #

def ref_forward(x, params):
    dn = ("NCDHW", "OIDHW", "NCDHW")
    pad = ((1, 1), (1, 1), (1, 1))
    scale1, shift1 = _fold_bn(params["gamma1"], params["beta1"],
                              params["mean1"], params["var1"])
    scale2, shift2 = _fold_bn(params["gamma2"], params["beta2"],
                              params["mean2"], params["var2"])
    bc = lambda v: v[None, :, None, None, None]
    c1 = lax.conv_general_dilated(x, params["w1"], (1, 1, 1), pad,
                                  dimension_numbers=dn,
                                  precision=lax.Precision.HIGHEST)
    o = jnp.maximum(c1 * bc(scale1) + bc(shift1), 0.0)
    c2 = lax.conv_general_dilated(o, params["w2"], (1, 1, 1), pad,
                                  dimension_numbers=dn,
                                  precision=lax.Precision.HIGHEST)
    o2 = c2 * bc(scale2) + bc(shift2) + x
    return jnp.maximum(o2, 0.0)


# --------------------------------- main ------------------------------------- #

if __name__ == "__main__":
    N, C, D, H, W = 2, 4, 8, 16, 16
    key = jax.random.PRNGKey(0)
    kx, kp = jax.random.split(key)
    x = jax.random.normal(kx, (N, C, D, H, W), jnp.float32)
    params = init_params(kp, C)

    fwd = jax.jit(functools.partial(resblock3d_forward, params=params))
    out = jax.block_until_ready(fwd(x))

    ref = jax.block_until_ready(ref_forward(x, params))
    assert out.shape == x.shape
    # Tolerance accounts for bf16 activation storage and default-precision
    # (single bf16 pass) MXU matmuls in the kernel vs the HIGHEST-precision
    # f32 reference convolution.
    if not bool(jnp.allclose(out, ref, atol=3e-2, rtol=3e-2)):
        err = float(jnp.max(jnp.abs(out - ref)))
        raise AssertionError(
            f"Pallas ResBlock3D output mismatch vs JAX reference (max err {err})")

    print("KERNEL_OK")
</pallas_src>

<mosaic_0001>
module attributes {stable_mosaic.version = 11 : i64} {
  func.func @_resblock_kernel(%arg0: i32, %arg1: memref<1x40x384xbf16, #tpu.memory_space<vmem>>, %arg2: memref<9x40x40xf32, #tpu.memory_space<vmem>>, %arg3: memref<9x32x40xf32, #tpu.memory_space<vmem>>, %arg4: memref<40x1xf32, #tpu.memory_space<vmem>>, %arg5: memref<32x1xf32, #tpu.memory_space<vmem>>, %arg6: memref<1x384xf32, #tpu.memory_space<vmem>>, %arg7: memref<1x32x384xf32, #tpu.memory_space<vmem>>) attributes {dimension_semantics = [#tpu.dimension_semantics<parallel>], iteration_bounds = array<i64: 2>, scalar_prefetch = 0 : i64, scratch_operands = 0 : i64, tpu.core_type = #tpu.core_type<tc>, window_params = [{transform_indices = @transform_0, window_bounds = array<i64: 1, 40, 384>}, {pipeline_mode = #tpu.pipeline_mode<synchronous>, transform_indices = @transform_1, window_bounds = array<i64: 9, 40, 40>}, {pipeline_mode = #tpu.pipeline_mode<synchronous>, transform_indices = @transform_2, window_bounds = array<i64: 9, 32, 40>}, {pipeline_mode = #tpu.pipeline_mode<synchronous>, transform_indices = @transform_3, window_bounds = array<i64: 40, 1>}, {pipeline_mode = #tpu.pipeline_mode<synchronous>, transform_indices = @transform_4, window_bounds = array<i64: 32, 1>}, {pipeline_mode = #tpu.pipeline_mode<synchronous>, transform_indices = @transform_5, window_bounds = array<i64: 1, 384>}, {transform_indices = @transform_6, window_bounds = array<i64: 1, 32, 384>}]} {
    %c0 = arith.constant 0 : index
    %c0_0 = arith.constant 0 : index
    %c0_1 = arith.constant 0 : index
    %0 = vector.load %arg1[%c0, %c0_0, %c0_1] : memref<1x40x384xbf16, #tpu.memory_space<vmem>>, vector<1x40x384xbf16>
    %1 = vector.shape_cast %0 : vector<1x40x384xbf16> to vector<40x384xbf16>
    %2 = arith.extf %1 : vector<40x384xbf16> to vector<40x384xf32>
    %c0_2 = arith.constant 0 : index
    %c0_3 = arith.constant 0 : index
    %3 = vector.load %arg6[%c0_2, %c0_3] : memref<1x384xf32, #tpu.memory_space<vmem>>, vector<1x384xf32>
    %4 = vector.extract_strided_slice %2 {offsets = [0, 365], sizes = [40, 19], strides = [1, 1]} : vector<40x384xf32> to vector<40x19xf32>
    %5 = vector.extract_strided_slice %2 {offsets = [0, 0], sizes = [40, 365], strides = [1, 1]} : vector<40x384xf32> to vector<40x365xf32>
    %6 = tpu.concatenate %4, %5 in 1 : vector<40x19xf32>, vector<40x365xf32> -> vector<40x384xf32>
    %c0_4 = arith.constant 0 : index
    %c0_5 = arith.constant 0 : index
    %c0_6 = arith.constant 0 : index
    %7 = vector.load %arg2[%c0_4, %c0_5, %c0_6] : memref<9x40x40xf32, #tpu.memory_space<vmem>>, vector<1x40x40xf32>
    %8 = vector.shape_cast %7 : vector<1x40x40xf32> to vector<40x40xf32>
    %cst = arith.constant dense<0.000000e+00> : vector<40x384xf32>
    %9 = tpu.matmul %8, %6, %cst {dimension_numbers = #tpu.dot_dimension_numbers<[1], [0], [0], [1], [0, 0, 1, 1], [], []>} : vector<40x40xf32>, vector<40x384xf32>, vector<40x384xf32> -> vector<40x384xf32>
    %10 = vector.extract_strided_slice %2 {offsets = [0, 366], sizes = [40, 18], strides = [1, 1]} : vector<40x384xf32> to vector<40x18xf32>
    %11 = vector.extract_strided_slice %2 {offsets = [0, 0], sizes = [40, 366], strides = [1, 1]} : vector<40x384xf32> to vector<40x366xf32>
    %12 = tpu.concatenate %10, %11 in 1 : vector<40x18xf32>, vector<40x366xf32> -> vector<40x384xf32>
    %c1 = arith.constant 1 : index
    %c0_7 = arith.constant 0 : index
    %c0_8 = arith.constant 0 : index
    %13 = vector.load %arg2[%c1, %c0_7, %c0_8] : memref<9x40x40xf32, #tpu.memory_space<vmem>>, vector<1x40x40xf32>
    %14 = vector.shape_cast %13 : vector<1x40x40xf32> to vector<40x40xf32>
    %cst_9 = arith.constant dense<0.000000e+00> : vector<40x384xf32>
    %15 = tpu.matmul %14, %12, %cst_9 {dimension_numbers = #tpu.dot_dimension_numbers<[1], [0], [0], [1], [0, 0, 1, 1], [], []>} : vector<40x40xf32>, vector<40x384xf32>, vector<40x384xf32> -> vector<40x384xf32>
    %16 = arith.addf %9, %15 : vector<40x384xf32>
    %17 = vector.extract_strided_slice %2 {offsets = [0, 367], sizes = [40, 17], strides = [1, 1]} : vector<40x384xf32> to vector<40x17xf32>
    %18 = vector.extract_strided_slice %2 {offsets = [0, 0], sizes = [40, 367], strides = [1, 1]} : vector<40x384xf32> to vector<40x367xf32>
    %19 = tpu.concatenate %17, %18 in 1 : vector<40x17xf32>, vector<40x367xf32> -> vector<40x384xf32>
    %c2 = arith.constant 2 : index
    %c0_10 = arith.constant 0 : index
    %c0_11 = arith.constant 0 : index
    %20 = vector.load %arg2[%c2, %c0_10, %c0_11] : memref<9x40x40xf32, #tpu.memory_space<vmem>>, vector<1x40x40xf32>
    %21 = vector.shape_cast %20 : vector<1x40x40xf32> to vector<40x40xf32>
    %cst_12 = arith.constant dense<0.000000e+00> : vector<40x384xf32>
    %22 = tpu.matmul %21, %19, %cst_12 {dimension_numbers = #tpu.dot_dimension_numbers<[1], [0], [0], [1], [0, 0, 1, 1], [], []>} : vector<40x40xf32>, vector<40x384xf32>, vector<40x384xf32> -> vector<40x384xf32>
    %23 = arith.addf %16, %22 : vector<40x384xf32>
    %24 = vector.extract_strided_slice %2 {offsets = [0, 383], sizes = [40, 1], strides = [1, 1]} : vector<40x384xf32> to vector<40x1xf32>
    %25 = vector.extract_strided_slice %2 {offsets = [0, 0], sizes = [40, 383], strides = [1, 1]} : vector<40x384xf32> to vector<40x383xf32>
    %26 = tpu.concatenate %24, %25 in 1 : vector<40x1xf32>, vector<40x383xf32> -> vector<40x384xf32>
    %c3 = arith.constant 3 : index
    %c0_13 = arith.constant 0 : index
    %c0_14 = arith.constant 0 : index
    %27 = vector.load %arg2[%c3, %c0_13, %c0_14] : memref<9x40x40xf32, #tpu.memory_space<vmem>>, vector<1x40x40xf32>
    %28 = vector.shape_cast %27 : vector<1x40x40xf32> to vector<40x40xf32>
    %cst_15 = arith.constant dense<0.000000e+00> : vector<40x384xf32>
    %29 = tpu.matmul %28, %26, %cst_15 {dimension_numbers = #tpu.dot_dimension_numbers<[1], [0], [0], [1], [0, 0, 1, 1], [], []>} : vector<40x40xf32>, vector<40x384xf32>, vector<40x384xf32> -> vector<40x384xf32>
    %30 = arith.addf %23, %29 : vector<40x384xf32>
    %c4 = arith.constant 4 : index
    %c0_16 = arith.constant 0 : index
    %c0_17 = arith.constant 0 : index
    %31 = vector.load %arg2[%c4, %c0_16, %c0_17] : memref<9x40x40xf32, #tpu.memory_space<vmem>>, vector<1x40x40xf32>
    %32 = vector.shape_cast %31 : vector<1x40x40xf32> to vector<40x40xf32>
    %cst_18 = arith.constant dense<0.000000e+00> : vector<40x384xf32>
    %33 = tpu.matmul %32, %2, %cst_18 {dimension_numbers = #tpu.dot_dimension_numbers<[1], [0], [0], [1], [0, 0, 1, 1], [], []>} : vector<40x40xf32>, vector<40x384xf32>, vector<40x384xf32> -> vector<40x384xf32>
    %34 = arith.addf %30, %33 : vector<40x384xf32>
    %35 = vector.extract_strided_slice %2 {offsets = [0, 1], sizes = [40, 383], strides = [1, 1]} : vector<40x384xf32> to vector<40x383xf32>
    %36 = vector.extract_strided_slice %2 {offsets = [0, 0], sizes = [40, 1], strides = [1, 1]} : vector<40x384xf32> to vector<40x1xf32>
    %37 = tpu.concatenate %35, %36 in 1 : vector<40x383xf32>, vector<40x1xf32> -> vector<40x384xf32>
    %c5 = arith.constant 5 : index
    %c0_19 = arith.constant 0 : index
    %c0_20 = arith.constant 0 : index
    %38 = vector.load %arg2[%c5, %c0_19, %c0_20] : memref<9x40x40xf32, #tpu.memory_space<vmem>>, vector<1x40x40xf32>
    %39 = vector.shape_cast %38 : vector<1x40x40xf32> to vector<40x40xf32>
    %cst_21 = arith.constant dense<0.000000e+00> : vector<40x384xf32>
    %40 = tpu.matmul %39, %37, %cst_21 {dimension_numbers = #tpu.dot_dimension_numbers<[1], [0], [0], [1], [0, 0, 1, 1], [], []>} : vector<40x40xf32>, vector<40x384xf32>, vector<40x384xf32> -> vector<40x384xf32>
    %41 = arith.addf %34, %40 : vector<40x384xf32>
    %42 = vector.extract_strided_slice %2 {offsets = [0, 17], sizes = [40, 367], strides = [1, 1]} : vector<40x384xf32> to vector<40x367xf32>
    %43 = vector.extract_strided_slice %2 {offsets = [0, 0], sizes = [40, 17], strides = [1, 1]} : vector<40x384xf32> to vector<40x17xf32>
    %44 = tpu.concatenate %42, %43 in 1 : vector<40x367xf32>, vector<40x17xf32> -> vector<40x384xf32>
    %c6 = arith.constant 6 : index
    %c0_22 = arith.constant 0 : index
    %c0_23 = arith.constant 0 : index
    %45 = vector.load %arg2[%c6, %c0_22, %c0_23] : memref<9x40x40xf32, #tpu.memory_space<vmem>>, vector<1x40x40xf32>
    %46 = vector.shape_cast %45 : vector<1x40x40xf32> to vector<40x40xf32>
    %cst_24 = arith.constant dense<0.000000e+00> : vector<40x384xf32>
    %47 = tpu.matmul %46, %44, %cst_24 {dimension_numbers = #tpu.dot_dimension_numbers<[1], [0], [0], [1], [0, 0, 1, 1], [], []>} : vector<40x40xf32>, vector<40x384xf32>, vector<40x384xf32> -> vector<40x384xf32>
    %48 = arith.addf %41, %47 : vector<40x384xf32>
    %49 = vector.extract_strided_slice %2 {offsets = [0, 18], sizes = [40, 366], strides = [1, 1]} : vector<40x384xf32> to vector<40x366xf32>
    %50 = vector.extract_strided_slice %2 {offsets = [0, 0], sizes = [40, 18], strides = [1, 1]} : vector<40x384xf32> to vector<40x18xf32>
    %51 = tpu.concatenate %49, %50 in 1 : vector<40x366xf32>, vector<40x18xf32> -> vector<40x384xf32>
    %c7 = arith.constant 7 : index
    %c0_25 = arith.constant 0 : index
    %c0_26 = arith.constant 0 : index
    %52 = vector.load %arg2[%c7, %c0_25, %c0_26] : memref<9x40x40xf32, #tpu.memory_space<vmem>>, vector<1x40x40xf32>
    %53 = vector.shape_cast %52 : vector<1x40x40xf32> to vector<40x40xf32>
    %cst_27 = arith.constant dense<0.000000e+00> : vector<40x384xf32>
    %54 = tpu.matmul %53, %51, %cst_27 {dimension_numbers = #tpu.dot_dimension_numbers<[1], [0], [0], [1], [0, 0, 1, 1], [], []>} : vector<40x40xf32>, vector<40x384xf32>, vector<40x384xf32> -> vector<40x384xf32>
    %55 = arith.addf %48, %54 : vector<40x384xf32>
    %56 = vector.extract_strided_slice %2 {offsets = [0, 19], sizes = [40, 365], strides = [1, 1]} : vector<40x384xf32> to vector<40x365xf32>
    %57 = vector.extract_strided_slice %2 {offsets = [0, 0], sizes = [40, 19], strides = [1, 1]} : vector<40x384xf32> to vector<40x19xf32>
    %58 = tpu.concatenate %56, %57 in 1 : vector<40x365xf32>, vector<40x19xf32> -> vector<40x384xf32>
    %c8 = arith.constant 8 : index
    %c0_28 = arith.constant 0 : index
    %c0_29 = arith.constant 0 : index
    %59 = vector.load %arg2[%c8, %c0_28, %c0_29] : memref<9x40x40xf32, #tpu.memory_space<vmem>>, vector<1x40x40xf32>
    %60 = vector.shape_cast %59 : vector<1x40x40xf32> to vector<40x40xf32>
    %cst_30 = arith.constant dense<0.000000e+00> : vector<40x384xf32>
    %61 = tpu.matmul %60, %58, %cst_30 {dimension_numbers = #tpu.dot_dimension_numbers<[1], [0], [0], [1], [0, 0, 1, 1], [], []>} : vector<40x40xf32>, vector<40x384xf32>, vector<40x384xf32> -> vector<40x384xf32>
    %62 = arith.addf %55, %61 : vector<40x384xf32>
    %c0_31 = arith.constant 0 : index
    %c0_32 = arith.constant 0 : index
    %63 = vector.load %arg4[%c0_31, %c0_32] : memref<40x1xf32, #tpu.memory_space<vmem>>, vector<40x1xf32>
    %64 = vector.broadcast %63 : vector<40x1xf32> to vector<40x384xf32>
    %65 = arith.addf %62, %64 : vector<40x384xf32>
    %cst_33 = arith.constant 0.000000e+00 : f32
    %66 = vector.broadcast %cst_33 : f32 to vector<40x384xf32>
    %67 = arith.maximumf %65, %66 : vector<40x384xf32>
    %68 = vector.broadcast %3 : vector<1x384xf32> to vector<40x384xf32>
    %69 = arith.mulf %67, %68 : vector<40x384xf32>
    %70 = vector.extract_strided_slice %2 {offsets = [4, 0], sizes = [32, 384], strides = [1, 1]} : vector<40x384xf32> to vector<32x384xf32>
    %71 = vector.extract_strided_slice %69 {offsets = [0, 365], sizes = [40, 19], strides = [1, 1]} : vector<40x384xf32> to vector<40x19xf32>
    %72 = vector.extract_strided_slice %69 {offsets = [0, 0], sizes = [40, 365], strides = [1, 1]} : vector<40x384xf32> to vector<40x365xf32>
    %73 = tpu.concatenate %71, %72 in 1 : vector<40x19xf32>, vector<40x365xf32> -> vector<40x384xf32>
    %c0_34 = arith.constant 0 : index
    %c0_35 = arith.constant 0 : index
    %c0_36 = arith.constant 0 : index
    %74 = vector.load %arg3[%c0_34, %c0_35, %c0_36] : memref<9x32x40xf32, #tpu.memory_space<vmem>>, vector<1x32x40xf32>
    %75 = vector.shape_cast %74 : vector<1x32x40xf32> to vector<32x40xf32>
    %cst_37 = arith.constant dense<0.000000e+00> : vector<32x384xf32>
    %76 = tpu.matmul %75, %73, %cst_37 {dimension_numbers = #tpu.dot_dimension_numbers<[1], [0], [0], [1], [0, 0, 1, 1], [], []>} : vector<32x40xf32>, vector<40x384xf32>, vector<32x384xf32> -> vector<32x384xf32>
    %77 = vector.extract_strided_slice %69 {offsets = [0, 366], sizes = [40, 18], strides = [1, 1]} : vector<40x384xf32> to vector<40x18xf32>
    %78 = vector.extract_strided_slice %69 {offsets = [0, 0], sizes = [40, 366], strides = [1, 1]} : vector<40x384xf32> to vector<40x366xf32>
    %79 = tpu.concatenate %77, %78 in 1 : vector<40x18xf32>, vector<40x366xf32> -> vector<40x384xf32>
    %c1_38 = arith.constant 1 : index
    %c0_39 = arith.constant 0 : index
    %c0_40 = arith.constant 0 : index
    %80 = vector.load %arg3[%c1_38, %c0_39, %c0_40] : memref<9x32x40xf32, #tpu.memory_space<vmem>>, vector<1x32x40xf32>
    %81 = vector.shape_cast %80 : vector<1x32x40xf32> to vector<32x40xf32>
    %cst_41 = arith.constant dense<0.000000e+00> : vector<32x384xf32>
    %82 = tpu.matmul %81, %79, %cst_41 {dimension_numbers = #tpu.dot_dimension_numbers<[1], [0], [0], [1], [0, 0, 1, 1], [], []>} : vector<32x40xf32>, vector<40x384xf32>, vector<32x384xf32> -> vector<32x384xf32>
    %83 = arith.addf %76, %82 : vector<32x384xf32>
    %84 = vector.extract_strided_slice %69 {offsets = [0, 367], sizes = [40, 17], strides = [1, 1]} : vector<40x384xf32> to vector<40x17xf32>
    %85 = vector.extract_strided_slice %69 {offsets = [0, 0], sizes = [40, 367], strides = [1, 1]} : vector<40x384xf32> to vector<40x367xf32>
    %86 = tpu.concatenate %84, %85 in 1 : vector<40x17xf32>, vector<40x367xf32> -> vector<40x384xf32>
    %c2_42 = arith.constant 2 : index
    %c0_43 = arith.constant 0 : index
    %c0_44 = arith.constant 0 : index
    %87 = vector.load %arg3[%c2_42, %c0_43, %c0_44] : memref<9x32x40xf32, #tpu.memory_space<vmem>>, vector<1x32x40xf32>
    %88 = vector.shape_cast %87 : vector<1x32x40xf32> to vector<32x40xf32>
    %cst_45 = arith.constant dense<0.000000e+00> : vector<32x384xf32>
    %89 = tpu.matmul %88, %86, %cst_45 {dimension_numbers = #tpu.dot_dimension_numbers<[1], [0], [0], [1], [0, 0, 1, 1], [], []>} : vector<32x40xf32>, vector<40x384xf32>, vector<32x384xf32> -> vector<32x384xf32>
    %90 = arith.addf %83, %89 : vector<32x384xf32>
    %91 = vector.extract_strided_slice %69 {offsets = [0, 383], sizes = [40, 1], strides = [1, 1]} : vector<40x384xf32> to vector<40x1xf32>
    %92 = vector.extract_strided_slice %69 {offsets = [0, 0], sizes = [40, 383], strides = [1, 1]} : vector<40x384xf32> to vector<40x383xf32>
    %93 = tpu.concatenate %91, %92 in 1 : vector<40x1xf32>, vector<40x383xf32> -> vector<40x384xf32>
    %c3_46 = arith.constant 3 : index
    %c0_47 = arith.constant 0 : index
    %c0_48 = arith.constant 0 : index
    %94 = vector.load %arg3[%c3_46, %c0_47, %c0_48] : memref<9x32x40xf32, #tpu.memory_space<vmem>>, vector<1x32x40xf32>
    %95 = vector.shape_cast %94 : vector<1x32x40xf32> to vector<32x40xf32>
    %cst_49 = arith.constant dense<0.000000e+00> : vector<32x384xf32>
    %96 = tpu.matmul %95, %93, %cst_49 {dimension_numbers = #tpu.dot_dimension_numbers<[1], [0], [0], [1], [0, 0, 1, 1], [], []>} : vector<32x40xf32>, vector<40x384xf32>, vector<32x384xf32> -> vector<32x384xf32>
    %97 = arith.addf %90, %96 : vector<32x384xf32>
    %c4_50 = arith.constant 4 : index
    %c0_51 = arith.constant 0 : index
    %c0_52 = arith.constant 0 : index
    %98 = vector.load %arg3[%c4_50, %c0_51, %c0_52] : memref<9x32x40xf32, #tpu.memory_space<vmem>>, vector<1x32x40xf32>
    %99 = vector.shape_cast %98 : vector<1x32x40xf32> to vector<32x40xf32>
    %cst_53 = arith.constant dense<0.000000e+00> : vector<32x384xf32>
    %100 = tpu.matmul %99, %69, %cst_53 {dimension_numbers = #tpu.dot_dimension_numbers<[1], [0], [0], [1], [0, 0, 1, 1], [], []>} : vector<32x40xf32>, vector<40x384xf32>, vector<32x384xf32> -> vector<32x384xf32>
    %101 = arith.addf %97, %100 : vector<32x384xf32>
    %102 = vector.extract_strided_slice %69 {offsets = [0, 1], sizes = [40, 383], strides = [1, 1]} : vector<40x384xf32> to vector<40x383xf32>
    %103 = vector.extract_strided_slice %69 {offsets = [0, 0], sizes = [40, 1], strides = [1, 1]} : vector<40x384xf32> to vector<40x1xf32>
    %104 = tpu.concatenate %102, %103 in 1 : vector<40x383xf32>, vector<40x1xf32> -> vector<40x384xf32>
    %c5_54 = arith.constant 5 : index
    %c0_55 = arith.constant 0 : index
    %c0_56 = arith.constant 0 : index
    %105 = vector.load %arg3[%c5_54, %c0_55, %c0_56] : memref<9x32x40xf32, #tpu.memory_space<vmem>>, vector<1x32x40xf32>
    %106 = vector.shape_cast %105 : vector<1x32x40xf32> to vector<32x40xf32>
    %cst_57 = arith.constant dense<0.000000e+00> : vector<32x384xf32>
    %107 = tpu.matmul %106, %104, %cst_57 {dimension_numbers = #tpu.dot_dimension_numbers<[1], [0], [0], [1], [0, 0, 1, 1], [], []>} : vector<32x40xf32>, vector<40x384xf32>, vector<32x384xf32> -> vector<32x384xf32>
    %108 = arith.addf %101, %107 : vector<32x384xf32>
    %109 = vector.extract_strided_slice %69 {offsets = [0, 17], sizes = [40, 367], strides = [1, 1]} : vector<40x384xf32> to vector<40x367xf32>
    %110 = vector.extract_strided_slice %69 {offsets = [0, 0], sizes = [40, 17], strides = [1, 1]} : vector<40x384xf32> to vector<40x17xf32>
    %111 = tpu.concatenate %109, %110 in 1 : vector<40x367xf32>, vector<40x17xf32> -> vector<40x384xf32>
    %c6_58 = arith.constant 6 : index
    %c0_59 = arith.constant 0 : index
    %c0_60 = arith.constant 0 : index
    %112 = vector.load %arg3[%c6_58, %c0_59, %c0_60] : memref<9x32x40xf32, #tpu.memory_space<vmem>>, vector<1x32x40xf32>
    %113 = vector.shape_cast %112 : vector<1x32x40xf32> to vector<32x40xf32>
    %cst_61 = arith.constant dense<0.000000e+00> : vector<32x384xf32>
    %114 = tpu.matmul %113, %111, %cst_61 {dimension_numbers = #tpu.dot_dimension_numbers<[1], [0], [0], [1], [0, 0, 1, 1], [], []>} : vector<32x40xf32>, vector<40x384xf32>, vector<32x384xf32> -> vector<32x384xf32>
    %115 = arith.addf %108, %114 : vector<32x384xf32>
    %116 = vector.extract_strided_slice %69 {offsets = [0, 18], sizes = [40, 366], strides = [1, 1]} : vector<40x384xf32> to vector<40x366xf32>
    %117 = vector.extract_strided_slice %69 {offsets = [0, 0], sizes = [40, 18], strides = [1, 1]} : vector<40x384xf32> to vector<40x18xf32>
    %118 = tpu.concatenate %116, %117 in 1 : vector<40x366xf32>, vector<40x18xf32> -> vector<40x384xf32>
    %c7_62 = arith.constant 7 : index
    %c0_63 = arith.constant 0 : index
    %c0_64 = arith.constant 0 : index
    %119 = vector.load %arg3[%c7_62, %c0_63, %c0_64] : memref<9x32x40xf32, #tpu.memory_space<vmem>>, vector<1x32x40xf32>
    %120 = vector.shape_cast %119 : vector<1x32x40xf32> to vector<32x40xf32>
    %cst_65 = arith.constant dense<0.000000e+00> : vector<32x384xf32>
    %121 = tpu.matmul %120, %118, %cst_65 {dimension_numbers = #tpu.dot_dimension_numbers<[1], [0], [0], [1], [0, 0, 1, 1], [], []>} : vector<32x40xf32>, vector<40x384xf32>, vector<32x384xf32> -> vector<32x384xf32>
    %122 = arith.addf %115, %121 : vector<32x384xf32>
    %123 = vector.extract_strided_slice %69 {offsets = [0, 19], sizes = [40, 365], strides = [1, 1]} : vector<40x384xf32> to vector<40x365xf32>
    %124 = vector.extract_strided_slice %69 {offsets = [0, 0], sizes = [40, 19], strides = [1, 1]} : vector<40x384xf32> to vector<40x19xf32>
    %125 = tpu.concatenate %123, %124 in 1 : vector<40x365xf32>, vector<40x19xf32> -> vector<40x384xf32>
    %c8_66 = arith.constant 8 : index
    %c0_67 = arith.constant 0 : index
    %c0_68 = arith.constant 0 : index
    %126 = vector.load %arg3[%c8_66, %c0_67, %c0_68] : memref<9x32x40xf32, #tpu.memory_space<vmem>>, vector<1x32x40xf32>
    %127 = vector.shape_cast %126 : vector<1x32x40xf32> to vector<32x40xf32>
    %cst_69 = arith.constant dense<0.000000e+00> : vector<32x384xf32>
    %128 = tpu.matmul %127, %125, %cst_69 {dimension_numbers = #tpu.dot_dimension_numbers<[1], [0], [0], [1], [0, 0, 1, 1], [], []>} : vector<32x40xf32>, vector<40x384xf32>, vector<32x384xf32> -> vector<32x384xf32>
    %129 = arith.addf %122, %128 : vector<32x384xf32>
    %c0_70 = arith.constant 0 : index
    %c0_71 = arith.constant 0 : index
    %130 = vector.load %arg5[%c0_70, %c0_71] : memref<32x1xf32, #tpu.memory_space<vmem>>, vector<32x1xf32>
    %131 = vector.broadcast %130 : vector<32x1xf32> to vector<32x384xf32>
    %132 = arith.addf %129, %131 : vector<32x384xf32>
    %133 = arith.addf %132, %70 : vector<32x384xf32>
    %cst_72 = arith.constant 0.000000e+00 : f32
    %134 = vector.broadcast %cst_72 : f32 to vector<32x384xf32>
    %135 = arith.maximumf %133, %134 : vector<32x384xf32>
    %c0_73 = arith.constant 0 : index
    %c0_74 = arith.constant 0 : index
    %c0_75 = arith.constant 0 : index
    %136 = vector.load %arg7[%c0_73, %c0_74, %c0_75] : memref<1x32x384xf32, #tpu.memory_space<vmem>>, vector<1x32x384xf32>
    %137 = vector.shape_cast %136 : vector<1x32x384xf32> to vector<32x384xf32>
    %138 = vector.shape_cast %135 : vector<32x384xf32> to vector<1x32x384xf32>
    tpu.vector_store %arg7[%c0_73, %c0_74, %c0_75], %138 {strides = array<i32>} : memref<1x32x384xf32, #tpu.memory_space<vmem>>, vector<1x32x384xf32>,
    return
  }
  func.func @transform_0(%arg0: i32) -> (i32, i32, i32) {
    %c0_i32 = arith.constant 0 : i32
    %c0_i32_0 = arith.constant 0 : i32
    %c0_i32_1 = arith.constant 0 : i32
    return %arg0, %c0_i32, %c0_i32_0 : i32, i32, i32
  }
  func.func @transform_1(%arg0: i32) -> (i32, i32, i32) {
    %c0_i32 = arith.constant 0 : i32
    %c0_i32_0 = arith.constant 0 : i32
    %c0_i32_1 = arith.constant 0 : i32
    %c0_i32_2 = arith.constant 0 : i32
    return %c0_i32, %c0_i32_0, %c0_i32_1 : i32, i32, i32
  }
  func.func @transform_2(%arg0: i32) -> (i32, i32, i32) {
    %c0_i32 = arith.constant 0 : i32
    %c0_i32_0 = arith.constant 0 : i32
    %c0_i32_1 = arith.constant 0 : i32
    %c0_i32_2 = arith.constant 0 : i32
    return %c0_i32, %c0_i32_0, %c0_i32_1 : i32, i32, i32
  }
  func.func @transform_3(%arg0: i32) -> (i32, i32) {
    %c0_i32 = arith.constant 0 : i32
    %c0_i32_0 = arith.constant 0 : i32
    %c0_i32_1 = arith.constant 0 : i32
    return %c0_i32, %c0_i32_0 : i32, i32
  }
  func.func @transform_4(%arg0: i32) -> (i32, i32) {
    %c0_i32 = arith.constant 0 : i32
    %c0_i32_0 = arith.constant 0 : i32
    %c0_i32_1 = arith.constant 0 : i32
    return %c0_i32, %c0_i32_0 : i32, i32
  }
  func.func @transform_5(%arg0: i32) -> (i32, i32) {
    %c0_i32 = arith.constant 0 : i32
    %c0_i32_0 = arith.constant 0 : i32
    %c0_i32_1 = arith.constant 0 : i32
    return %c0_i32, %c0_i32_0 : i32, i32
  }
  func.func @transform_6(%arg0: i32) -> (i32, i32, i32) {
    %c0_i32 = arith.constant 0 : i32
    %c0_i32_0 = arith.constant 0 : i32
    %c0_i32_1 = arith.constant 0 : i32
    return %arg0, %c0_i32, %c0_i32_0 : i32, i32, i32
  }
}

</mosaic_0001>

<bundles_post_ra>
// kernel: tile.10
= control target key start
LH: loop header
LB: loop body
LE: loop exit
PB: predicated region body
PF: predicated region fallthrough
CT: control target
= control target key end

     0   :  { %s22_s0 = inlined_call_operand.vmem [shape: f32[4], index: 0, kind: input, shape index: {}]   ;;  %s23_s1 = inlined_call_operand.vmem [shape: f32[8,4], index: 1, kind: output, shape index: {}]  }
   0x1   :  { %v4_v0 = vld [vmem:[%s22_s0] ss:$0 sm:$0xff] }
   0x2   :  { %5 = vst [vmem:[%s23_s1] sm:$0xff] %v4_v0 }

// kernel: tile.11
= control target key start
LH: loop header
LB: loop body
LE: loop exit
PB: predicated region body
PF: predicated region fallthrough
CT: control target
= control target key end

     0   :  { %s69_s10 = smov 28   ;;  %s70_s11 = smov 20   ;;  %vm3_vm0 = vcmask 31744   ;;  %vm9_vm1 = vcmask 261344   ;;  %vm15_vm2 = vcmask 228544   ;;  %vm21_vm3 = vcmask 195744   ;;  %s113_s0 = inlined_call_operand.vmem [shape: f32[8,4], index: 0, kind: input, shape index: {}]   ;;  %s114_s1 = inlined_call_operand.vmem [shape: f32[32], index: 1, kind: output, shape index: {}]  }
   0x1   :  { %v55_v0 = vld [vmem:[%s113_s0 + $0x7] sm:$0x1]   ;;  %v57_v1 = vld [vmem:[%s113_s0 + $0x5] sm:$0x1]   ;;  %v56_v2 = vld [vmem:[%s113_s0 + $0x6] sm:$0x1]  }
   0x2   :  { %7 = vrot.lane.b32.xlu0 %v55_v0, %s69_s10  ;;  %19 = vrot.lane.b32.xlu1 %v57_v1, %s70_s11  ;;  %v58_v3 = vld [vmem:[%s113_s0 + $0x4] sm:$0x1]   ;;  %v2_v4 = vld [vmem:[%s113_s0] sm:$0x1]   ;;  %s71_s18 = smov 24   ;;  %s72_s19 = smov 16  }
   0x3   :  { %4 = vst.msk [vmem:[#allocation0] sm:$0x1] %vm3_vm0, %v2_v4   ;;  %v59_v5 = vld [vmem:[%s113_s0 + $0x3] sm:$0x1]   ;;  %v60_v6 = vld [vmem:[%s113_s0 + $0x2] sm:$0x1]  }
   0x4   :  { %s73_s24 = smov 12   ;;  %s74_s25 = smov 8   ;;  %v61_v7 = vld [vmem:[%s113_s0 + $0x1] sm:$0x1]   ;;  %vm27_vm4 = vcmask 162944   ;;  %vm33_vm5 = vcmask 130144  }
   0x5   :  { %s75_s0 = smov 4   ;;  %vm39_vm6 = vcmask 97344   ;;  %vm45_vm7 = vcmask 64544  }
   0x6   :  { %13 = vrot.lane.b32.xlu0 %v56_v2, %s71_s18  ;;  %25 = vrot.lane.b32.xlu1 %v58_v3, %s72_s19 }
   0xa   :  { %31 = vrot.lane.b32.xlu0 %v59_v5, %s73_s24  ;;  %37 = vrot.lane.b32.xlu1 %v60_v6, %s74_s25 }
   0xe   :  { %43 = vrot.lane.b32.xlu0 %v61_v7, %s75_s0 }
  0x74   :  { %v8_v8 = vpop.permute.xlu0 %7   ;;  %v20_v9 = vpop.permute.xlu1 %19  }
  0x75   :  { %10 = vst.msk [vmem:[#allocation0] sm:$0x1] %vm9_vm1, %v8_v8  }
  0x78   :  { %v14_v10 = vpop.permute.xlu0 %13   ;;  %v26_v11 = vpop.permute.xlu1 %25  }
  0x79   :  { %16 = vst.msk [vmem:[#allocation0] sm:$0x1] %vm15_vm2, %v14_v10  }
  0x7a   :  { %22 = vst.msk [vmem:[#allocation0] sm:$0x1] %vm21_vm3, %v20_v9  }
  0x7b   :  { %28 = vst.msk [vmem:[#allocation0] sm:$0x1] %vm27_vm4, %v26_v11  }
  0x7c   :  { %v32_v12 = vpop.permute.xlu0 %31   ;;  %v38_v13 = vpop.permute.xlu1 %37  }
  0x7d   :  { %34 = vst.msk [vmem:[#allocation0] sm:$0x1] %vm33_vm5, %v32_v12  }
  0x7e   :  { %40 = vst.msk [vmem:[#allocation0] sm:$0x1] %vm39_vm6, %v38_v13  }
  0x80   :  { %v44_v14 = vpop.permute.xlu0 %43  }
  0x81   :  { %46 = vst.msk [vmem:[#allocation0] sm:$0x1] %vm45_vm7, %v44_v14  }
  0x88   :  { %v51_v15 = vld [vmem:[#allocation0] sm:$0x1] }
  0x89   :  { %54 = vst [vmem:[%s114_s1] sm:$0x1] %v51_v15 }

// kernel: tile.0
= control target key start
LH: loop header
LB: loop body
LE: loop exit
PB: predicated region body
PF: predicated region fallthrough
CT: control target
= control target key end

     0   :  { %vm3_vm0 = vcmask 7168   ;;  %s30_s8 = smov 125   ;;  %s31_s11 = smov 126   ;;  %s57_s0 = inlined_call_operand.vmem [shape: f32[8,4], index: 0, kind: input, shape index: {}]   ;;  %s58_s1 = inlined_call_operand.vmem [shape: f32[32,1], index: 1, kind: output, shape index: {}]  }
   0x1   :  { %v5_v0 = vld [vmem:[%s57_s0] sm:$0xff]   ;;  %s29_s0 = smov 127  }
   0x2   :  { %6 = vrot.lane.b32.xlu0 %v5_v0, %s29_s0  ;;  %18 = vrot.lane.b32.xlu1 %v5_v0, %s30_s8  ;;  %4 = vst.msk [vmem:[%s58_s1] ss:$4 sm:$0xff] %vm3_vm0, %v5_v0  }
   0x6   :  { %12 = vrot.lane.b32.xlu0 %v5_v0, %s31_s11 }
  0x74   :  { %v7_v1 = vpop.permute.xlu0 %6   ;;  %v19_v2 = vpop.permute.xlu1 %18  }
  0x75   :  { %23 = vst.msk [vmem:[%s58_s1 + $0x1] ss:$4 sm:$0xff] %vm3_vm0, %v7_v1   ;;  %25 = vst.msk [vmem:[%s58_s1 + $0x3] ss:$4 sm:$0xff] %vm3_vm0, %v19_v2  }
  0x78   :  { %v13_v3 = vpop.permute.xlu0 %12  }
  0x79   :  { %24 = vst.msk [vmem:[%s58_s1 + $0x2] ss:$4 sm:$0xff] %vm3_vm0, %v13_v3  }

// kernel: resblock3d_forward.1
= control target key start
LH: loop header
LB: loop body
LE: loop exit
PB: predicated region body
PF: predicated region fallthrough
CT: control target
= control target key end

     0   :  { %s6515_s21 = smov 0   ;;  %s8821_s0 = inlined_call_operand.vmem [shape: bf16[2,40,384], index: 0, kind: input, shape index: {}]   ;;  %s8822_s1 = inlined_call_operand.vmem [shape: f32[9,40,40], index: 1, kind: input, shape index: {}]   ;;  %s8823_s2 = inlined_call_operand.vmem [shape: f32[9,32,40], index: 2, kind: input, shape index: {}]   ;;  %s8824_s3 = inlined_call_operand.vmem [shape: f32[40,1], index: 3, kind: input, shape index: {}]   ;;  %s8825_s4 = inlined_call_operand.vmem [shape: f32[32,1], index: 4, kind: input, shape index: {}]   ;;  %s8826_s5 = inlined_call_operand.vmem [shape: f32[1,384], index: 5, kind: input, shape index: {}]   ;;  %s8827_s6 = inlined_call_operand.vmem [shape: f32[2,32,384], index: 6, kind: output, shape index: {}]  }
   0x1 LB: > { %s5375_s22 = sadd.s32 4294967295, %s6467_s21   ;;  %p5379_p0 = scmp.ge.s32.totalorder %s6467_s21, 1  ;;  %s6467_s21 = sphi %s6515_s21, %s16_s21  }
   0x2   : > { %p212_p1 = scmp.lt.s32.totalorder %s6467_s21, 3 }
   0x4   : > { %p213_p2 = pnand %p5379_p0, %p212_p1 }
   0x6   : > { %216 = sbr.rel (%p213_p2) target bundleno = 1111 (0x457), region = 44 }
   0xb   : > { %p242_p3 = scmp.lt.s32.totalorder %s5375_s22, 1  ;;  %v8828_v0 = vmov 0.0   ;;  %s6470_s27 = smov 18   ;;  %vm6471_vm0 = vmmov 0   ;;  %vm399_vm1 = vcmask 146432   ;;  %vm436_vm2 = vcmask 326656  }
   0xc   : > { %5789 = vmatprep.subr.mxu1 %v8828_v0  ;;  %516 = vmatprep.mubr.f32.mxu0 %v8828_v0  ;;  %s6472_s28 = smov 19   ;;  %s6473_s29 = smov 17   ;;  %vm328_vm3 = vcmask 154624   ;;  %vm872_vm4 = vcmask 138240   ;;  %vm1159_vm5 = vcmask 7168   ;;  %vm1662_vm6 = vcmask 1039360  }
   0xd   : > { %s9041_s22 = smov (!%p242_p3, %s5375_s22), 1  ;;  %5799 = vmatprep.mubr.msk.f32.mxu1 %vm6471_vm0, %v8828_v0  ;;  %s6474_s30 = smov 1   ;;  %vm1949_vm7 = vcmask 908288   ;;  %vm2236_vm8 = vcmask 900096   ;;  %vm2523_vm9 = vcmask 891904   ;;  %vm5244_vm10 = vcmask 1043456  }
   0xe   : > { %s6158_s23 = smul.u32 60, %s9041_s22  ;;  %s6475_s7 = smov 127  }
   0xf   : > { %s6476_s8 = smov 111   ;;  %s6477_s9 = smov 110  }
  0x10   : > { %s6531_s26 = scalar_lea.vmem %s8821_s0, %s6158_s23  ;;  %s6478_s10 = smov 109  }
  0x11   : > { %v260_v1 = vld [vmem:[%s6531_s26 + $0x30] sm:$0xff]  ;;  %v258_v2 = vld [vmem:[%s6531_s26 + $0x24] sm:$0xff]  ;;  %v259_v3 = vld [vmem:[%s6531_s26 + $0x2c] ss:$12 sps:$4 sm:$0xff]   ;;  %s6159_s23 = smul.u32 96, %s9041_s22 }
  0x12   : > { %v6536_v4 = vunpack.c.l.bf16 %v260_v1  ;;  %v6538_v5 = vunpack.c.h.bf16 %v260_v1  ;;  %v6540_v6 = vunpack.c.h.bf16 %v258_v2  ;;  %v6542_v7 = vunpack.c.l.bf16 %v259_v3  ;;  %v256_v8 = vld [vmem:[%s6531_s26 + $0x18] sm:$0xff]  ;;  %v254_v9 = vld [vmem:[%s6531_s26 + $0xc] sm:$0xff]  ;;  %v255_v10 = vld [vmem:[%s6531_s26 + $0x14] ss:$12 sps:$4 sm:$0xff]  }
  0x13   : > { %v6547_v11 = vunpack.c.l.bf16 %v258_v2  ;;  %v6549_v12 = vunpack.c.h.bf16 %v259_v3  ;;  %v6551_v13 = vunpack.c.l.bf16 %v256_v8  ;;  %v6553_v14 = vunpack.c.h.bf16 %v256_v8  ;;  %v252_v23 = vld [vmem:[%s6531_s26] sm:$0xff]  ;;  %v253_v28 = vld [vmem:[%s6531_s26 + $0x8] sm:$0xf]  ;;  %s8778_s25 = scalar_lea.vmem %s8827_s6, %s6159_s23 }
  0x14   : > { %8884 = vst [vmem:[#allocation2_spill] sm:$0xff] %v6536_v4  ;;  %8885 = vst [vmem:[#allocation3_spill] sm:$0xff] %v6538_v5  ;;  %v6179_v15 = vpack.i.bf16 %v6538_v5, %v6536_v4  ;;  %v6189_v16 = vpack.i.bf16 %v6542_v7, %v6540_v6  ;;  %v6559_v17 = vunpack.c.h.bf16 %v254_v9  ;;  %v6561_v18 = vunpack.c.l.bf16 %v255_v10 }
  0x15   : > { %8886 = vst [vmem:[#allocation4_spill] sm:$0xff] %v6540_v6  ;;  %8887 = vst [vmem:[#allocation5_spill] sm:$0xff] %v6542_v7  ;;  %v6184_v19 = vpack.i.bf16 %v6547_v11, %v6549_v12  ;;  %v6194_v20 = vpack.i.bf16 %v6553_v14, %v6551_v13  ;;  %v6569_v21 = vunpack.c.l.bf16 %v254_v9  ;;  %v6571_v22 = vunpack.c.h.bf16 %v255_v10 }
  0x16   : > { %8888 = vst [vmem:[#allocation6_spill] sm:$0xff] %v6547_v11  ;;  %8889 = vst [vmem:[#allocation7_spill] sm:$0xff] %v6549_v12  ;;  %6180 = vrot.lane.b32.xlu0 %v6179_v15, %s6470_s27  ;;  %6190 = vrot.lane.b32.xlu1 %v6189_v16, %s6470_s27  ;;  %v6204_v24 = vpack.i.bf16 %v6561_v18, %v6559_v17  ;;  %v6580_v26 = vunpack.c.l.bf16 %v252_v23  ;;  %v6582_v27 = vunpack.c.h.bf16 %v252_v23  ;;  %v6591_v30 = vunpack.c.l.bf16 %v253_v28 }
  0x17   : > { %8890 = vst [vmem:[#allocation8_spill] sm:$0xff] %v6551_v13  ;;  %8891 = vst [vmem:[#allocation9_spill] sm:$0xff] %v6553_v14  ;;  %v6199_v25 = vpack.i.bf16 %v6569_v21, %v6571_v22  ;;  %v6319_v31 = vpack.i.bf16 %v6549_v12, %v6538_v5  ;;  %v6324_v32 = vpack.i.bf16 %v6540_v6, %v6536_v4 }
  0x18   : > { %8892 = vst [vmem:[#allocation10_spill] sm:$0xff] %v6559_v17  ;;  %8893 = vst [vmem:[#allocation11_spill] sm:$0xff] %v6561_v18  ;;  %v6209_v29 = vpack.i.bf16 %v6582_v27, %v6580_v26  ;;  %v6329_v33 = vpack.i.bf16 %v6547_v11, %v6542_v7  ;;  %v6334_v34 = vpack.i.bf16 %v6571_v22, %v6553_v14 }
  0x19   : > { %8894 = vst [vmem:[#allocation12_spill] sm:$0xff] %v6569_v21  ;;  %8895 = vst [vmem:[#allocation13_spill] sm:$0xff] %v6571_v22  ;;  %v6339_v35 = vpack.i.bf16 %v6559_v17, %v6551_v13  ;;  %v6344_v36 = vpack.i.bf16 %v6569_v21, %v6561_v18  ;;  %v6643_v37 = vpack.i.bf16 %v6591_v30, %v6582_v27 }
  0x1a   : > { %6185 = vrot.lane.b32.xlu0 %v6184_v19, %s6470_s27  ;;  %6195 = vrot.lane.b32.xlu1 %v6194_v20, %s6470_s27  ;;  %8896 = vst [vmem:[#allocation14_spill] sm:$0xff] %v6580_v26  ;;  %8897 = vst [vmem:[#allocation15_spill] sm:$0xff] %v6582_v27 }
  0x1b   : > { %8898 = vst [vmem:[#allocation16_spill] sm:$0xff] %v6591_v30 }
  0x1e   : > { %6205 = vrot.lane.b32.xlu1 %v6204_v24, %s6470_s27  ;;  %6200 = vrot.lane.b32.xlu0 %v6199_v25, %s6470_s27 }
  0x22   : > { %6210 = vrot.lane.b32.xlu0 %v6209_v29, %s6470_s27  ;;  %364 = vrot.lane.b32.xlu1 %v6591_v30, %s6470_s27 }
  0x26   : > { %6215 = vrot.lane.b32.xlu0 %v6179_v15, %s6472_s28  ;;  %6220 = vrot.lane.b32.xlu1 %v6184_v19, %s6472_s28 }
  0x2a   : > { %6225 = vrot.lane.b32.xlu0 %v6189_v16, %s6472_s28  ;;  %6230 = vrot.lane.b32.xlu1 %v6194_v20, %s6472_s28 }
  0x2e   : > { %6235 = vrot.lane.b32.xlu0 %v6199_v25, %s6472_s28  ;;  %6240 = vrot.lane.b32.xlu1 %v6204_v24, %s6472_s28 }
  0x32   : > { %6245 = vrot.lane.b32.xlu0 %v6209_v29, %s6472_s28  ;;  %283 = vrot.lane.b32.xlu1 %v6591_v30, %s6472_s28 }
  0x36   : > { %6250 = vrot.lane.b32.xlu0 %v6179_v15, %s6473_s29  ;;  %6255 = vrot.lane.b32.xlu1 %v6184_v19, %s6473_s29 }
  0x3a   : > { %6260 = vrot.lane.b32.xlu0 %v6189_v16, %s6473_s29  ;;  %6265 = vrot.lane.b32.xlu1 %v6194_v20, %s6473_s29 }
  0x3e   : > { %6270 = vrot.lane.b32.xlu0 %v6199_v25, %s6473_s29  ;;  %6275 = vrot.lane.b32.xlu1 %v6204_v24, %s6473_s29 }
  0x42   : > { %6280 = vrot.lane.b32.xlu0 %v6209_v29, %s6473_s29  ;;  %837 = vrot.lane.b32.xlu1 %v6591_v30, %s6473_s29 }
  0x46   : > { %6285 = vrot.lane.b32.xlu0 %v6179_v15, %s6474_s30  ;;  %6290 = vrot.lane.b32.xlu1 %v6184_v19, %s6474_s30  ;;  %v5382_v19 = vld [vmem:[%s8822_s1 + $0x28] sm:$0xff] }
  0x4a   : > { %6295 = vrot.lane.b32.xlu0 %v6189_v16, %s6474_s30  ;;  %6300 = vrot.lane.b32.xlu1 %v6194_v20, %s6474_s30 }
  0x4e   : > { %6305 = vrot.lane.b32.xlu0 %v6199_v25, %s6474_s30  ;;  %6310 = vrot.lane.b32.xlu1 %v6204_v24, %s6474_s30 }
  0x52   : > { %6315 = vrot.lane.b32.xlu0 %v6209_v29, %s6474_s30  ;;  %1124 = vrot.lane.b32.xlu1 %v6591_v30, %s6474_s30 }
  0x56   : > { %6320 = vrot.lane.b32.xlu0 %v6319_v31, %s6475_s7  ;;  %6325 = vrot.lane.b32.xlu1 %v6324_v32, %s6475_s7 }
  0x5a   : > { %6330 = vrot.lane.b32.xlu0 %v6329_v33, %s6475_s7  ;;  %6335 = vrot.lane.b32.xlu1 %v6334_v34, %s6475_s7 }
  0x5e   : > { %6340 = vrot.lane.b32.xlu0 %v6339_v35, %s6475_s7  ;;  %6345 = vrot.lane.b32.xlu1 %v6344_v36, %s6475_s7 }
  0x62   : > { %6350 = vrot.lane.b32.xlu0 %v6643_v37, %s6475_s7  ;;  %1632 = vrot.lane.b32.xlu1 %v6580_v26, %s6475_s7 }
  0x66   : > { %6355 = vrot.lane.b32.xlu0 %v6319_v31, %s6476_s8  ;;  %6360 = vrot.lane.b32.xlu1 %v6324_v32, %s6476_s8 }
  0x6a   : > { %6365 = vrot.lane.b32.xlu0 %v6329_v33, %s6476_s8  ;;  %6370 = vrot.lane.b32.xlu1 %v6334_v34, %s6476_s8 }
  0x6e   : > { %6375 = vrot.lane.b32.xlu0 %v6339_v35, %s6476_s8  ;;  %6380 = vrot.lane.b32.xlu1 %v6344_v36, %s6476_s8 }
  0x72   : > { %6385 = vrot.lane.b32.xlu0 %v6643_v37, %s6476_s8  ;;  %1919 = vrot.lane.b32.xlu1 %v6580_v26, %s6476_s8 }
  0x76   : > { %6390 = vrot.lane.b32.xlu0 %v6319_v31, %s6477_s9  ;;  %6395 = vrot.lane.b32.xlu1 %v6324_v32, %s6477_s9 }
  0x7a   : > { %6400 = vrot.lane.b32.xlu0 %v6329_v33, %s6477_s9  ;;  %6405 = vrot.lane.b32.xlu1 %v6334_v34, %s6477_s9 }
  0x7e   : > { %6410 = vrot.lane.b32.xlu0 %v6339_v35, %s6477_s9  ;;  %6415 = vrot.lane.b32.xlu1 %v6344_v36, %s6477_s9 }
  0x82   : > { %6420 = vrot.lane.b32.xlu0 %v6643_v37, %s6477_s9  ;;  %2206 = vrot.lane.b32.xlu1 %v6580_v26, %s6477_s9 }
  0x86   : > { %6425 = vrot.lane.b32.xlu0 %v6319_v31, %s6478_s10  ;;  %6430 = vrot.lane.b32.xlu1 %v6324_v32, %s6478_s10 }
  0x88   : > { %v6181_v38 = vpop.permute.xlu0 %6180  ;;  %v6191_v39 = vpop.permute.xlu1 %6190 }
  0x89   : > { %v6183_v40 = vunpack.i.h.bf16 %v6181_v38  ;;  %v6182_v41 = vunpack.i.l.bf16 %v6181_v38  ;;  %v6193_v43 = vunpack.i.h.bf16 %v6191_v39  ;;  %v6192_v44 = vunpack.i.l.bf16 %v6191_v39 }
  0x8a   : > { %6435 = vrot.lane.b32.xlu0 %v6329_v33, %s6478_s10  ;;  %6440 = vrot.lane.b32.xlu1 %v6334_v34, %s6478_s10  ;;  %v5383_v33 = vld [vmem:[%s8822_s1 + $0x30] sm:$0xff] }
  0x8b   : > { %v408_v42 = vsel %vm399_vm1, %v6182_v41, %v6183_v40  ;;  %v407_v57 = vsel %vm399_vm1, %v6192_v44, %v6193_v43 }
  0x8c   : > { %474 = vmatprep.subr.mxu0 %v408_v42  ;;  %v6186_v45 = vpop.permute.xlu0 %6185  ;;  %v6196_v46 = vpop.permute.xlu1 %6195 }
  0x8d   : > { %v6188_v47 = vunpack.i.h.bf16 %v6186_v45  ;;  %v6187_v48 = vunpack.i.l.bf16 %v6186_v45  ;;  %v6198_v49 = vunpack.i.h.bf16 %v6196_v46  ;;  %v6197_v50 = vunpack.i.l.bf16 %v6196_v46 }
  0x8e   : > { %6445 = vrot.lane.b32.xlu0 %v6339_v35, %s6478_s10  ;;  %6450 = vrot.lane.b32.xlu1 %v6344_v36, %s6478_s10 }
  0x8f   : > { %v429_v51 = vsel %vm399_vm1, %v6187_v48, %v6182_v41  ;;  %v409_v52 = vsel %vm399_vm1, %v6183_v40, %v6187_v48  ;;  %v406_v53 = vsel %vm399_vm1, %v6188_v47, %v6192_v44  ;;  %v428_v56 = vsel %vm399_vm1, %v6193_v43, %v6188_v47  ;;  %v5384_v44 = vld [vmem:[%s8822_s1 + $0x38] sm:$0xff] }
  0x90   : > { %475 = vmatpush1.msra.mxu0 %v429_v51  ;;  %5790 = vmatpush3.msra.mxu1 %v409_v52  ;;  %v6206_v54 = vpop.permute.xlu1 %6205  ;;  %v6201_v55 = vpop.permute.xlu0 %6200  ;;  %v404_v58 = vsel %vm399_vm1, %v6197_v50, %v6198_v49 }
  0x91   : > { %v6208_v59 = vunpack.i.h.bf16 %v6206_v54  ;;  %v6207_v60 = vunpack.i.l.bf16 %v6206_v54  ;;  %v6203_v61 = vunpack.i.h.bf16 %v6201_v55  ;;  %v6202_v62 = vunpack.i.l.bf16 %v6201_v55  ;;  %476 = vmatprep.subr.mxu0 %v406_v53  ;;  %5791 = vmatprep.subr.mxu1 %v8828_v0  ;;  %v5385_v55 = vld [vmem:[%s8822_s1 + $0x40] sm:$0xff] }
  0x92   : > { %477 = vmatpush1.msra.mxu0 %v428_v56  ;;  %5792 = vmatpush3.msra.mxu1 %v407_v57 }
  0x93   : > { %478 = vmatprep.subr.mxu0 %v404_v58  ;;  %5793 = vmatprep.subr.mxu1 %v8828_v0  ;;  %v427_v63 = vsel %vm399_vm1, %v6202_v62, %v6197_v50  ;;  %v405_v1 = vsel %vm399_vm1, %v6198_v49, %v6202_v62  ;;  %v402_v2 = vsel %vm399_vm1, %v6203_v61, %v6207_v60 }
  0x94   : > { %479 = vmatpush1.msra.mxu0 %v427_v63  ;;  %5794 = vmatpush3.msra.mxu1 %v405_v1  ;;  %v6211_v3 = vpop.permute.xlu0 %6210  ;;  %v403_v8 = vsel %vm399_vm1, %v6207_v60, %v6208_v59  ;;  %v365_v9 = vpop.permute.xlu1 %364  ;;  %v426_v16 = vsel %vm399_vm1, %v6208_v59, %v6203_v61  ;;  %v5386_v1 = vld [vmem:[%s8822_s1 + $0x48] sm:$0xff] }
  0x95   : > { %v6213_v10 = vunpack.i.h.bf16 %v6211_v3  ;;  %v6212_v15 = vunpack.i.l.bf16 %v6211_v3  ;;  %480 = vmatprep.subr.mxu0 %v402_v2  ;;  %5795 = vmatprep.subr.mxu1 %v8828_v0 }
  0x96   : > { %481 = vmatpush1.msra.mxu0 %v426_v16  ;;  %5796 = vmatpush3.msra.mxu1 %v403_v8 }
  0x97   : > { %5797 = vmatprep.subr.mxu1 %v8828_v0  ;;  %v400_v20 = vsel %vm399_vm1, %v6212_v15, %v6213_v10  ;;  %v401_v23 = vsel %vm399_vm1, %v6213_v10, %v365_v9  ;;  %v425_v24 = vsel %vm399_vm1, %v365_v9, %v6212_v15  ;;  %6455 = vrot.lane.b32.xlu0 %v6643_v37, %s6478_s10 }
  0x98   : > { %v6216_v25 = vpop.permute.xlu0 %6215  ;;  %482 = vmatprep.subr.mxu0 %v400_v20  ;;  %5798 = vmatpush3.msra.mxu1 %v401_v23  ;;  %v6221_v28 = vpop.permute.xlu1 %6220  ;;  %v359_v23 = vld [vmem:[%s8822_s1] sm:$0xff] }
  0x99   : > { %v6218_v29 = vunpack.i.h.bf16 %v6216_v25  ;;  %v6217_v31 = vunpack.i.l.bf16 %v6216_v25  ;;  %483 = vmatpush1.msra.mxu0 %v425_v24  ;;  %5800 = vmatmul.mubr.msk.f32.vlgmr.msra.gmra.mxu1 %vm436_vm2, %v5382_v19  ;;  %v6222_v32 = vunpack.i.l.bf16 %v6221_v28  ;;  %v6223_v34 = vunpack.i.h.bf16 %v6221_v28 }
  0x9a   : > { %5387 = vmatmul.mubr.msk.f32.vlgmr.msra.gmra.mxu0 %vm436_vm2, %v5382_v19  ;;  %5802 = vmatprep.mubr.msk.f32.mxu1 %vm6471_vm0, %v8828_v0 }
  0x9b   : > { %522 = vmatprep.mubr.f32.mxu0 %v8828_v0  ;;  %v337_v35 = vsel %vm328_vm3, %v6217_v31, %v6218_v29  ;;  %v358_v36 = vsel %vm328_vm3, %v6222_v32, %v6217_v31  ;;  %5814 = vmatprep.subr.mxu1 %v8828_v0  ;;  %v338_v37 = vsel %vm328_vm3, %v6218_v29, %v6222_v32 }
  0x9c   : > { %v6226_v38 = vpop.permute.xlu0 %6225  ;;  %674 = vmatprep.subr.mxu0 %v337_v35  ;;  %v6231_v39 = vpop.permute.xlu1 %6230  ;;  %5815 = vmatpush3.msra.mxu1 %v338_v37 }
  0x9d   : > { %v6228_v40 = vunpack.i.h.bf16 %v6226_v38  ;;  %v6227_v41 = vunpack.i.l.bf16 %v6226_v38  ;;  %5803 = vmatmul.mubr.msk.f32.gmra.mxu1 %vm436_vm2, %v5383_v33  ;;  %v6233_v42 = vunpack.i.h.bf16 %v6231_v39  ;;  %v6232_v43 = vunpack.i.l.bf16 %v6231_v39  ;;  %675 = vmatpush1.msra.mxu0 %v358_v36 }
  0x9e   : > { %5388 = vmatmul.mubr.msk.f32.gmra.mxu0 %vm436_vm2, %v5383_v33  ;;  %5805 = vmatprep.mubr.msk.f32.mxu1 %vm6471_vm0, %v8828_v0 }
  0x9f   : > { %v335_v45 = vsel %vm328_vm3, %v6223_v34, %v6227_v41  ;;  %528 = vmatprep.mubr.f32.mxu0 %v8828_v0  ;;  %v357_v46 = vsel %vm328_vm3, %v6228_v40, %v6223_v34  ;;  %5816 = vmatprep.subr.mxu1 %v8828_v0  ;;  %v336_v47 = vsel %vm328_vm3, %v6227_v41, %v6228_v40  ;;  %v360_v34 = vld [vmem:[%s8822_s1 + $0x8] sm:$0xff] }
  0xa0   : > { %676 = vmatprep.subr.mxu0 %v335_v45  ;;  %v6236_v48 = vpop.permute.xlu0 %6235  ;;  %v6241_v49 = vpop.permute.xlu1 %6240  ;;  %5817 = vmatpush3.msra.mxu1 %v336_v47  ;;  %v333_v50 = vsel %vm328_vm3, %v6232_v43, %v6233_v42 }
  0xa1   : > { %5806 = vmatmul.mubr.msk.f32.gmra.mxu1 %vm436_vm2, %v5384_v44  ;;  %677 = vmatpush1.msra.mxu0 %v357_v46  ;;  %v6238_v51 = vunpack.i.h.bf16 %v6236_v48  ;;  %v6237_v52 = vunpack.i.l.bf16 %v6236_v48  ;;  %v6243_v53 = vunpack.i.h.bf16 %v6241_v49  ;;  %v6242_v54 = vunpack.i.l.bf16 %v6241_v49 }
  0xa2   : > { %5389 = vmatmul.mubr.msk.f32.gmra.mxu0 %vm436_vm2, %v5384_v44  ;;  %5808 = vmatprep.mubr.msk.f32.mxu1 %vm6471_vm0, %v8828_v0 }
  0xa3   : > { %534 = vmatprep.mubr.f32.mxu0 %v8828_v0  ;;  %678 = vmatprep.subr.mxu0 %v333_v50  ;;  %v356_v56 = vsel %vm328_vm3, %v6237_v52, %v6232_v43  ;;  %v334_v57 = vsel %vm328_vm3, %v6233_v42, %v6237_v52  ;;  %v331_v58 = vsel %vm328_vm3, %v6238_v51, %v6242_v54  ;;  %v361_v43 = vld [vmem:[%s8822_s1 + $0x10] sm:$0xff]  ;;  %v362_v52 = vld [vmem:[%s8822_s1 + $0x18] sm:$0xff] }
  0xa4   : > { %5818 = vmatprep.subr.mxu1 %v8828_v0  ;;  %679 = vmatpush1.msra.mxu0 %v356_v56  ;;  %v6246_v59 = vpop.permute.xlu0 %6245  ;;  %v355_v60 = vsel %vm328_vm3, %v6243_v53, %v6238_v51  ;;  %v284_v61 = vpop.permute.xlu1 %283  ;;  %v332_v2 = vsel %vm328_vm3, %v6242_v54, %v6243_v53 }
  0xa5   : > { %5809 = vmatmul.mubr.msk.f32.gmra.mxu1 %vm436_vm2, %v5385_v55  ;;  %v6248_v62 = vunpack.i.h.bf16 %v6246_v59  ;;  %v6247_v63 = vunpack.i.l.bf16 %v6246_v59  ;;  %680 = vmatprep.subr.mxu0 %v331_v58 }
  0xa6   : > { %5390 = vmatmul.mubr.msk.f32.gmra.mxu0 %vm436_vm2, %v5385_v55  ;;  %5819 = vmatpush3.msra.mxu1 %v334_v57 }
  0xa7   : > { %5811 = vmatprep.mubr.msk.f32.mxu1 %vm6471_vm0, %v8828_v0  ;;  %681 = vmatpush1.msra.mxu0 %v355_v60  ;;  %v329_v3 = vsel %vm328_vm3, %v6247_v63, %v6248_v62  ;;  %v354_v9 = vsel %vm328_vm3, %v284_v61, %v6247_v63  ;;  %v330_v19 = vsel %vm328_vm3, %v6248_v62, %v284_v61  ;;  %v363_v60 = vld [vmem:[%s8822_s1 + $0x20] sm:$0xff] }
  0xa8   : > { %540 = vmatprep.mubr.f32.mxu0 %v8828_v0  ;;  %5820 = vmatprep.subr.mxu1 %v8828_v0  ;;  %v6251_v8 = vpop.permute.xlu0 %6250  ;;  %v6256_v10 = vpop.permute.xlu1 %6255 }
  0xa9   : > { %5812 = vmatmul.mubr.msk.f32.gmra.mxu1 %vm436_vm2, %v5386_v1  ;;  %682 = vmatprep.subr.mxu0 %v329_v3  ;;  %v6253_v15 = vunpack.i.h.bf16 %v6251_v8  ;;  %v6252_v16 = vunpack.i.l.bf16 %v6251_v8  ;;  %v6257_v20 = vunpack.i.l.bf16 %v6256_v10  ;;  %v6258_v24 = vunpack.i.h.bf16 %v6256_v10 }
  0xaa   : > { %5391 = vmatmul.mubr.msk.f32.gmra.mxu0 %vm436_vm2, %v5386_v1  ;;  %5821 = vmatpush3.msra.mxu1 %v332_v2 }
  0xab   : > { %5822 = vmatprep.subr.mxu1 %v8828_v0  ;;  %683 = vmatpush1.msra.mxu0 %v354_v9  ;;  %v881_v28 = vsel %vm872_vm4, %v6252_v16, %v6253_v15  ;;  %v902_v33 = vsel %vm872_vm4, %v6257_v20, %v6252_v16  ;;  %v882_v38 = vsel %vm872_vm4, %v6253_v15, %v6257_v20  ;;  %v5407_v9 = vld [vmem:[%s8822_s1 + $0x50] sm:$0xff] }
  0xac   : > { %5823 = vmatpush3.msra.mxu1 %v330_v19  ;;  %5824 = vmatprep.mubr.msk.f32.mxu1 %vm6471_vm0, %v8828_v0  ;;  %v6261_v25 = vpop.permute.xlu0 %6260  ;;  %v6266_v29 = vpop.permute.xlu1 %6265 }
  0xad   : > { %716 = vmatprep.mubr.f32.mxu0 %v8828_v0  ;;  %5825 = vmatmul.mubr.msk.f32.vlgmr.msra.gmra.mxu1 %vm436_vm2, %v359_v23  ;;  %v6263_v31 = vunpack.i.h.bf16 %v6261_v25  ;;  %v6262_v32 = vunpack.i.l.bf16 %v6261_v25  ;;  %v6268_v35 = vunpack.i.h.bf16 %v6266_v29  ;;  %v6267_v36 = vunpack.i.l.bf16 %v6266_v29 }
  0xae   : > { %5397 = vmatmul.mubr.msk.f32.vlgmr.msra.gmra.mxu0 %vm436_vm2, %v359_v23  ;;  %5827 = vmatprep.mubr.msk.f32.mxu1 %vm6471_vm0, %v8828_v0 }
  0xaf   : > { %722 = vmatprep.mubr.f32.mxu0 %v8828_v0  ;;  %946 = vmatprep.subr.mxu0 %v881_v28  ;;  %v879_v37 = vsel %vm872_vm4, %v6258_v24, %v6262_v32  ;;  %v901_v41 = vsel %vm872_vm4, %v6263_v31, %v6258_v24  ;;  %v877_v46 = vsel %vm872_vm4, %v6267_v36, %v6268_v35  ;;  %v5408_v24 = vld [vmem:[%s8822_s1 + $0x58] sm:$0xff] }
  0xb0   : > { %947 = vmatpush1.msra.mxu0 %v902_v33  ;;  %5839 = vmatprep.subr.mxu1 %v8828_v0  ;;  %v6271_v39 = vpop.permute.xlu0 %6270  ;;  %v6276_v40 = vpop.permute.xlu1 %6275  ;;  %v880_v48 = vsel %vm872_vm4, %v6262_v32, %v6263_v31 }
  0xb1   : > { %5828 = vmatmul.mubr.msk.f32.gmra.mxu1 %vm436_vm2, %v360_v34  ;;  %948 = vmatprep.subr.mxu0 %v879_v37  ;;  %v6272_v42 = vunpack.i.l.bf16 %v6271_v39  ;;  %v6273_v44 = vunpack.i.h.bf16 %v6271_v39  ;;  %v6277_v45 = vunpack.i.l.bf16 %v6276_v40  ;;  %v6278_v47 = vunpack.i.h.bf16 %v6276_v40 }
  0xb2   : > { %5398 = vmatmul.mubr.msk.f32.gmra.mxu0 %vm436_vm2, %v360_v34  ;;  %5830 = vmatprep.mubr.msk.f32.mxu1 %vm6471_vm0, %v8828_v0 }
  0xb3   : > { %5840 = vmatpush3.msra.mxu1 %v882_v38  ;;  %728 = vmatprep.mubr.f32.mxu0 %v8828_v0  ;;  %v900_v51 = vsel %vm872_vm4, %v6272_v42, %v6267_v36  ;;  %v875_v55 = vsel %vm872_vm4, %v6273_v44, %v6277_v45  ;;  %v878_v56 = vsel %vm872_vm4, %v6268_v35, %v6272_v42  ;;  %v5409_v36 = vld [vmem:[%s8822_s1 + $0x60] sm:$0xff] }
  0xb4   : > { %949 = vmatpush1.msra.mxu0 %v901_v41  ;;  %5841 = vmatprep.subr.mxu1 %v8828_v0  ;;  %v6281_v49 = vpop.permute.xlu0 %6280  ;;  %v838_v50 = vpop.permute.xlu1 %837  ;;  %v899_v57 = vsel %vm872_vm4, %v6278_v47, %v6273_v44  ;;  %v876_v62 = vsel %vm872_vm4, %v6277_v45, %v6278_v47  ;;  %v5410_v44 = vld [vmem:[%s8822_s1 + $0x68] sm:$0xff] }
  0xb5   : > { %5831 = vmatmul.mubr.msk.f32.gmra.mxu1 %vm436_vm2, %v361_v43  ;;  %950 = vmatprep.subr.mxu0 %v877_v46  ;;  %v6283_v53 = vunpack.i.h.bf16 %v6281_v49  ;;  %v6282_v54 = vunpack.i.l.bf16 %v6281_v49 }
  0xb6   : > { %5399 = vmatmul.mubr.msk.f32.gmra.mxu0 %vm436_vm2, %v361_v43  ;;  %5833 = vmatprep.mubr.msk.f32.mxu1 %vm6471_vm0, %v8828_v0 }
  0xb7   : > { %5842 = vmatpush3.msra.mxu1 %v880_v48  ;;  %734 = vmatprep.mubr.f32.mxu0 %v8828_v0  ;;  %v873_v61 = vsel %vm872_vm4, %v6282_v54, %v6283_v53  ;;  %v898_v63 = vsel %vm872_vm4, %v838_v50, %v6282_v54  ;;  %v874_v3 = vsel %vm872_vm4, %v6283_v53, %v838_v50 }
  0xb8   : > { %5843 = vmatprep.subr.mxu1 %v8828_v0  ;;  %951 = vmatpush1.msra.mxu0 %v900_v51  ;;  %v6286_v58 = vpop.permute.xlu0 %6285  ;;  %v6291_v59 = vpop.permute.xlu1 %6290  ;;  %v5411_v51 = vld [vmem:[%s8822_s1 + $0x70] sm:$0xff] }
  0xb9   : > { %5834 = vmatmul.mubr.msk.f32.gmra.mxu1 %vm436_vm2, %v362_v52  ;;  %952 = vmatprep.subr.mxu0 %v875_v55  ;;  %v6288_v1 = vunpack.i.h.bf16 %v6286_v58  ;;  %v6287_v2 = vunpack.i.l.bf16 %v6286_v58  ;;  %v6292_v10 = vunpack.i.l.bf16 %v6291_v59  ;;  %v6293_v16 = vunpack.i.h.bf16 %v6291_v59  ;;  %v5423_v58 = vld [vmem:[%s8822_s1 + $0x80] sm:$0xff] }
  0xba   : > { %5400 = vmatmul.mubr.msk.f32.gmra.mxu0 %vm436_vm2, %v362_v52  ;;  %5844 = vmatpush3.msra.mxu1 %v878_v56 }
  0xbb   : > { %5836 = vmatprep.mubr.msk.f32.mxu1 %vm6471_vm0, %v8828_v0  ;;  %953 = vmatpush1.msra.mxu0 %v899_v57  ;;  %v1168_v23 = vsel %vm1159_vm5, %v6287_v2, %v6288_v1  ;;  %v1189_v25 = vsel %vm1159_vm5, %v6292_v10, %v6287_v2  ;;  %v1169_v31 = vsel %vm1159_vm5, %v6288_v1, %v6292_v10  ;;  %v5422_v57 = vld [vmem:[%s8822_s1 + $0x78] sm:$0xff] }
  0xbc   : > { %740 = vmatprep.mubr.f32.mxu0 %v8828_v0  ;;  %5845 = vmatprep.subr.mxu1 %v8828_v0  ;;  %v6296_v8 = vpop.permute.xlu0 %6295  ;;  %v6301_v15 = vpop.permute.xlu1 %6300  ;;  %v5426_v2 = vld [vmem:[%s8822_s1 + $0x98] sm:$0xff] }
  0xbd   : > { %5837 = vmatmul.mubr.msk.f32.gmra.mxu1 %vm436_vm2, %v363_v60  ;;  %954 = vmatprep.subr.mxu0 %v873_v61  ;;  %v6297_v19 = vunpack.i.l.bf16 %v6296_v8  ;;  %v6298_v20 = vunpack.i.h.bf16 %v6296_v8  ;;  %v6303_v32 = vunpack.i.h.bf16 %v6301_v15  ;;  %v6302_v33 = vunpack.i.l.bf16 %v6301_v15  ;;  %v5437_v15 = vld [vmem:[%s8822_s1 + $0xa0] sm:$0xff] }
  0xbe   : > { %5401 = vmatmul.mubr.msk.f32.gmra.mxu0 %vm436_vm2, %v363_v60  ;;  %5846 = vmatpush3.msra.mxu1 %v876_v62  ;;  %v5424_v60 = vld [vmem:[%s8822_s1 + $0x88] sm:$0xff] }
  0xbf   : > { %5847 = vmatprep.subr.mxu1 %v8828_v0  ;;  %955 = vmatpush1.msra.mxu0 %v898_v63  ;;  %v1166_v29 = vsel %vm1159_vm5, %v6293_v16, %v6297_v19  ;;  %v1188_v34 = vsel %vm1159_vm5, %v6298_v20, %v6293_v16  ;;  %v1167_v40 = vsel %vm1159_vm5, %v6297_v19, %v6298_v20  ;;  %v5425_v63 = vld [vmem:[%s8822_s1 + $0x90] sm:$0xff] }
  0xc0   : > { %5848 = vmatpush3.msra.mxu1 %v874_v3  ;;  %5849 = vmatprep.mubr.msk.f32.mxu1 %vm6471_vm0, %v8828_v0  ;;  %v6306_v28 = vpop.permute.xlu0 %6305  ;;  %v6311_v35 = vpop.permute.xlu1 %6310  ;;  %v1164_v42 = vsel %vm1159_vm5, %v6302_v33, %v6303_v32 }
  0xc1   : > { %988 = vmatprep.mubr.f32.mxu0 %v8828_v0  ;;  %5850 = vmatmul.mubr.msk.f32.vlgmr.msra.gmra.mxu1 %vm436_vm2, %v5407_v9  ;;  %v6307_v37 = vunpack.i.l.bf16 %v6306_v28  ;;  %v6308_v38 = vunpack.i.h.bf16 %v6306_v28  ;;  %v6312_v39 = vunpack.i.l.bf16 %v6311_v35  ;;  %v6313_v41 = vunpack.i.h.bf16 %v6311_v35 }
  0xc2   : > { %5412 = vmatmul.mubr.msk.f32.vlgmr.msra.gmra.mxu0 %vm436_vm2, %v5407_v9  ;;  %2493 = vrot.lane.b32.xlu1 %v6580_v26, %s6478_s10 }
  0xc3   : > { %5852 = vmatprep.mubr.msk.f32.mxu1 %vm6471_vm0, %v8828_v0  ;;  %994 = vmatprep.mubr.f32.mxu0 %v8828_v0  ;;  %v1187_v45 = vsel %vm1159_vm5, %v6307_v37, %v6302_v33  ;;  %v1165_v46 = vsel %vm1159_vm5, %v6303_v32, %v6307_v37  ;;  %v1162_v49 = vsel %vm1159_vm5, %v6308_v38, %v6312_v39  ;;  %v5438_v33 = vld [vmem:[%s8822_s1 + $0xa8] sm:$0xff] }
  0xc4   : > { %1233 = vmatprep.subr.mxu0 %v1168_v23  ;;  %5864 = vmatprep.subr.mxu1 %v8828_v0  ;;  %v6316_v43 = vpop.permute.xlu0 %6315  ;;  %v1186_v50 = vsel %vm1159_vm5, %v6313_v41, %v6308_v38  ;;  %v1125_v52 = vpop.permute.xlu1 %1124  ;;  %v1163_v53 = vsel %vm1159_vm5, %v6312_v39, %v6313_v41 }
  0xc5   : > { %5853 = vmatmul.mubr.msk.f32.gmra.mxu1 %vm436_vm2, %v5408_v24  ;;  %1234 = vmatpush1.msra.mxu0 %v1189_v25  ;;  %v6318_v47 = vunpack.i.h.bf16 %v6316_v43  ;;  %v6317_v48 = vunpack.i.l.bf16 %v6316_v43 }
  0xc6   : > { %5413 = vmatmul.mubr.msk.f32.gmra.mxu0 %vm436_vm2, %v5408_v24  ;;  %5855 = vmatprep.mubr.msk.f32.mxu1 %vm6471_vm0, %v8828_v0 }
  0xc7   : > { %1235 = vmatprep.subr.mxu0 %v1166_v29  ;;  %5865 = vmatpush3.msra.mxu1 %v1169_v31  ;;  %v1160_v54 = vsel %vm1159_vm5, %v6317_v48, %v6318_v47  ;;  %v1185_v55 = vsel %vm1159_vm5, %v1125_v52, %v6317_v48  ;;  %v1161_v56 = vsel %vm1159_vm5, %v6318_v47, %v1125_v52 }
  0xc8   : > { %1000 = vmatprep.mubr.f32.mxu0 %v8828_v0  ;;  %1236 = vmatpush1.msra.mxu0 %v1188_v34  ;;  %v6321_v59 = vpop.permute.xlu0 %6320  ;;  %v6326_v61 = vpop.permute.xlu1 %6325 }
  0xc9   : > { %5856 = vmatmul.mubr.msk.f32.gmra.mxu1 %vm436_vm2, %v5409_v36  ;;  %5866 = vmatprep.subr.mxu1 %v8828_v0  ;;  %v6323_v8 = vunpack.i.h.bf16 %v6321_v59  ;;  %v6322_v9 = vunpack.i.l.bf16 %v6321_v59  ;;  %v6327_v10 = vunpack.i.l.bf16 %v6326_v61  ;;  %v6328_v19 = vunpack.i.h.bf16 %v6326_v61 }
  0xca   : > { %5414 = vmatmul.mubr.msk.f32.gmra.mxu0 %vm436_vm2, %v5409_v36  ;;  %5858 = vmatprep.mubr.msk.f32.mxu1 %vm6471_vm0, %v8828_v0 }
  0xcb   : > { %5867 = vmatpush3.msra.mxu1 %v1167_v40  ;;  %1006 = vmatprep.mubr.f32.mxu0 %v8828_v0  ;;  %v1672_v24 = vsel %vm1662_vm6, %v6322_v9, %v6323_v8  ;;  %v1671_v31 = vsel %vm1662_vm6, %v6327_v10, %v6322_v9  ;;  %v1697_v32 = vsel %vm1662_vm6, %v6323_v8, %v6327_v10  ;;  %v5439_v40 = vld [vmem:[%s8822_s1 + $0xb0] sm:$0xff] }
  0xcc   : > { %1237 = vmatprep.subr.mxu0 %v1164_v42  ;;  %5868 = vmatprep.subr.mxu1 %v8828_v0  ;;  %v6905_v62 = vpop.permute.xlu0 %6330  ;;  %v6919_v1 = vpop.permute.xlu1 %6335 }
  0xcd   : > { %5859 = vmatmul.mubr.msk.f32.gmra.mxu1 %vm436_vm2, %v5410_v44  ;;  %1238 = vmatpush1.msra.mxu0 %v1187_v45  ;;  %v6332_v20 = vunpack.i.l.bf16 %v6905_v62  ;;  %v6333_v23 = vunpack.i.h.bf16 %v6905_v62  ;;  %v6338_v28 = vunpack.i.h.bf16 %v6919_v1  ;;  %v6337_v29 = vunpack.i.l.bf16 %v6919_v1  ;;  %v5452_v1 = vld [vmem:[%s8822_s1 + $0xc8] sm:$0xff] }
  0xce   : > { %5415 = vmatmul.mubr.msk.f32.gmra.mxu0 %vm436_vm2, %v5410_v44  ;;  %5869 = vmatpush3.msra.mxu1 %v1165_v46 }
  0xcf   : > { %1239 = vmatprep.subr.mxu0 %v1162_v49  ;;  %5861 = vmatprep.mubr.msk.f32.mxu1 %vm6471_vm0, %v8828_v0  ;;  %v1670_v35 = vsel %vm1662_vm6, %v6328_v19, %v6332_v20  ;;  %v1669_v36 = vsel %vm1662_vm6, %v6333_v23, %v6328_v19  ;;  %v1668_v39 = vsel %vm1662_vm6, %v6337_v29, %v6338_v28 }
  0xd0   : > { %1240 = vmatpush1.msra.mxu0 %v1186_v50  ;;  %1012 = vmatprep.mubr.f32.mxu0 %v8828_v0  ;;  %v6929_v3 = vpop.permute.xlu0 %6340  ;;  %v6942_v16 = vpop.permute.xlu1 %6345  ;;  %v1696_v43 = vsel %vm1662_vm6, %v6332_v20, %v6333_v23  ;;  %v5440_v50 = vld [vmem:[%s8822_s1 + $0xb8] sm:$0xff]  ;;  %v5453_v23 = vld [vmem:[%s8822_s1 + $0xd0] sm:$0xff] }
  0xd1   : > { %5862 = vmatmul.mubr.msk.f32.gmra.mxu1 %vm436_vm2, %v5411_v51  ;;  %5870 = vmatprep.subr.mxu1 %v8828_v0  ;;  %v6342_v38 = vunpack.i.l.bf16 %v6929_v3  ;;  %v6343_v41 = vunpack.i.h.bf16 %v6929_v3  ;;  %v6347_v42 = vunpack.i.l.bf16 %v6942_v16  ;;  %v6348_v44 = vunpack.i.h.bf16 %v6942_v16 }
  0xd2   : > { %5416 = vmatmul.mubr.msk.f32.gmra.mxu0 %vm436_vm2, %v5411_v51  ;;  %5871 = vmatpush3.msra.mxu1 %v1163_v53 }
  0xd3   : > { %1241 = vmatprep.subr.mxu0 %v1160_v54  ;;  %5872 = vmatprep.subr.mxu1 %v8828_v0  ;;  %v1667_v46 = vsel %vm1662_vm6, %v6342_v38, %v6337_v29  ;;  %v1695_v47 = vsel %vm1662_vm6, %v6338_v28, %v6342_v38  ;;  %v1666_v52 = vsel %vm1662_vm6, %v6343_v41, %v6347_v42 }
  0xd4   : > { %1242 = vmatpush1.msra.mxu0 %v1185_v55  ;;  %5873 = vmatpush3.msra.mxu1 %v1161_v56  ;;  %v6952_v25 = vpop.permute.xlu0 %6350  ;;  %v1633_v34 = vpop.permute.xlu1 %1632  ;;  %v1665_v53 = vsel %vm1662_vm6, %v6348_v44, %v6343_v41  ;;  %v5441_v55 = vld [vmem:[%s8822_s1 + $0xc0] sm:$0xff] }
  0xd5   : > { %5874 = vmatprep.mubr.msk.f32.mxu1 %vm6471_vm0, %v8828_v0  ;;  %1275 = vmatprep.mubr.f32.mxu0 %v8828_v0  ;;  %v6353_v48 = vunpack.i.h.bf16 %v6952_v25  ;;  %v6352_v49 = vunpack.i.l.bf16 %v6952_v25 }
  0xd6   : > { %5875 = vmatmul.mubr.msk.f32.vlgmr.msra.gmra.mxu1 %vm436_vm2, %v5422_v57  ;;  %5427 = vmatmul.mubr.msk.f32.vlgmr.msra.gmra.mxu0 %vm436_vm2, %v5422_v57  ;;  %v1694_v57 = vsel %vm1662_vm6, %v6347_v42, %v6348_v44 }
  0xd7   : > { %5877 = vmatprep.mubr.msk.f32.mxu1 %vm6471_vm0, %v8828_v0  ;;  %1281 = vmatprep.mubr.f32.mxu0 %v8828_v0  ;;  %v1664_v54 = vsel %vm1662_vm6, %v6352_v49, %v6353_v48  ;;  %v1693_v62 = vsel %vm1662_vm6, %v6353_v48, %v1633_v34 }
  0xd8   : > { %5889 = vmatprep.subr.mxu1 %v8828_v0  ;;  %1454 = vmatprep.subr.mxu0 %v6538_v5  ;;  %v6969_v37 = vpop.permute.xlu0 %6355  ;;  %v6986_v45 = vpop.permute.xlu1 %6360 }
  0xd9   : > { %5890 = vmatpush3.msra.mxu1 %v6549_v12  ;;  %1455 = vmatpush1.msra.mxu0 %v6536_v4  ;;  %v6358_v59 = vunpack.i.h.bf16 %v6969_v37 }
  0xda   : > { %5878 = vmatmul.mubr.msk.f32.gmra.mxu1 %vm436_vm2, %v5423_v58  ;;  %5428 = vmatmul.mubr.msk.f32.gmra.mxu0 %vm436_vm2, %v5423_v58  ;;  %v1663_v58 = vsel %vm1662_vm6, %v1633_v34, %v6352_v49  ;;  %v5456_v49 = vld [vmem:[%s8822_s1 + $0xe8] sm:$0xff] }
  0xdb   : > { %5880 = vmatprep.mubr.msk.f32.mxu1 %vm6471_vm0, %v8828_v0  ;;  %1287 = vmatprep.mubr.f32.mxu0 %v8828_v0 }
  0xdc   : > { %5891 = vmatprep.subr.mxu1 %v8828_v0  ;;  %1456 = vmatprep.subr.mxu0 %v6540_v6  ;;  %v6999_v51 = vpop.permute.xlu0 %6365  ;;  %v7013_v56 = vpop.permute.xlu1 %6370 }
  0xdd   : > { %5892 = vmatpush3.msra.mxu1 %v6542_v7  ;;  %1457 = vmatpush1.msra.mxu0 %v6547_v11  ;;  %v6367_v3 = vunpack.i.l.bf16 %v6999_v51  ;;  %v6368_v8 = vunpack.i.h.bf16 %v6999_v51  ;;  %v6372_v16 = vunpack.i.l.bf16 %v7013_v56 }
  0xde   : > { %5881 = vmatmul.mubr.msk.f32.gmra.mxu1 %vm436_vm2, %v5424_v60  ;;  %5429 = vmatmul.mubr.msk.f32.gmra.mxu0 %vm436_vm2, %v5424_v60  ;;  %v6357_v60 = vunpack.i.l.bf16 %v6969_v37 }
  0xdf   : > { %5883 = vmatprep.mubr.msk.f32.mxu1 %vm6471_vm0, %v8828_v0  ;;  %1293 = vmatprep.mubr.f32.mxu0 %v8828_v0  ;;  %v1983_v37 = vsel %vm1949_vm7, %v6367_v3, %v6368_v8 }
  0xe0   : > { %5893 = vmatprep.subr.mxu1 %v8828_v0  ;;  %1458 = vmatprep.subr.mxu0 %v6553_v14  ;;  %v7021_v61 = vpop.permute.xlu0 %6375  ;;  %v1959_v9 = vsel %vm1949_vm7, %v6357_v60, %v6358_v59  ;;  %v6381_v10 = vpop.permute.xlu1 %6380 }
  0xe1   : > { %5894 = vmatpush3.msra.mxu1 %v6571_v22  ;;  %1459 = vmatpush1.msra.mxu0 %v6551_v13  ;;  %v6383_v38 = vunpack.i.h.bf16 %v6381_v10 }
  0xe2   : > { %5884 = vmatmul.mubr.msk.f32.gmra.mxu1 %vm436_vm2, %v5425_v63  ;;  %5430 = vmatmul.mubr.msk.f32.gmra.mxu0 %vm436_vm2, %v5425_v63  ;;  %v6362_v63 = vunpack.i.l.bf16 %v6986_v45 }
  0xe3   : > { %5886 = vmatprep.mubr.msk.f32.mxu1 %vm6471_vm0, %v8828_v0  ;;  %1299 = vmatprep.mubr.f32.mxu0 %v8828_v0 }
  0xe4   : > { %5895 = vmatprep.subr.mxu1 %v8828_v0  ;;  %1460 = vmatprep.subr.mxu0 %v6559_v17  ;;  %v1958_v19 = vsel %vm1949_vm7, %v6362_v63, %v6357_v60  ;;  %v1984_v20 = vsel %vm1949_vm7, %v6358_v59, %v6362_v63  ;;  %v1920_v29 = vpop.permute.xlu1 %1919 }
  0xe5   : > { %5896 = vmatpush3.msra.mxu1 %v6561_v18  ;;  %1461 = vmatpush1.msra.mxu0 %v6569_v21 }
  0xe6   : > { %5887 = vmatmul.mubr.msk.f32.gmra.mxu1 %vm436_vm2, %v5426_v2  ;;  %5431 = vmatmul.mubr.msk.f32.gmra.mxu0 %vm436_vm2, %v5426_v2  ;;  %v6363_v2 = vunpack.i.h.bf16 %v6986_v45 }
  0xe7   : > { %5897 = vmatprep.subr.mxu1 %v8828_v0  ;;  %1462 = vmatprep.subr.mxu0 %v6582_v27 }
  0xe8   : > { %5898 = vmatpush3.msra.mxu1 %v6591_v30  ;;  %5899 = vmatprep.mubr.msk.f32.mxu1 %vm6471_vm0, %v8828_v0  ;;  %v1957_v25 = vsel %vm1949_vm7, %v6363_v2, %v6367_v3  ;;  %v1956_v28 = vsel %vm1949_vm7, %v6368_v8, %v6363_v2  ;;  %v6396_v44 = vpop.permute.xlu1 %6395  ;;  %v5468_v8 = vld [vmem:[%s8822_s1 + $0xf8] sm:$0xff] }
  0xe9   : > { %1463 = vmatpush1.msra.mxu0 %v6580_v26  ;;  %1496 = vmatprep.mubr.f32.mxu0 %v8828_v0  ;;  %v6398_v59 = vunpack.i.h.bf16 %v6396_v44 }
  0xea   : > { %5900 = vmatmul.mubr.msk.f32.vlgmr.msra.gmra.mxu1 %vm436_vm2, %v5437_v15  ;;  %5442 = vmatmul.mubr.msk.f32.vlgmr.msra.gmra.mxu0 %vm436_vm2, %v5437_v15  ;;  %v6373_v15 = vunpack.i.h.bf16 %v7013_v56  ;;  %v6397_v56 = vunpack.i.l.bf16 %v6396_v44 }
  0xeb   : > { %5902 = vmatprep.mubr.msk.f32.mxu1 %vm6471_vm0, %v8828_v0  ;;  %1502 = vmatprep.mubr.f32.mxu0 %v8828_v0 }
  0xec   : > { %1741 = vmatprep.subr.mxu0 %v1672_v24  ;;  %5914 = vmatprep.subr.mxu1 %v8828_v0  ;;  %v6386_v24 = vpop.permute.xlu0 %6385 }
  0xed   : > { %1742 = vmatpush1.msra.mxu0 %v1671_v31  ;;  %5915 = vmatpush3.msra.mxu1 %v1697_v32  ;;  %v6377_v31 = vunpack.i.l.bf16 %v7021_v61  ;;  %v1955_v32 = vsel %vm1949_vm7, %v6372_v16, %v6373_v15  ;;  %v6388_v41 = vunpack.i.h.bf16 %v6386_v24  ;;  %v6387_v42 = vunpack.i.l.bf16 %v6386_v24 }
  0xee   : > { %5903 = vmatmul.mubr.msk.f32.gmra.mxu1 %vm436_vm2, %v5438_v33  ;;  %5443 = vmatmul.mubr.msk.f32.gmra.mxu0 %vm436_vm2, %v5438_v33  ;;  %v5454_v33 = vld [vmem:[%s8822_s1 + $0xd8] sm:$0xff] }
  0xef   : > { %5905 = vmatprep.mubr.msk.f32.mxu1 %vm6471_vm0, %v8828_v0  ;;  %1743 = vmatprep.subr.mxu0 %v1670_v35  ;;  %v6378_v35 = vunpack.i.h.bf16 %v7021_v61  ;;  %v1951_v48 = vsel %vm1949_vm7, %v6387_v42, %v6388_v41  ;;  %v1950_v51 = vsel %vm1949_vm7, %v1920_v29, %v6387_v42  ;;  %v5471_v42 = vld [vmem:[%s8822_s1 + $0x110] sm:$0xff] }
  0xf0   : > { %1508 = vmatprep.mubr.f32.mxu0 %v8828_v0  ;;  %1744 = vmatpush1.msra.mxu0 %v1669_v36  ;;  %v7062_v34 = vpop.permute.xlu0 %6390  ;;  %v6382_v36 = vunpack.i.l.bf16 %v6381_v10 }
  0xf1   : > { %5916 = vmatprep.subr.mxu1 %v8828_v0  ;;  %1745 = vmatprep.subr.mxu0 %v1668_v39  ;;  %v1954_v39 = vsel %vm1949_vm7, %v6377_v31, %v6372_v16 }
  0xf2   : > { %5906 = vmatmul.mubr.msk.f32.gmra.mxu1 %vm436_vm2, %v5439_v40  ;;  %5444 = vmatmul.mubr.msk.f32.gmra.mxu0 %vm436_vm2, %v5439_v40  ;;  %v1982_v40 = vsel %vm1949_vm7, %v6373_v15, %v6377_v31  ;;  %v1953_v45 = vsel %vm1949_vm7, %v6378_v35, %v6382_v36 }
  0xf3   : > { %5908 = vmatprep.mubr.msk.f32.mxu1 %vm6471_vm0, %v8828_v0  ;;  %5917 = vmatpush3.msra.mxu1 %v1696_v43  ;;  %v5455_v43 = vld [vmem:[%s8822_s1 + $0xe0] sm:$0xff] }
  0xf4   : > { %1514 = vmatprep.mubr.f32.mxu0 %v8828_v0  ;;  %5918 = vmatprep.subr.mxu1 %v8828_v0 }
  0xf5   : > { %1746 = vmatpush1.msra.mxu0 %v1667_v46  ;;  %5919 = vmatpush3.msra.mxu1 %v1695_v47  ;;  %v1952_v46 = vsel %vm1949_vm7, %v6383_v38, %v6378_v35  ;;  %v7081_v47 = vpop.permute.xlu0 %6400 }
  0xf6   : > { %5909 = vmatmul.mubr.msk.f32.gmra.mxu1 %vm436_vm2, %v5440_v50  ;;  %5445 = vmatmul.mubr.msk.f32.gmra.mxu0 %vm436_vm2, %v5440_v50  ;;  %v1981_v50 = vsel %vm1949_vm7, %v6382_v36, %v6383_v38  ;;  %v6402_v60 = vunpack.i.l.bf16 %v7081_v47  ;;  %v6403_v61 = vunpack.i.h.bf16 %v7081_v47 }
  0xf7   : > { %1747 = vmatprep.subr.mxu0 %v1666_v52  ;;  %5911 = vmatprep.mubr.msk.f32.mxu1 %vm6471_vm0, %v8828_v0  ;;  %v6393_v52 = vunpack.i.h.bf16 %v7062_v34 }
  0xf8   : > { %1748 = vmatpush1.msra.mxu0 %v1665_v53  ;;  %1520 = vmatprep.mubr.f32.mxu0 %v8828_v0  ;;  %v6392_v53 = vunpack.i.l.bf16 %v7062_v34  ;;  %v2244_v10 = vsel %vm2236_vm8, %v6398_v59, %v6402_v60  ;;  %v2243_v15 = vsel %vm2236_vm8, %v6403_v61, %v6398_v59 }
  0xf9   : > { %5920 = vmatprep.subr.mxu1 %v8828_v0  ;;  %1749 = vmatprep.subr.mxu0 %v1664_v54  ;;  %v6406_v54 = vpop.permute.xlu1 %6405  ;;  %v2271_v3 = vsel %vm2236_vm8, %v6393_v52, %v6397_v56 }
  0xfa   : > { %5912 = vmatmul.mubr.msk.f32.gmra.mxu1 %vm436_vm2, %v5441_v55  ;;  %5446 = vmatmul.mubr.msk.f32.gmra.mxu0 %vm436_vm2, %v5441_v55  ;;  %v1980_v55 = vsel %vm1949_vm7, %v6388_v41, %v1920_v29  ;;  %v6408_v63 = vunpack.i.h.bf16 %v6406_v54  ;;  %v2245_v2 = vsel %vm2236_vm8, %v6397_v56, %v6392_v53  ;;  %v2270_v29 = vsel %vm2236_vm8, %v6402_v60, %v6403_v61  ;;  %v5483_v61 = vld [vmem:[%s8822_s1 + $0x120] sm:$0xff] }
  0xfb   : > { %5921 = vmatpush3.msra.mxu1 %v1694_v57  ;;  %1750 = vmatpush1.msra.mxu0 %v1663_v58  ;;  %v5467_v57 = vld [vmem:[%s8822_s1 + $0xf0] sm:$0xff]  ;;  %v6411_v58 = vpop.permute.xlu0 %6410 }
  0xfc   : > { %5922 = vmatprep.subr.mxu1 %v8828_v0  ;;  %5924 = vmatprep.mubr.msk.f32.mxu1 %vm6471_vm0, %v8828_v0 }
  0xfd   : > { %5923 = vmatpush3.msra.mxu1 %v1693_v62  ;;  %1783 = vmatprep.mubr.f32.mxu0 %v8828_v0  ;;  %v2246_v62 = vsel %vm2236_vm8, %v6392_v53, %v6393_v52 }
  0xfe   : > { %5925 = vmatmul.mubr.msk.f32.vlgmr.msra.gmra.mxu1 %vm436_vm2, %v5452_v1  ;;  %5457 = vmatmul.mubr.msk.f32.vlgmr.msra.gmra.mxu0 %vm436_vm2, %v5452_v1  ;;  %v6407_v1 = vunpack.i.l.bf16 %v6406_v54 }
  0xff   : > { %5927 = vmatprep.mubr.msk.f32.mxu1 %vm6471_vm0, %v8828_v0  ;;  %1789 = vmatprep.mubr.f32.mxu0 %v8828_v0  ;;  %v6421_v16 = vpop.permute.xlu0 %6420 }
 0x100   : > { %2028 = vmatprep.subr.mxu0 %v1959_v9  ;;  %5939 = vmatprep.subr.mxu1 %v8828_v0  ;;  %v6416_v9 = vpop.permute.xlu1 %6415  ;;  %v6423_v35 = vunpack.i.h.bf16 %v6421_v16  ;;  %v6422_v36 = vunpack.i.l.bf16 %v6421_v16 }
 0x101   : > { %2029 = vmatpush1.msra.mxu0 %v1958_v19  ;;  %5940 = vmatpush3.msra.mxu1 %v1984_v20  ;;  %v6412_v19 = vunpack.i.l.bf16 %v6411_v58  ;;  %v2242_v20 = vsel %vm2236_vm8, %v6407_v1, %v6408_v63  ;;  %v6418_v31 = vunpack.i.h.bf16 %v6416_v9 }
 0x102   : > { %5928 = vmatmul.mubr.msk.f32.gmra.mxu1 %vm436_vm2, %v5453_v23  ;;  %5458 = vmatmul.mubr.msk.f32.gmra.mxu0 %vm436_vm2, %v5453_v23  ;;  %v5469_v23 = vld [vmem:[%s8822_s1 + $0x100] sm:$0xff]  ;;  %v2238_v41 = vsel %vm2236_vm8, %v6422_v36, %v6423_v35 }
 0x103   : > { %5930 = vmatprep.mubr.msk.f32.mxu1 %vm6471_vm0, %v8828_v0  ;;  %2030 = vmatprep.subr.mxu0 %v1957_v25  ;;  %v6413_v25 = vunpack.i.h.bf16 %v6411_v58  ;;  %v2269_v34 = vsel %vm2236_vm8, %v6408_v63, %v6412_v19 }
 0x104   : > { %1795 = vmatprep.mubr.f32.mxu0 %v8828_v0  ;;  %2031 = vmatpush1.msra.mxu0 %v1956_v28  ;;  %v2207_v24 = vpop.permute.xlu1 %2206  ;;  %v6417_v28 = vunpack.i.l.bf16 %v6416_v9 }
 0x105   : > { %5941 = vmatprep.subr.mxu1 %v8828_v0  ;;  %2032 = vmatprep.subr.mxu0 %v1955_v32  ;;  %v6426_v32 = vpop.permute.xlu0 %6425 }
 0x106   : > { %5931 = vmatmul.mubr.msk.f32.gmra.mxu1 %vm436_vm2, %v5454_v33  ;;  %5459 = vmatmul.mubr.msk.f32.gmra.mxu0 %vm436_vm2, %v5454_v33  ;;  %v2241_v33 = vsel %vm2236_vm8, %v6412_v19, %v6407_v1  ;;  %v2240_v38 = vsel %vm2236_vm8, %v6413_v25, %v6417_v28  ;;  %v2268_v44 = vsel %vm2236_vm8, %v6417_v28, %v6418_v31  ;;  %v6427_v47 = vunpack.i.l.bf16 %v6426_v32  ;;  %v5485_v28 = vld [vmem:[%s8822_s1 + $0x130] sm:$0xff] }
 0x107   : > { %5933 = vmatprep.mubr.msk.f32.mxu1 %vm6471_vm0, %v8828_v0  ;;  %5942 = vmatpush3.msra.mxu1 %v1983_v37  ;;  %v5470_v37 = vld [vmem:[%s8822_s1 + $0x108] sm:$0xff] }
 0x108   : > { %1801 = vmatprep.mubr.f32.mxu0 %v8828_v0  ;;  %5943 = vmatprep.subr.mxu1 %v8828_v0 }
 0x109   : > { %2033 = vmatpush1.msra.mxu0 %v1954_v39  ;;  %5944 = vmatpush3.msra.mxu1 %v1982_v40  ;;  %v2239_v39 = vsel %vm2236_vm8, %v6418_v31, %v6413_v25  ;;  %v6431_v40 = vpop.permute.xlu1 %6430 }
 0x10a   : > { %5934 = vmatmul.mubr.msk.f32.gmra.mxu1 %vm436_vm2, %v5455_v43  ;;  %5460 = vmatmul.mubr.msk.f32.gmra.mxu0 %vm436_vm2, %v5455_v43  ;;  %v6436_v43 = vpop.permute.xlu0 %6435  ;;  %v6433_v52 = vunpack.i.h.bf16 %v6431_v40 }
 0x10b   : > { %2034 = vmatprep.subr.mxu0 %v1953_v45  ;;  %5936 = vmatprep.mubr.msk.f32.mxu1 %vm6471_vm0, %v8828_v0  ;;  %v2237_v45 = vsel %vm2236_vm8, %v2207_v24, %v6422_v36  ;;  %v6437_v53 = vunpack.i.l.bf16 %v6436_v43  ;;  %v6438_v54 = vunpack.i.h.bf16 %v6436_v43  ;;  %v2782_v43 = vld [vmem:[%s8824_s3 + $0x10] sm:$0xff] }
 0x10c   : > { %2035 = vmatpush1.msra.mxu0 %v1952_v46  ;;  %1807 = vmatprep.mubr.f32.mxu0 %v8828_v0  ;;  %v6428_v46 = vunpack.i.h.bf16 %v6426_v32 }
 0x10d   : > { %5945 = vmatprep.subr.mxu1 %v8828_v0  ;;  %2036 = vmatprep.subr.mxu0 %v1951_v48  ;;  %v2267_v48 = vsel %vm2236_vm8, %v6423_v35, %v2207_v24  ;;  %v2530_v63 = vsel %vm2523_vm9, %v6438_v54, %v6433_v52  ;;  %v2557_v16 = vsel %vm2523_vm9, %v6437_v53, %v6438_v54 }
 0x10e   : > { %5937 = vmatmul.mubr.msk.f32.gmra.mxu1 %vm436_vm2, %v5456_v49  ;;  %5461 = vmatmul.mubr.msk.f32.gmra.mxu0 %vm436_vm2, %v5456_v49  ;;  %v6432_v49 = vunpack.i.l.bf16 %v6431_v40  ;;  %v6446_v56 = vpop.permute.xlu0 %6445  ;;  %v2784_v40 = vld [vmem:[%s8824_s3 + $0x20] sm:$0xff] }
 0x10f   : > { %5946 = vmatpush3.msra.mxu1 %v1981_v50  ;;  %2037 = vmatpush1.msra.mxu0 %v1950_v51  ;;  %v5482_v50 = vld [vmem:[%s8822_s1 + $0x118] sm:$0xff]  ;;  %v6441_v51 = vpop.permute.xlu1 %6440 }
 0x110   : > { %5947 = vmatprep.subr.mxu1 %v8828_v0  ;;  %5949 = vmatprep.mubr.msk.f32.mxu1 %vm6471_vm0, %v8828_v0  ;;  %v6442_v58 = vunpack.i.l.bf16 %v6441_v51  ;;  %v2532_v59 = vsel %vm2523_vm9, %v6432_v49, %v6427_v47  ;;  %v2558_v60 = vsel %vm2523_vm9, %v6428_v46, %v6432_v49 }
 0x111   : > { %5948 = vmatpush3.msra.mxu1 %v1980_v55  ;;  %2070 = vmatprep.mubr.f32.mxu0 %v8828_v0  ;;  %v2533_v55 = vsel %vm2523_vm9, %v6427_v47, %v6428_v46  ;;  %v2780_v46 = vld [vmem:[%s8824_s3] sm:$0xff]  ;;  %v5500_v47 = vld [vmem:[%s8822_s1 + $0x158] sm:$0xff] }
 0x112   : > { %5950 = vmatmul.mubr.msk.f32.vlgmr.msra.gmra.mxu1 %vm436_vm2, %v5467_v57  ;;  %5472 = vmatmul.mubr.msk.f32.vlgmr.msra.gmra.mxu0 %vm436_vm2, %v5467_v57  ;;  %v6443_v57 = vunpack.i.h.bf16 %v6441_v51  ;;  %v6456_v9 = vpop.permute.xlu0 %6455 }
 0x113   : > { %5952 = vmatprep.mubr.msk.f32.mxu1 %vm6471_vm0, %v8828_v0  ;;  %2076 = vmatprep.mubr.f32.mxu0 %v8828_v0  ;;  %v6451_v1 = vpop.permute.xlu1 %6450  ;;  %v6458_v24 = vunpack.i.h.bf16 %v6456_v9  ;;  %v6457_v25 = vunpack.i.l.bf16 %v6456_v9 }
 0x114   : > { %2315 = vmatprep.subr.mxu0 %v2246_v62  ;;  %5964 = vmatprep.subr.mxu1 %v8828_v0  ;;  %v2531_v62 = vsel %vm2523_vm9, %v6433_v52, %v6437_v53  ;;  %v6453_v19 = vunpack.i.h.bf16 %v6451_v1 }
 0x115   : > { %2316 = vmatpush1.msra.mxu0 %v2245_v2  ;;  %5965 = vmatpush3.msra.mxu1 %v2271_v3  ;;  %v6447_v2 = vunpack.i.l.bf16 %v6446_v56  ;;  %v2529_v3 = vsel %vm2523_vm9, %v6442_v58, %v6443_v57  ;;  %v2525_v32 = vsel %vm2523_vm9, %v6457_v25, %v6458_v24 }
 0x116   : > { %5953 = vmatmul.mubr.msk.f32.gmra.mxu1 %vm436_vm2, %v5468_v8  ;;  %5473 = vmatmul.mubr.msk.f32.gmra.mxu0 %vm436_vm2, %v5468_v8  ;;  %v5484_v8 = vld [vmem:[%s8822_s1 + $0x128] sm:$0xff] }
 0x117   : > { %5955 = vmatprep.mubr.msk.f32.mxu1 %vm6471_vm0, %v8828_v0  ;;  %2317 = vmatprep.subr.mxu0 %v2244_v10  ;;  %v6448_v10 = vunpack.i.h.bf16 %v6446_v56 }
 0x118   : > { %2082 = vmatprep.mubr.f32.mxu0 %v8828_v0  ;;  %2318 = vmatpush1.msra.mxu0 %v2243_v15  ;;  %v6452_v15 = vunpack.i.l.bf16 %v6451_v1 }
 0x119   : > { %5966 = vmatprep.subr.mxu1 %v8828_v0  ;;  %2319 = vmatprep.subr.mxu0 %v2242_v20  ;;  %v2528_v20 = vsel %vm2523_vm9, %v6447_v2, %v6442_v58  ;;  %v2526_v31 = vsel %vm2523_vm9, %v6453_v19, %v6448_v10 }
 0x11a   : > { %5956 = vmatmul.mubr.msk.f32.gmra.mxu1 %vm436_vm2, %v5469_v23  ;;  %5474 = vmatmul.mubr.msk.f32.gmra.mxu0 %vm436_vm2, %v5469_v23  ;;  %v2556_v23 = vsel %vm2523_vm9, %v6443_v57, %v6447_v2  ;;  %v2555_v35 = vsel %vm2523_vm9, %v6452_v15, %v6453_v19 }
 0x11b   : > { %5958 = vmatprep.mubr.msk.f32.mxu1 %vm6471_vm0, %v8828_v0  ;;  %5967 = vmatpush3.msra.mxu1 %v2270_v29  ;;  %v2527_v29 = vsel %vm2523_vm9, %v6448_v10, %v6452_v15 }
 0x11c   : > { %2088 = vmatprep.mubr.f32.mxu0 %v8828_v0  ;;  %5968 = vmatprep.subr.mxu1 %v8828_v0 }
 0x11d   : > { %2320 = vmatpush1.msra.mxu0 %v2241_v33  ;;  %5969 = vmatpush3.msra.mxu1 %v2269_v34  ;;  %v5486_v33 = vld [vmem:[%s8822_s1 + $0x138] sm:$0xff] }
 0x11e   : > { %5959 = vmatmul.mubr.msk.f32.gmra.mxu1 %vm436_vm2, %v5470_v37  ;;  %5475 = vmatmul.mubr.msk.f32.gmra.mxu0 %vm436_vm2, %v5470_v37 }
 0x11f   : > { %2321 = vmatprep.subr.mxu0 %v2240_v38  ;;  %5961 = vmatprep.mubr.msk.f32.mxu1 %vm6471_vm0, %v8828_v0  ;;  %v5497_v38 = vld [vmem:[%s8822_s1 + $0x140] sm:$0xff] }
 0x120   : > { %2322 = vmatpush1.msra.mxu0 %v2239_v39  ;;  %2094 = vmatprep.mubr.f32.mxu0 %v8828_v0  ;;  %v2783_v39 = vld [vmem:[%s8824_s3 + $0x18] sm:$0xff] }
 0x121   : > { %5970 = vmatprep.subr.mxu1 %v8828_v0  ;;  %2323 = vmatprep.subr.mxu0 %v2238_v41  ;;  %v5498_v41 = vld [vmem:[%s8822_s1 + $0x148] sm:$0xff] }
 0x122   : > { %5962 = vmatmul.mubr.msk.f32.gmra.mxu1 %vm436_vm2, %v5471_v42  ;;  %5476 = vmatmul.mubr.msk.f32.gmra.mxu0 %vm436_vm2, %v5471_v42  ;;  %v6479_v42 = vmov 0  }
 0x123   : > { %5971 = vmatpush3.msra.mxu1 %v2268_v44  ;;  %2324 = vmatpush1.msra.mxu0 %v2237_v45  ;;  %v2781_v44 = vld [vmem:[%s8824_s3 + $0x8] sm:$0xff]  ;;  %v5499_v45 = vld [vmem:[%s8822_s1 + $0x150] sm:$0xff] }
 0x124   : > { %5972 = vmatprep.subr.mxu1 %v8828_v0  ;;  %5974 = vmatprep.mubr.msk.f32.mxu1 %vm6471_vm0, %v8828_v0 }
 0x125   : > { %5973 = vmatpush3.msra.mxu1 %v2267_v48  ;;  %2357 = vmatprep.mubr.f32.mxu0 %v8828_v0  ;;  %v5501_v48 = vld [vmem:[%s8822_s1 + $0x160] sm:$0xff] }
 0x126   : > { %5975 = vmatmul.mubr.msk.f32.vlgmr.msra.gmra.mxu1 %vm436_vm2, %v5482_v50  ;;  %5487 = vmatmul.mubr.msk.f32.vlgmr.msra.gmra.mxu0 %vm436_vm2, %v5482_v50 }
 0x127   : > { %5977 = vmatprep.mubr.msk.f32.mxu1 %vm6471_vm0, %v8828_v0  ;;  %2363 = vmatprep.mubr.f32.mxu0 %v8828_v0 }
 0x128   : > { %2602 = vmatprep.subr.mxu0 %v2533_v55  ;;  %5989 = vmatprep.subr.mxu1 %v8828_v0 }
 0x129   : > { %2603 = vmatpush1.msra.mxu0 %v2532_v59  ;;  %5990 = vmatpush3.msra.mxu1 %v2558_v60 }
 0x12a   : > { %5978 = vmatmul.mubr.msk.f32.gmra.mxu1 %vm436_vm2, %v5483_v61  ;;  %5488 = vmatmul.mubr.msk.f32.gmra.mxu0 %vm436_vm2, %v5483_v61 }
 0x12b   : > { %5980 = vmatprep.mubr.msk.f32.mxu1 %vm6471_vm0, %v8828_v0  ;;  %2604 = vmatprep.subr.mxu0 %v2531_v62 }
 0x12c   : > { %2369 = vmatprep.mubr.f32.mxu0 %v8828_v0  ;;  %2605 = vmatpush1.msra.mxu0 %v2530_v63 }
 0x12d   : > { %5991 = vmatprep.subr.mxu1 %v8828_v0  ;;  %2606 = vmatprep.subr.mxu0 %v2529_v3 }
 0x12e   : > { %5981 = vmatmul.mubr.msk.f32.gmra.mxu1 %vm436_vm2, %v5484_v8  ;;  %5489 = vmatmul.mubr.msk.f32.gmra.mxu0 %vm436_vm2, %v5484_v8 }
 0x12f   : > { %5983 = vmatprep.mubr.msk.f32.mxu1 %vm6471_vm0, %v8828_v0  ;;  %5992 = vmatpush3.msra.mxu1 %v2557_v16 }
 0x130   : > { %2375 = vmatprep.mubr.f32.mxu0 %v8828_v0  ;;  %5993 = vmatprep.subr.mxu1 %v8828_v0 }
 0x131   : > { %2607 = vmatpush1.msra.mxu0 %v2528_v20  ;;  %5994 = vmatpush3.msra.mxu1 %v2556_v23 }
 0x132   : > { %5984 = vmatmul.mubr.msk.f32.gmra.mxu1 %vm436_vm2, %v5485_v28  ;;  %5490 = vmatmul.mubr.msk.f32.gmra.mxu0 %vm436_vm2, %v5485_v28 }
 0x133   : > { %2608 = vmatprep.subr.mxu0 %v2527_v29  ;;  %5986 = vmatprep.mubr.msk.f32.mxu1 %vm6471_vm0, %v8828_v0 }
 0x134   : > { %2609 = vmatpush1.msra.mxu0 %v2526_v31  ;;  %2381 = vmatprep.mubr.f32.mxu0 %v8828_v0  ;;  %v2494_v34 = vpop.permute.xlu1 %2493 }
 0x135   : > { %5995 = vmatprep.subr.mxu1 %v8828_v0  ;;  %2610 = vmatprep.subr.mxu0 %v2525_v32  ;;  %v2524_v36 = vsel %vm2523_vm9, %v2494_v34, %v6457_v25  ;;  %v2554_v37 = vsel %vm2523_vm9, %v6458_v24, %v2494_v34 }
 0x136   : > { %5987 = vmatmul.mubr.msk.f32.gmra.mxu1 %vm436_vm2, %v5486_v33  ;;  %5491 = vmatmul.mubr.msk.f32.gmra.mxu0 %vm436_vm2, %v5486_v33 }
 0x137   : > { %5996 = vmatpush3.msra.mxu1 %v2555_v35  ;;  %2611 = vmatpush1.msra.mxu0 %v2524_v36 }
 0x138   : > { %5997 = vmatprep.subr.mxu1 %v8828_v0  ;;  %5999 = vmatprep.mubr.msk.f32.mxu1 %vm6471_vm0, %v8828_v0 }
 0x139   : > { %5998 = vmatpush3.msra.mxu1 %v2554_v37  ;;  %2644 = vmatprep.mubr.f32.mxu0 %v8828_v0 }
 0x13a   : > { %6000 = vmatmul.mubr.msk.f32.vlgmr.msra.gmra.mxu1 %vm436_vm2, %v5497_v38  ;;  %5502 = vmatmul.mubr.msk.f32.vlgmr.msra.gmra.mxu0 %vm436_vm2, %v5497_v38 }
 0x13b   : > { %6002 = vmatprep.mubr.msk.f32.mxu1 %vm6471_vm0, %v8828_v0  ;;  %2650 = vmatprep.mubr.f32.mxu0 %v8828_v0 }
 0x13c   : > { %6460 = vset.pattern.permute.xlu1 %v6479_v42  ;;  %6459 = vset.pattern.permute.xlu0 %v6479_v42 }
 0x13d   : > { %2802 = vperm.xlu1 %6460, %v2783_v39   ;;  %2807 = vperm.xlu0 %6459, %v2784_v40  }
 0x13e   : > { %6003 = vmatmul.mubr.msk.f32.gmra.mxu1 %vm436_vm2, %v5498_v41  ;;  %5503 = vmatmul.mubr.msk.f32.gmra.mxu0 %vm436_vm2, %v5498_v41 }
 0x13f   : > { %6005 = vmatprep.mubr.msk.f32.mxu1 %vm6471_vm0, %v8828_v0  ;;  %2656 = vmatprep.mubr.f32.mxu0 %v8828_v0 }
 0x141   : > { %2797 = vperm.xlu1 %6460, %v2782_v43   ;;  %2792 = vperm.xlu0 %6459, %v2781_v44  }
 0x142   : > { %6006 = vmatmul.mubr.msk.f32.gmra.mxu1 %vm436_vm2, %v5499_v45  ;;  %5504 = vmatmul.mubr.msk.f32.gmra.mxu0 %vm436_vm2, %v5499_v45 }
 0x143   : > { %6008 = vmatprep.mubr.msk.f32.mxu1 %vm6471_vm0, %v8828_v0  ;;  %2662 = vmatprep.mubr.f32.mxu0 %v8828_v0 }
 0x145   : > { %2787 = vperm.xlu1 %6460, %v2780_v46  }
 0x146   : > { %6009 = vmatmul.mubr.msk.f32.gmra.mxu1 %vm436_vm2, %v5500_v47  ;;  %5505 = vmatmul.mubr.msk.f32.gmra.mxu0 %vm436_vm2, %v5500_v47 }
 0x147   : > { %6011 = vmatprep.mubr.msk.f32.mxu1 %vm6471_vm0, %v8828_v0  ;;  %2668 = vmatprep.mubr.f32.mxu0 %v8828_v0 }
 0x14a   : > { %6012 = vmatmul.mubr.msk.f32.gmra.mxu1 %vm436_vm2, %v5501_v48  ;;  %5506 = vmatmul.mubr.msk.f32.gmra.mxu0 %vm436_vm2, %v5501_v48 }
 0x14b   : > { %3101 = vmatprep.mubr.f32.mxu0 %v8828_v0 }
 0x159   : > { %v613_v49 = vpop.f32.mrf.mxu1 }
 0x15a   : > { %v518_v50 = vpop.f32.mrf.mxu0 }
 0x15b   : > { %v5801_v51 = vpop.f32.mrf.mxu1 }
 0x15c   : > { %v7279_v52 = vpop.f32.mrf.mxu0 }
 0x15d   : > { %v618_v53 = vpop.f32.mrf.mxu1 }
 0x15e   : > { %v524_v54 = vpop.f32.mrf.mxu0 }
 0x15f   : > { %v5804_v55 = vpop.f32.mrf.mxu1 }
 0x160   : > { %v7281_v56 = vpop.f32.mrf.mxu0 }
 0x161   : > { %v623_v57 = vpop.f32.mrf.mxu1 }
 0x162   : > { %v530_v58 = vpop.f32.mrf.mxu0 }
 0x163   : > { %v5807_v59 = vpop.f32.mrf.mxu1 }
 0x164   : > { %v7283_v60 = vpop.f32.mrf.mxu0 }
 0x165   : > { %v628_v61 = vpop.f32.mrf.mxu1 }
 0x166   : > { %v536_v62 = vpop.f32.mrf.mxu0 }
 0x167   : > { %v5810_v63 = vpop.f32.mrf.mxu1 }
 0x168   : > { %v7285_v1 = vpop.f32.mrf.mxu0 }
 0x169   : > { %v633_v2 = vpop.f32.mrf.mxu1 }
 0x16a   : > { %v542_v3 = vpop.f32.mrf.mxu0 }
 0x16b   : > { %v5813_v8 = vpop.f32.mrf.mxu1 }
 0x16c   : > { %v7287_v9 = vpop.f32.mrf.mxu0 }
 0x16d   : > { %v813_v10 = vpop.f32.mrf.mxu1 }
 0x16e   : > { %v814_v15 = vadd.f32 %v813_v10, %v613_v49  ;;  %v718_v16 = vpop.f32.mrf.mxu0 }
 0x16f   : > { %v719_v19 = vadd.f32 %v718_v16, %v518_v50  ;;  %v5826_v20 = vpop.f32.mrf.mxu1 }
 0x170   : > { %v7289_v23 = vpop.f32.mrf.mxu0 }
 0x171   : > { %v818_v24 = vpop.f32.mrf.mxu1 }
 0x172   : > { %v819_v25 = vadd.f32 %v818_v24, %v618_v53  ;;  %v724_v28 = vpop.f32.mrf.mxu0 }
 0x173   : > { %v725_v29 = vadd.f32 %v724_v28, %v524_v54  ;;  %v5829_v31 = vpop.f32.mrf.mxu1 }
 0x174   : > { %v7291_v32 = vpop.f32.mrf.mxu0 }
 0x175   : > { %v823_v33 = vpop.f32.mrf.mxu1 }
 0x176   : > { %v824_v34 = vadd.f32 %v823_v33, %v623_v57  ;;  %v730_v35 = vpop.f32.mrf.mxu0 }
 0x177   : > { %v731_v36 = vadd.f32 %v730_v35, %v530_v58  ;;  %v5832_v37 = vpop.f32.mrf.mxu1 }
 0x178   : > { %v7293_v38 = vpop.f32.mrf.mxu0 }
 0x179   : > { %v828_v39 = vpop.f32.mrf.mxu1 }
 0x17a   : > { %v829_v40 = vadd.f32 %v828_v39, %v628_v61  ;;  %v736_v41 = vpop.f32.mrf.mxu0 }
 0x17b   : > { %v737_v42 = vadd.f32 %v736_v41, %v536_v62  ;;  %v5835_v43 = vpop.f32.mrf.mxu1 }
 0x17c   : > { %v7295_v44 = vpop.f32.mrf.mxu0 }
 0x17d   : > { %v833_v45 = vpop.f32.mrf.mxu1 }
 0x17e   : > { %v834_v46 = vadd.f32 %v833_v45, %v633_v2  ;;  %v742_v47 = vpop.f32.mrf.mxu0 }
 0x17f   : > { %v743_v48 = vadd.f32 %v742_v47, %v542_v3  ;;  %v5838_v49 = vpop.f32.mrf.mxu1 }
 0x180   : > { %v7297_v50 = vpop.f32.mrf.mxu0 }
 0x181   : > { %v1085_v51 = vpop.f32.mrf.mxu1 }
 0x182   : > { %v1111_v53 = vadd.f32 %v1085_v51, %v814_v15  ;;  %v990_v54 = vpop.f32.mrf.mxu0 }
 0x183   : > { %v1109_v55 = vadd.f32 %v990_v54, %v719_v19  ;;  %v5851_v57 = vpop.f32.mrf.mxu1 }
 0x184   : > { %v7299_v58 = vpop.f32.mrf.mxu0 }
 0x185   : > { %v1090_v59 = vpop.f32.mrf.mxu1 }
 0x186   : > { %v1114_v61 = vadd.f32 %v1090_v59, %v819_v25  ;;  %v996_v62 = vpop.f32.mrf.mxu0 }
 0x187   : > { %v1112_v63 = vadd.f32 %v996_v62, %v725_v29  ;;  %v5854_v8 = vpop.f32.mrf.mxu1 }
 0x188   : > { %v7301_v10 = vpop.f32.mrf.mxu0 }
 0x189   : > { %v1095_v2 = vpop.f32.mrf.mxu1 }
 0x18a   : > { %v1117_v16 = vadd.f32 %v1095_v2, %v824_v34  ;;  %v1002_v3 = vpop.f32.mrf.mxu0 }
 0x18b   : > { %v1115_v20 = vadd.f32 %v1002_v3, %v731_v36  ;;  %v5857_v24 = vpop.f32.mrf.mxu1 }
 0x18c   : > { %v1004_v28 = vpop.f32.mrf.mxu0 }
 0x18d   : > { %v1100_v31 = vpop.f32.mrf.mxu1 }
 0x18e   : > { %v1120_v15 = vadd.f32 %v1100_v31, %v829_v40  ;;  %v1008_v33 = vpop.f32.mrf.mxu0 }
 0x18f   : > { %v1118_v19 = vadd.f32 %v1008_v33, %v737_v42  ;;  %v5860_v35 = vpop.f32.mrf.mxu1 }
 0x190   : > { %v1010_v37 = vpop.f32.mrf.mxu0 }
 0x191   : > { %v1105_v39 = vpop.f32.mrf.mxu1 }
 0x192   : > { %v1123_v41 = vadd.f32 %v1105_v39, %v834_v46  ;;  %v1014_v25 = vpop.f32.mrf.mxu0 }
 0x193   : > { %v1121_v43 = vadd.f32 %v1014_v25, %v743_v48  ;;  %v5863_v29 = vpop.f32.mrf.mxu1 }
 0x194   : > { %v7303_v45 = vpop.f32.mrf.mxu0 }
 0x196   : > { %v1372_v47 = vpop.f32.mrf.mxu1  ;;  %v1277_v49 = vpop.f32.mrf.mxu0 }
 0x197   : > { %v1398_v34 = vadd.f32 %v1372_v47, %v1111_v53  ;;  %v1396_v51 = vadd.f32 %v1277_v49, %v1109_v55 }
 0x198   : > { %v5876_v36 = vpop.f32.mrf.mxu1  ;;  %v7305_v54 = vpop.f32.mrf.mxu0 }
 0x19a   : > { %v1377_v57 = vpop.f32.mrf.mxu1  ;;  %v1283_v40 = vpop.f32.mrf.mxu0 }
 0x19b   : > { %v1401_v59 = vadd.f32 %v1377_v57, %v1114_v61  ;;  %v1399_v42 = vadd.f32 %v1283_v40, %v1112_v63 }
 0x19c   : > { %v5879_v62 = vpop.f32.mrf.mxu1  ;;  %v7307_v8 = vpop.f32.mrf.mxu0 }
 0x19e   : > { %v1382_v46 = vpop.f32.mrf.mxu1  ;;  %v1289_v2 = vpop.f32.mrf.mxu0 }
 0x19f   : > { %v1404_v48 = vadd.f32 %v1382_v46, %v1117_v16  ;;  %v1402_v3 = vadd.f32 %v1289_v2, %v1115_v20 }
 0x1a0   : > { %v5882_v24 = vpop.f32.mrf.mxu1  ;;  %v1291_v31 = vpop.f32.mrf.mxu0 }
 0x1a2   : > { %v1387_v33 = vpop.f32.mrf.mxu1  ;;  %v1295_v35 = vpop.f32.mrf.mxu0 }
 0x1a3   : > { %v1407_v53 = vadd.f32 %v1387_v33, %v1120_v15  ;;  %v1405_v55 = vadd.f32 %v1295_v35, %v1118_v19  ;;  %v733_v19 = vadd.f32 %v7293_v38, %v7283_v60  ;;  %v745_v60 = vadd.f32 %v7297_v50, %v7287_v9 }
 0x1a4   : > { %v5885_v39 = vpop.f32.mrf.mxu1  ;;  %v1297_v25 = vpop.f32.mrf.mxu0 }
 0x1a5   : > { %v1116_v35 = vadd.f32 %v1004_v28, %v733_v19 }
 0x1a6   : > { %v1392_v29 = vpop.f32.mrf.mxu1  ;;  %v1301_v47 = vpop.f32.mrf.mxu0 }
 0x1a7   : > { %v1410_v49 = vadd.f32 %v1392_v29, %v1123_v41  ;;  %v1408_v61 = vadd.f32 %v1301_v47, %v1121_v43 }
 0x1a8   : > { %v5888_v63 = vpop.f32.mrf.mxu1  ;;  %v1303_v36 = vpop.f32.mrf.mxu0 }
 0x1aa   : > { %v1593_v57 = vpop.f32.mrf.mxu1  ;;  %v1498_v40 = vpop.f32.mrf.mxu0 }
 0x1ab   : > { %v7309_v62 = vadd.f32 %v1593_v57, %v1398_v34  ;;  %v7311_v16 = vadd.f32 %v1498_v40, %v1396_v51  ;;  %v739_v34 = vadd.f32 %v7295_v44, %v7285_v1  ;;  %v1403_v51 = vadd.f32 %v1291_v31, %v1116_v35 }
 0x1ac   : > { %v5901_v20 = vpop.f32.mrf.mxu1  ;;  %v7313_v46 = vpop.f32.mrf.mxu0  ;;  %v727_v35 = vadd.f32 %v7291_v32, %v7281_v56 }
 0x1ad   : > { %v1119_v20 = vadd.f32 %v1010_v37, %v739_v34 }
 0x1ae   : > { %v1598_v2 = vpop.f32.mrf.mxu1  ;;  %v1504_v15 = vpop.f32.mrf.mxu0 }
 0x1af   : > { %v1622_v24 = vadd.f32 %v1598_v2, %v1401_v59  ;;  %v1620_v33 = vadd.f32 %v1504_v15, %v1399_v42  ;;  %v1406_v38 = vadd.f32 %v1297_v25, %v1119_v20  ;;  %v1122_v15 = vadd.f32 %v7303_v45, %v745_v60 }
 0x1b0   : > { %v5904_v41 = vpop.f32.mrf.mxu1  ;;  %v1506_v43 = vpop.f32.mrf.mxu0 }
 0x1b2   : > { %v1603_v39 = vpop.f32.mrf.mxu1  ;;  %v1510_v29 = vpop.f32.mrf.mxu0 }
 0x1b3   : > { %v1625_v47 = vadd.f32 %v1603_v39, %v1404_v48  ;;  %v1623_v63 = vadd.f32 %v1510_v29, %v1402_v3  ;;  %v1409_v3 = vadd.f32 %v1303_v36, %v1122_v15 }
 0x1b4   : > { %v5907_v57 = vpop.f32.mrf.mxu1  ;;  %v1512_v40 = vpop.f32.mrf.mxu0 }
 0x1b5   : > { %v1624_v0 = vadd.f32 %v1512_v40, %v1403_v51 }
 0x1b6   : > { %v1608_v5 = vpop.f32.mrf.mxu1  ;;  %v1516_v12 = vpop.f32.mrf.mxu0 }
 0x1b7   : > { %v1628_v59 = vadd.f32 %v1608_v5, %v1407_v53  ;;  %v1626_v28 = vadd.f32 %v1516_v12, %v1405_v55  ;;  %v1113_v12 = vadd.f32 %v7301_v10, %v727_v35 }
 0x1b8   : > { %v5910_v42 = vpop.f32.mrf.mxu1  ;;  %v1518_v2 = vpop.f32.mrf.mxu0 }
 0x1b9   : > { %v1627_v1 = vadd.f32 %v1518_v2, %v1406_v38  ;;  %v1400_v53 = vadd.f32 %v7307_v8, %v1113_v12 }
 0x1ba   : > { %v1613_v44 = vpop.f32.mrf.mxu1  ;;  %v1522_v48 = vpop.f32.mrf.mxu0 }
 0x1bb   : > { %v1631_v31 = vadd.f32 %v1613_v44, %v1410_v49  ;;  %v1629_v19 = vadd.f32 %v1522_v48, %v1408_v61  ;;  %v1621_v49 = vadd.f32 %v1506_v43, %v1400_v53 }
 0x1bc   : > { %v5913_v37 = vpop.f32.mrf.mxu1  ;;  %v1524_v41 = vpop.f32.mrf.mxu0 }
 0x1bd   : > { %v1630_v39 = vadd.f32 %v1524_v41, %v1409_v3 }
 0x1be   : > { %v7324_v9 = vpop.f32.mrf.mxu1  ;;  %v7326_v5 = vpop.f32.mrf.mxu0 }
 0x1c0   : > { %v5926_v50 = vpop.f32.mrf.mxu1  ;;  %v7329_v45 = vpop.f32.mrf.mxu0 }
 0x1c2   : > { %v1885_v55 = vpop.f32.mrf.mxu1  ;;  %v1791_v25 = vpop.f32.mrf.mxu0 }
 0x1c3   : > { %v7332_v61 = vadd.f32 %v1885_v55, %v1622_v24  ;;  %v7334_v36 = vadd.f32 %v1791_v25, %v1620_v33 }
 0x1c4   : > { %v5929_v56 = vpop.f32.mrf.mxu1  ;;  %v1793_v32 = vpop.f32.mrf.mxu0 }
 0x1c5   : > { %v7336_v29 = vadd.f32 %v1793_v32, %v1621_v49 }
 0x1c6   : > { %v1890_v34 = vpop.f32.mrf.mxu1  ;;  %v1797_v51 = vpop.f32.mrf.mxu0 }
 0x1c7   : > { %v1912_v57 = vadd.f32 %v1890_v34, %v1625_v47  ;;  %v1910_v10 = vadd.f32 %v1797_v51, %v1623_v63 }
 0x1c8   : > { %v5932_v40 = vpop.f32.mrf.mxu1  ;;  %v1799_v20 = vpop.f32.mrf.mxu0 }
 0x1c9   : > { %v1911_v60 = vadd.f32 %v1799_v20, %v1624_v0 }
 0x1ca   : > { %v1895_v38 = vpop.f32.mrf.mxu1  ;;  %v1803_v8 = vpop.f32.mrf.mxu0 }
 0x1cb   : > { %v1915_v42 = vadd.f32 %v1895_v38, %v1628_v59  ;;  %v1913_v2 = vadd.f32 %v1803_v8, %v1626_v28 }
 0x1cc   : > { %v5935_v43 = vpop.f32.mrf.mxu1  ;;  %v1805_v24 = vpop.f32.mrf.mxu0 }
 0x1cd   : > { %v1914_v15 = vadd.f32 %v1805_v24, %v1627_v1 }
 0x1ce   : > { %v1900_v33 = vpop.f32.mrf.mxu1  ;;  %v1809_v44 = vpop.f32.mrf.mxu0 }
 0x1cf   : > { %v1918_v48 = vadd.f32 %v1900_v33, %v1631_v31  ;;  %v1916_v3 = vadd.f32 %v1809_v44, %v1629_v19 }
 0x1d0   : > { %v5938_v37 = vpop.f32.mrf.mxu1  ;;  %v1811_v41 = vpop.f32.mrf.mxu0 }
 0x1d1   : > { %v1917_v35 = vadd.f32 %v1811_v41, %v1630_v39 }
 0x1d2   : > { %v2167_v12 = vpop.f32.mrf.mxu1  ;;  %v2072_v47 = vpop.f32.mrf.mxu0 }
 0x1d4   : > { %v5951_v63 = vpop.f32.mrf.mxu1  ;;  %v7338_v50 = vpop.f32.mrf.mxu0 }
 0x1d6   : > { %v7340_v0 = vpop.f32.mrf.mxu1  ;;  %v7342_v53 = vpop.f32.mrf.mxu0 }
 0x1d8   : > { %v5954_v59 = vpop.f32.mrf.mxu1  ;;  %v7344_v28 = vpop.f32.mrf.mxu0 }
 0x1da   : > { %v2177_v1 = vpop.f32.mrf.mxu1  ;;  %v2084_v55 = vpop.f32.mrf.mxu0 }
 0x1db   : > { %v7346_v25 = vadd.f32 %v2177_v1, %v1912_v57  ;;  %v7348_v31 = vadd.f32 %v2084_v55, %v1910_v10 }
 0x1dc   : > { %v5957_v19 = vpop.f32.mrf.mxu1  ;;  %v2086_v39 = vpop.f32.mrf.mxu0 }
 0x1dd   : > { %v2198_v49 = vadd.f32 %v2086_v39, %v1911_v60 }
 0x1de   : > { %v2182_v56 = vpop.f32.mrf.mxu1  ;;  %v2090_v32 = vpop.f32.mrf.mxu0 }
 0x1df   : > { %v2202_v34 = vadd.f32 %v2182_v56, %v1915_v42  ;;  %v2200_v51 = vadd.f32 %v2090_v32, %v1913_v2  ;;  %v2841_v56 = vlaneseq }
 0x1e0   : > { %v5960_v40 = vpop.f32.mrf.mxu1  ;;  %v2092_v20 = vpop.f32.mrf.mxu0 }
 0x1e1   : > { %v2201_v38 = vadd.f32 %v2092_v20, %v1914_v15  ;;  %v721_v15 = vadd.f32 %v7289_v23, %v7279_v52 }
 0x1e2   : > { %v2187_v8 = vpop.f32.mrf.mxu1  ;;  %v2096_v43 = vpop.f32.mrf.mxu0 }
 0x1e3   : > { %v2205_v24 = vadd.f32 %v2187_v8, %v1918_v48  ;;  %v2203_v33 = vadd.f32 %v2096_v43, %v1916_v3  ;;  %v7362_v3 = vpop.permute.xlu1 %2802 }
 0x1e4   : > { %v5963_v44 = vpop.f32.mrf.mxu1  ;;  %v2098_v37 = vpop.f32.mrf.mxu0 }
 0x1e5   : > { %v2204_v57 = vadd.f32 %v2098_v37, %v1917_v35  ;;  %v1110_v35 = vadd.f32 %v7299_v58, %v721_v15  ;;  %v1906_v58 = vadd.f32 %v7324_v9, %v7309_v62 }
 0x1e6   : > { %v2454_v41 = vpop.f32.mrf.mxu1  ;;  %v2359_v10 = vpop.f32.mrf.mxu0 }
 0x1e7   : > { %v1397_v40 = vadd.f32 %v7305_v54, %v1110_v35  ;;  %v2193_v35 = vadd.f32 %v2167_v12, %v1906_v58 }
 0x1e8   : > { %v5976_v63 = vpop.f32.mrf.mxu1  ;;  %v2361_v59 = vpop.f32.mrf.mxu0 }
 0x1e9   : > { %v1618_v52 = vadd.f32 %v7313_v46, %v1397_v40  ;;  %v2842_v63 = vshrl.u32 %v2841_v56, 7 }
 0x1ea   : > { %v7350_v1 = vpop.f32.mrf.mxu1  ;;  %v7352_v60 = vpop.f32.mrf.mxu0 }
 0x1eb   : > { %v1905_v54 = vadd.f32 %v7329_v45, %v1618_v52  ;;  %v2843_v62 = vsub.s32 0, %v2842_v63  ;;  %v277_v45 = vld [vmem:[%s8826_s5] sm:$0x7] }
 0x1ec   : > { %v5979_v42 = vpop.f32.mrf.mxu1  ;;  %v7354_v2 = vpop.f32.mrf.mxu0 }
 0x1ed   : > { %v1904_v42 = vadd.f32 %v7326_v5, %v7311_v16  ;;  %v2192_v9 = vadd.f32 %v7338_v50, %v1905_v54  ;;  %v2480_v16 = vadd.f32 %v2454_v41, %v2193_v35  ;;  %v7390_v41 = vrot.slane %v277_v45, %v2843_v62 }
 0x1ee   : > { %v7358_v55 = vpop.f32.mrf.mxu1  ;;  %v7360_v48 = vpop.f32.mrf.mxu0 }
 0x1f0   : > { %v5982_v19 = vpop.f32.mrf.mxu1  ;;  %v2373_v39 = vpop.f32.mrf.mxu0 }
 0x1f1   : > { %v7365_v32 = vadd.f32 %v2373_v39, %v2198_v49  ;;  %v7375_v49 = vpop.permute.xlu1 %2797  ;;  %v2191_v19 = vadd.f32 %v2072_v47, %v1904_v42  ;;  %v2479_v47 = vadd.f32 %v2361_v59, %v2192_v9 }
 0x1f2   : > { %v2469_v20 = vpop.f32.mrf.mxu1  ;;  %v2377_v8 = vpop.f32.mrf.mxu0 }
 0x1f3   : > { %v2489_v43 = vadd.f32 %v2469_v20, %v2202_v34  ;;  %v7368_v44 = vadd.f32 %v2377_v8, %v2200_v51  ;;  %v2851_v20 = vsub.s32 2, %v2842_v63  ;;  %v2478_v5 = vadd.f32 %v2359_v10, %v2191_v19 }
 0x1f4   : > { %v5985_v23 = vpop.f32.mrf.mxu1  ;;  %v2379_v37 = vpop.f32.mrf.mxu0 }
 0x1f5   : > { %v7377_v15 = vadd.f32 %v2379_v37, %v2201_v38  ;;  %v7388_v23 = vrot.slane %v277_v45, %v2851_v20  ;;  %v2847_v20 = vsub.s32 1, %v2842_v63 }
 0x1f6   : > { %v2474_v34 = vpop.f32.mrf.mxu1  ;;  %v2383_v51 = vpop.f32.mrf.mxu0 }
 0x1f7   : > { %v2492_v46 = vadd.f32 %v2474_v34, %v2205_v24  ;;  %v7380_v39 = vadd.f32 %v2383_v51, %v2203_v33  ;;  %v2788_v24 = vpop.permute.xlu1 %2787 }
 0x1f8   : > { %v5988_v56 = vpop.f32.mrf.mxu1  ;;  %v2385_v40 = vpop.f32.mrf.mxu0 }
 0x1f9   : > { %v7383_v8 = vadd.f32 %v2385_v40, %v2204_v57 }
 0x1fa   : > { %v2741_v38 = vpop.f32.mrf.mxu1  ;;  %v2646_v12 = vpop.f32.mrf.mxu0 }
 0x1fb   : > { %v2767_v33 = vadd.f32 %v2741_v38, %v2480_v16  ;;  %v2765_v52 = vadd.f32 %v2646_v12, %v2478_v5  ;;  %v7410_v12 = vrot.slane %v277_v45, %v2847_v20 }
 0x1fc   : > { %v6001_v37 = vpop.f32.mrf.mxu1  ;;  %v2648_v58 = vpop.f32.mrf.mxu0 }
 0x1fd   : > { %v2812_v42 = vadd.f32 %v2788_v24, %v2767_v33  ;;  %v2810_v50 = vadd.f32 %v2788_v24, %v2765_v52  ;;  %v2766_v57 = vadd.f32 %v2648_v58, %v2479_v47  ;;  %v2196_v52 = vadd.f32 %v7340_v0, %v7332_v61 }
 0x1fe   : > { %v2746_v10 = vpop.f32.mrf.mxu1  ;;  %v2652_v54 = vpop.f32.mrf.mxu0  ;;  %v2194_v37 = vadd.f32 %v7342_v53, %v7334_v36 }
 0x1ff   : > { %v2827_v34 = vmax.f32 %v2812_v42, 0.0  ;;  %v2825_v51 = vmax.f32 %v2810_v50, 0.0  ;;  %v2811_v40 = vadd.f32 %v2788_v24, %v2766_v57  ;;  %v2808_v24 = vpop.permute.xlu0 %2807  ;;  %v2483_v57 = vadd.f32 %v7350_v1, %v2196_v52 }
 0x200   : > { %v6004_v35 = vpop.f32.mrf.mxu1  ;;  %v7392_v19 = vpop.f32.mrf.mxu0 }
 0x201   : > { %v7395_v59 = vmul.f32 %v7388_v23, %v2827_v34  ;;  %v7398_v56 = vmul.f32 %v7390_v41, %v2825_v51  ;;  %v2826_v38 = vmax.f32 %v2811_v40, 0.0  ;;  %v2481_v34 = vadd.f32 %v7352_v60, %v2194_v37 }
 0x202   : > { %v7400_v9 = vpop.f32.mrf.mxu1  ;;  %v7402_v62 = vpop.f32.mrf.mxu0  ;;  %v2770_v40 = vadd.f32 %v2746_v10, %v2483_v57 }
 0x203   : > { %8899 = vst [vmem:[#allocation17_spill] sm:$0xff] %v7395_v59  ;;  %8900 = vst [vmem:[#allocation18_spill] sm:$0xff] %v7398_v56  ;;  %2955 = vrot.lane.b32.xlu0 %v7395_v59, %s6470_s27  ;;  %2901 = vrot.lane.b32.xlu1 %v7398_v56, %s6472_s28  ;;  %v7422_v50 = vmul.f32 %v7410_v12, %v2826_v38  ;;  %v2768_v1 = vadd.f32 %v2652_v54, %v2481_v34 }
 0x204   : > { %v6007_v16 = vpop.f32.mrf.mxu1  ;;  %v7408_v5 = vpop.f32.mrf.mxu0 }
 0x205   : > { %8901 = vst [vmem:[#allocation19_spill] sm:$0xff] %v7422_v50 }
 0x206   : > { %v2756_v47 = vpop.f32.mrf.mxu1  ;;  %v2664_v33 = vpop.f32.mrf.mxu0 }
 0x207   : > { %v2776_v63 = vadd.f32 %v2756_v47, %v2489_v43  ;;  %2876 = vrot.lane.b32.xlu0 %v7395_v59, %s6472_s28  ;;  %3680 = vrot.lane.b32.xlu1 %v7398_v56, %s6474_s30  ;;  %v2774_v58 = vadd.f32 %v2664_v33, %v7368_v44 }
 0x208   : > { %v6010_v45 = vpop.f32.mrf.mxu1  ;;  %v2666_v42 = vpop.f32.mrf.mxu0 }
 0x209   : > { %v2821_v43 = vadd.f32 %v7362_v3, %v2776_v63  ;;  %v2819_v51 = vadd.f32 %v7362_v3, %v2774_v58  ;;  %v2775_v61 = vadd.f32 %v2666_v42, %v7377_v15  ;;  %v2793_v15 = vpop.permute.xlu0 %2792 }
 0x20a   : > { %v2761_v0 = vpop.f32.mrf.mxu1  ;;  %v2670_v35 = vpop.f32.mrf.mxu0  ;;  %v2815_v58 = vadd.f32 %v2793_v15, %v2770_v40 }
 0x20b   : > { %v2836_v36 = vmax.f32 %v2821_v43, 0.0  ;;  %v2779_v53 = vadd.f32 %v2761_v0, %v2492_v46  ;;  %3397 = vrot.lane.b32.xlu0 %v7395_v59, %s6473_s29  ;;  %v2777_v44 = vadd.f32 %v2670_v35, %v7380_v39  ;;  %2972 = vrot.lane.b32.xlu1 %v7422_v50, %s6470_s27  ;;  %v2834_v20 = vmax.f32 %v2819_v51, 0.0 }
 0x20c   : > { %v2820_v60 = vadd.f32 %v7362_v3, %v2775_v61  ;;  %v2672_v16 = vpop.f32.mrf.mxu0  ;;  %v6013_v38 = vpop.f32.mrf.mxu1  ;;  %v2195_v3 = vadd.f32 %v7344_v28, %v7336_v29  ;;  %v2830_v28 = vmax.f32 %v2815_v58, 0.0 }
 0x20d   : > { %v7436_v47 = vmul.f32 %v7388_v23, %v2836_v36  ;;  %v2824_v46 = vadd.f32 %v2808_v24, %v2779_v53  ;;  %v2822_v33 = vadd.f32 %v2808_v24, %v2777_v44  ;;  %v2778_v63 = vadd.f32 %v2672_v16, %v7383_v8  ;;  %v7618_v38 = vld [vmem:[%s8823_s2 + $0x20] sm:$0xff] }
 0x20e   : > { %v7440_v39 = vmul.f32 %v7390_v41, %v2834_v20  ;;  %v2835_v52 = vmax.f32 %v2820_v60, 0.0  ;;  %v2813_v8 = vadd.f32 %v2793_v15, %v2768_v1  ;;  %v2482_v57 = vadd.f32 %v7354_v2, %v2195_v3  ;;  %6024 = vmatprep.mubr.msk.f32.mxu1 %vm436_vm2, %v7618_v38 }
 0x20f   : > { %8902 = vst [vmem:[#allocation20_spill] sm:$0xff] %v7436_v47  ;;  %v2839_v37 = vmax.f32 %v2824_v46, 0.0  ;;  %v2837_v10 = vmax.f32 %v2822_v33, 0.0  ;;  %v2823_v54 = vadd.f32 %v2808_v24, %v2778_v63  ;;  %3665 = vrot.lane.b32.xlu0 %v7395_v59, %s6474_s30  ;;  %2903 = vrot.lane.b32.xlu1 %v7422_v50, %s6472_s28  ;;  %v7474_v61 = vmul.f32 %v7388_v23, %v2830_v28 }
 0x210   : > { %8903 = vst [vmem:[#allocation21_spill] sm:$0xff] %v7440_v39  ;;  %v7449_v45 = vmul.f32 %v7410_v12, %v2835_v52  ;;  %v2828_v29 = vmax.f32 %v2813_v8, 0.0  ;;  %v2769_v51 = vadd.f32 %v7392_v19, %v2482_v57  ;;  %v2486_v36 = vadd.f32 %v7358_v55, %v7346_v25 }
 0x211   : > { %v7452_v42 = vmul.f32 %v7388_v23, %v2839_v37  ;;  %v7455_v43 = vmul.f32 %v7390_v41, %v2837_v10  ;;  %v2838_v24 = vmax.f32 %v2823_v54, 0.0  ;;  %8909 = vst [vmem:[#allocation27_spill] sm:$0xff] %v7474_v61  ;;  %v2484_v53 = vadd.f32 %v7360_v48, %v7348_v31 }
 0x212   : > { %8904 = vst [vmem:[#allocation22_spill] sm:$0xff] %v7449_v45  ;;  %v7471_v2 = vmul.f32 %v7390_v41, %v2828_v29  ;;  %v2814_v0 = vadd.f32 %v2793_v15, %v2769_v51  ;;  %v2773_v44 = vadd.f32 %v7400_v9, %v2486_v36  ;;  %v2772_v1 = vadd.f32 %v7408_v5, %v7365_v32 }
 0x213   : > { %8905 = vst [vmem:[#allocation23_spill] sm:$0xff] %v7452_v42  ;;  %8906 = vst [vmem:[#allocation24_spill] sm:$0xff] %v7455_v43  ;;  %v7459_v34 = vmul.f32 %v7410_v12, %v2838_v24  ;;  %2970 = vrot.lane.b32.xlu0 %v7398_v56, %s6470_s27  ;;  %3414 = vrot.lane.b32.xlu1 %v7422_v50, %s6473_s29  ;;  %v2771_v40 = vadd.f32 %v7402_v62, %v2484_v53 }
 0x214   : > { %8908 = vst [vmem:[#allocation26_spill] sm:$0xff] %v7471_v2  ;;  %v2829_v19 = vmax.f32 %v2814_v0, 0.0  ;;  %v2818_v25 = vadd.f32 %v7375_v49, %v2773_v44  ;;  %v2817_v20 = vadd.f32 %v7375_v49, %v2772_v1 }
 0x215   : > { %8907 = vst [vmem:[#allocation25_spill] sm:$0xff] %v7459_v34  ;;  %v2816_v31 = vadd.f32 %v7375_v49, %v2771_v40 }
 0x216   : > { %v7485_v35 = vmul.f32 %v7410_v12, %v2829_v19  ;;  %v2833_v55 = vmax.f32 %v2818_v25, 0.0 }
 0x217   : > { %3412 = vrot.lane.b32.xlu0 %v7398_v56, %s6473_s29  ;;  %3682 = vrot.lane.b32.xlu1 %v7422_v50, %s6474_s30  ;;  %v2831_v48 = vmax.f32 %v2816_v31, 0.0 }
 0x218   : > { %8910 = vst [vmem:[#allocation28_spill] sm:$0xff] %v7485_v35  ;;  %v7512_v9 = vmul.f32 %v7388_v23, %v2833_v55  ;;  %v2832_v23 = vmax.f32 %v2817_v20, 0.0 }
 0x219   : > { %v7515_v62 = vmul.f32 %v7390_v41, %v2831_v48 }
 0x21a   : > { %8911 = vst [vmem:[#allocation29_spill] sm:$0xff] %v7512_v9  ;;  %v7533_v32 = vmul.f32 %v7410_v12, %v2832_v23 }
 0x21b   : > { %2905 = vrot.lane.b32.xlu0 %v7471_v2, %s6472_s28  ;;  %2957 = vrot.lane.b32.xlu1 %v7474_v61, %s6470_s27  ;;  %8912 = vst [vmem:[#allocation30_spill] sm:$0xff] %v7515_v62 }
 0x21c   : > { %8913 = vst [vmem:[#allocation31_spill] sm:$0xff] %v7533_v32 }
 0x21f   : > { %3684 = vrot.lane.b32.xlu0 %v7471_v2, %s6474_s30  ;;  %2878 = vrot.lane.b32.xlu1 %v7474_v61, %s6472_s28 }
 0x223   : > { %2976 = vrot.lane.b32.xlu0 %v7485_v35, %s6470_s27  ;;  %3399 = vrot.lane.b32.xlu1 %v7474_v61, %s6473_s29 }
 0x227   : > { %2907 = vrot.lane.b32.xlu0 %v7485_v35, %s6472_s28  ;;  %3667 = vrot.lane.b32.xlu1 %v7474_v61, %s6474_s30 }
 0x22b   : > { %3418 = vrot.lane.b32.xlu0 %v7485_v35, %s6473_s29  ;;  %2974 = vrot.lane.b32.xlu1 %v7471_v2, %s6470_s27 }
 0x22f   : > { %3686 = vrot.lane.b32.xlu0 %v7485_v35, %s6474_s30  ;;  %3416 = vrot.lane.b32.xlu1 %v7471_v2, %s6473_s29 }
 0x233   : > { %2959 = vrot.lane.b32.xlu0 %v7512_v9, %s6470_s27  ;;  %2909 = vrot.lane.b32.xlu1 %v7515_v62, %s6472_s28 }
 0x237   : > { %2880 = vrot.lane.b32.xlu0 %v7512_v9, %s6472_s28  ;;  %3688 = vrot.lane.b32.xlu1 %v7515_v62, %s6474_s30 }
 0x23b   : > { %3401 = vrot.lane.b32.xlu0 %v7512_v9, %s6473_s29  ;;  %4148 = vrot.lane.b32.xlu1 %v7515_v62, %s6475_s7 }
 0x23f   : > { %3669 = vrot.lane.b32.xlu0 %v7512_v9, %s6474_s30  ;;  %2980 = vrot.lane.b32.xlu1 %v7533_v32, %s6470_s27 }
 0x243   : > { %4152 = vrot.lane.b32.xlu0 %v7512_v9, %s6475_s7  ;;  %2911 = vrot.lane.b32.xlu1 %v7533_v32, %s6472_s28 }
 0x247   : > { %2978 = vrot.lane.b32.xlu0 %v7515_v62, %s6470_s27  ;;  %3422 = vrot.lane.b32.xlu1 %v7533_v32, %s6473_s29 }
 0x24b   : > { %3420 = vrot.lane.b32.xlu0 %v7515_v62, %s6473_s29  ;;  %3690 = vrot.lane.b32.xlu1 %v7533_v32, %s6474_s30 }
 0x24f   : > { %2913 = vrot.lane.b32.xlu0 %v7440_v39, %s6472_s28  ;;  %2961 = vrot.lane.b32.xlu1 %v7436_v47, %s6470_s27 }
 0x253   : > { %3692 = vrot.lane.b32.xlu0 %v7440_v39, %s6474_s30  ;;  %2882 = vrot.lane.b32.xlu1 %v7436_v47, %s6472_s28 }
 0x257   : > { %4154 = vrot.lane.b32.xlu0 %v7440_v39, %s6475_s7  ;;  %3403 = vrot.lane.b32.xlu1 %v7436_v47, %s6473_s29 }
 0x25b   : > { %2984 = vrot.lane.b32.xlu0 %v7449_v45, %s6470_s27  ;;  %3671 = vrot.lane.b32.xlu1 %v7436_v47, %s6474_s30 }
 0x25f   : > { %2915 = vrot.lane.b32.xlu0 %v7449_v45, %s6472_s28  ;;  %4158 = vrot.lane.b32.xlu1 %v7436_v47, %s6475_s7 }
 0x263   : > { %3426 = vrot.lane.b32.xlu0 %v7449_v45, %s6473_s29  ;;  %2982 = vrot.lane.b32.xlu1 %v7440_v39, %s6470_s27 }
 0x267   : > { %3694 = vrot.lane.b32.xlu0 %v7449_v45, %s6474_s30  ;;  %3424 = vrot.lane.b32.xlu1 %v7440_v39, %s6473_s29 }
 0x26b   : > { %2963 = vrot.lane.b32.xlu0 %v7452_v42, %s6470_s27  ;;  %2884 = vrot.lane.b32.xlu1 %v7452_v42, %s6472_s28 }
 0x26f   : > { %3405 = vrot.lane.b32.xlu0 %v7452_v42, %s6473_s29  ;;  %3673 = vrot.lane.b32.xlu1 %v7452_v42, %s6474_s30 }
 0x273   : > { %2986 = vrot.lane.b32.xlu0 %v7455_v43, %s6470_s27  ;;  %4164 = vrot.lane.b32.xlu1 %v7452_v42, %s6475_s7 }
 0x275   : > { %v7591_v49 = vpop.permute.xlu0 %2955  ;;  %v7593_v41 = vpop.permute.xlu1 %2901 }
 0x277   : > { %3428 = vrot.lane.b32.xlu0 %v7455_v43, %s6473_s29  ;;  %2917 = vrot.lane.b32.xlu1 %v7455_v43, %s6472_s28 }
 0x279   : > { %v7599_v5 = vpop.permute.xlu0 %2876  ;;  %v7601_v12 = vpop.permute.xlu1 %3680 }
 0x27a   : > { %8914 = vst [vmem:[#allocation32_spill] sm:$0xff] %v7601_v12 }
 0x27b   : > { %4160 = vrot.lane.b32.xlu0 %v7455_v43, %s6475_s7  ;;  %3696 = vrot.lane.b32.xlu1 %v7455_v43, %s6474_s30 }
 0x27d   : > { %v7607_v60 = vpop.permute.xlu0 %3397  ;;  %v7609_v16 = vpop.permute.xlu1 %2972 }
 0x27f   : > { %4142 = vrot.lane.b32.xlu0 %v7471_v2, %s6475_s7  ;;  %2988 = vrot.lane.b32.xlu1 %v7459_v34, %s6470_s27 }
 0x281   : > { %v7622_v15 = vpop.permute.xlu0 %3665  ;;  %v7624_v46 = vpop.permute.xlu1 %2903 }
 0x282   : > { %8915 = vst [vmem:[#allocation33_spill] sm:$0xff] %v7622_v15 }
 0x283   : > { %4150 = vrot.lane.b32.xlu0 %v7533_v32, %s6475_s7  ;;  %4156 = vrot.lane.b32.xlu1 %v7449_v45, %s6475_s7 }
 0x285   : > { %v7630_v33 = vpop.permute.xlu0 %2970  ;;  %v7632_v63 = vpop.permute.xlu1 %3414 }
 0x287   : > { %4140 = vrot.lane.b32.xlu0 %v7395_v59, %s6475_s7  ;;  %4146 = vrot.lane.b32.xlu1 %v7474_v61, %s6475_s7 }
 0x289   : > { %v7638_v52 = vpop.permute.xlu0 %3412  ;;  %v7640_v37 = vpop.permute.xlu1 %3682 }
 0x28a   : > { %8916 = vst [vmem:[#allocation34_spill] sm:$0xff] %v7640_v37 }
 0x28b   : > { %4138 = vrot.lane.b32.xlu0 %v7422_v50, %s6475_s7  ;;  %4136 = vrot.lane.b32.xlu1 %v7398_v56, %s6475_s7 }
 0x28d   : > { %v7646_v10 = vpop.permute.xlu0 %2905  ;;  %v7648_v54 = vpop.permute.xlu1 %2957 }
 0x28f   : > { %2919 = vrot.lane.b32.xlu0 %v7459_v34, %s6472_s28  ;;  %4144 = vrot.lane.b32.xlu1 %v7485_v35, %s6475_s7 }
 0x291   : > { %v7654_v3 = vpop.permute.xlu0 %3684  ;;  %v7656_v58 = vpop.permute.xlu1 %2878 }
 0x292   : > { %8917 = vst [vmem:[#allocation35_spill] sm:$0xff] %v7654_v3 }
 0x293   : > { %4432 = vrot.lane.b32.xlu0 %v7452_v42, %s6476_s8  ;;  %4428 = vrot.lane.b32.xlu1 %v7455_v43, %s6476_s8 }
 0x295   : > { %v7662_v8 = vpop.permute.xlu0 %2976  ;;  %v7664_v24 = vpop.permute.xlu1 %3399 }
 0x297   : > { %4424 = vrot.lane.b32.xlu0 %v7449_v45, %s6476_s8  ;;  %4426 = vrot.lane.b32.xlu1 %v7436_v47, %s6476_s8 }
 0x299   : > { %v7670_v57 = vpop.permute.xlu0 %2907  ;;  %v7672_v29 = vpop.permute.xlu1 %3667 }
 0x29a   : > { %8918 = vst [vmem:[#allocation36_spill] sm:$0xff] %v7672_v29 }
 0x29b   : > { %4422 = vrot.lane.b32.xlu0 %v7440_v39, %s6476_s8  ;;  %3430 = vrot.lane.b32.xlu1 %v7459_v34, %s6473_s29 }
 0x29d   : > { %v7678_v28 = vpop.permute.xlu0 %3418  ;;  %v7680_v51 = vpop.permute.xlu1 %2974 }
 0x29f   : > { %4420 = vrot.lane.b32.xlu0 %v7512_v9, %s6476_s8  ;;  %4418 = vrot.lane.b32.xlu1 %v7533_v32, %s6476_s8 }
 0x2a1   : > { %v7686_v0 = vpop.permute.xlu0 %3686  ;;  %v7688_v19 = vpop.permute.xlu1 %3416 }
 0x2a2   : > { %8919 = vst [vmem:[#allocation37_spill] sm:$0xff] %v7686_v0 }
 0x2a3   : > { %4412 = vrot.lane.b32.xlu0 %v7485_v35, %s6476_s8  ;;  %4416 = vrot.lane.b32.xlu1 %v7515_v62, %s6476_s8 }
 0x2a5   : > { %v7694_v36 = vpop.permute.xlu0 %2959  ;;  %v7696_v53 = vpop.permute.xlu1 %2909 }
 0x2a7   : > { %4410 = vrot.lane.b32.xlu0 %v7471_v2, %s6476_s8  ;;  %4414 = vrot.lane.b32.xlu1 %v7474_v61, %s6476_s8 }
 0x2a9   : > { %v7702_v44 = vpop.permute.xlu0 %2880  ;;  %v3689_v40 = vpop.permute.xlu1 %3688 }
 0x2ab   : > { %3698 = vrot.lane.b32.xlu0 %v7459_v34, %s6474_s30  ;;  %4406 = vrot.lane.b32.xlu1 %v7422_v50, %s6476_s8 }
 0x2ad   : > { %v3402_v25 = vpop.permute.xlu0 %3401  ;;  %v7708_v31 = vpop.permute.xlu1 %4148 }
 0x2ae   : > { %8920 = vst [vmem:[#allocation38_spill] sm:$0xff] %v7708_v31 }
 0x2af   : > { %4408 = vrot.lane.b32.xlu0 %v7395_v59, %s6476_s8  ;;  %4404 = vrot.lane.b32.xlu1 %v7398_v56, %s6476_s8 }
 0x2b1   : > { %v3670_v55 = vpop.permute.xlu0 %3669  ;;  %v7714_v48 = vpop.permute.xlu1 %2980 }
 0x2b2   : > { %v7717_v1 = vsel %vm1159_vm5, %v3670_v55, %v3689_v40 }
 0x2b3   : > { %4696 = vrot.lane.b32.xlu0 %v7455_v43, %s6477_s9  ;;  %4700 = vrot.lane.b32.xlu1 %v7452_v42, %s6477_s9 }
 0x2b5   : > { %v7723_v20 = vpop.permute.xlu0 %4152  ;;  %v7725_v23 = vpop.permute.xlu1 %2911 }
 0x2b6   : > { %8921 = vst [vmem:[#allocation39_spill] sm:$0xff] %v7723_v20  ;;  %v7730_v7 = vsel %vm328_vm3, %v7725_v23, %v7702_v44 }
 0x2b7   : > { %4690 = vrot.lane.b32.xlu0 %v7440_v39, %s6477_s9  ;;  %4694 = vrot.lane.b32.xlu1 %v7436_v47, %s6477_s9 }
 0x2b9   : > { %v7736_v4 = vpop.permute.xlu0 %2978  ;;  %v3423_v30 = vpop.permute.xlu1 %3422 }
 0x2ba   : > { %v7739_v6 = vsel %vm872_vm4, %v3423_v30, %v3402_v25 }
 0x2bb   : > { %4688 = vrot.lane.b32.xlu0 %v7512_v9, %s6477_s9  ;;  %4684 = vrot.lane.b32.xlu1 %v7515_v62, %s6477_s9 }
 0x2bd   : > { %v3421_v22 = vpop.permute.xlu0 %3420  ;;  %v3691_v18 = vpop.permute.xlu1 %3690 }
 0x2be   : > { %v7746_v11 = vsel %vm872_vm4, %v3402_v25, %v3421_v22  ;;  %v7749_v14 = vsel %vm872_vm4, %v3421_v22, %v3423_v30  ;;  %v7752_v13 = vsel %vm1159_vm5, %v3689_v40, %v3691_v18  ;;  %v7755_v17 = vsel %vm1159_vm5, %v3691_v18, %v3670_v55 }
 0x2bf   : > { %8922 = vst [vmem:[#allocation40_spill] sm:$0xff] %v7755_v17  ;;  %4678 = vrot.lane.b32.xlu0 %v7471_v2, %s6477_s9  ;;  %4692 = vrot.lane.b32.xlu1 %v7449_v45, %s6477_s9 }
 0x2c1   : > { %v7761_v27 = vpop.permute.xlu0 %2913  ;;  %v7763_v21 = vpop.permute.xlu1 %2961 }
 0x2c3   : > { %4162 = vrot.lane.b32.xlu0 %v7459_v34, %s6475_s7  ;;  %4682 = vrot.lane.b32.xlu1 %v7474_v61, %s6477_s9 }
 0x2c5   : > { %v3693_v22 = vpop.permute.xlu0 %3692  ;;  %v7769_v30 = vpop.permute.xlu1 %2882 }
 0x2c7   : > { %4686 = vrot.lane.b32.xlu0 %v7533_v32, %s6477_s9  ;;  %4672 = vrot.lane.b32.xlu1 %v7398_v56, %s6477_s9 }
 0x2c9   : > { %v7775_v18 = vpop.permute.xlu0 %4154  ;;  %v7777_v40 = vpop.permute.xlu1 %3403 }
 0x2cb   : > { %4676 = vrot.lane.b32.xlu0 %v7395_v59, %s6477_s9  ;;  %4430 = vrot.lane.b32.xlu1 %v7459_v34, %s6476_s8 }
 0x2cd   : > { %v2985_v25 = vpop.permute.xlu0 %2984  ;;  %v3672_v55 = vpop.permute.xlu1 %3671 }
 0x2ce   : > { %v7784_v26 = vsel %vm1159_vm5, %v3672_v55, %v3693_v22 }
 0x2cf   : > { %4674 = vrot.lane.b32.xlu0 %v7422_v50, %s6477_s9  ;;  %4680 = vrot.lane.b32.xlu1 %v7485_v35, %s6477_s9 }
 0x2d1   : > { %v7790_v20 = vpop.permute.xlu0 %2915  ;;  %v4159_v31 = vpop.permute.xlu1 %4158 }
 0x2d2   : > { %v7794_v15 = vsel %vm1662_vm6, %v4159_v31, %v7775_v18 }
 0x2d3   : > { %8923 = vst [vmem:[#allocation41_spill] sm:$0xff] %v7794_v15  ;;  %4968 = vrot.lane.b32.xlu0 %v7452_v42, %s6478_s10  ;;  %4964 = vrot.lane.b32.xlu1 %v7455_v43, %s6478_s10 }
 0x2d5   : > { %v7800_v12 = vpop.permute.xlu0 %3426  ;;  %v2983_v37 = vpop.permute.xlu1 %2982 }
 0x2d6   : > { %v2996_v17 = vsel %vm399_vm1, %v2983_v37, %v2985_v25 }
 0x2d7   : > { %4960 = vrot.lane.b32.xlu0 %v7449_v45, %s6478_s10  ;;  %4962 = vrot.lane.b32.xlu1 %v7436_v47, %s6478_s10 }
 0x2d9   : > { %v3695_v29 = vpop.permute.xlu0 %3694  ;;  %v7806_v3 = vpop.permute.xlu1 %3424 }
 0x2da   : > { %v7809_v15 = vsel %vm1159_vm5, %v3693_v22, %v3695_v29  ;;  %v7812_v42 = vsel %vm1159_vm5, %v3695_v29, %v3672_v55 }
 0x2db   : > { %4958 = vrot.lane.b32.xlu0 %v7440_v39, %s6478_s10  ;;  %4954 = vrot.lane.b32.xlu1 %v7533_v32, %s6478_s10 }
 0x2dd   : > { %v2964_v43 = vpop.permute.xlu0 %2963  ;;  %v7818_v45 = vpop.permute.xlu1 %2884 }
 0x2df   : > { %4698 = vrot.lane.b32.xlu0 %v7459_v34, %s6477_s9  ;;  %4952 = vrot.lane.b32.xlu1 %v7515_v62, %s6478_s10 }
 0x2e1   : > { %v7824_v22 = vpop.permute.xlu0 %3405  ;;  %v7826_v47 = vpop.permute.xlu1 %3673 }
 0x2e3   : > { %4956 = vrot.lane.b32.xlu0 %v7512_v9, %s6478_s10  ;;  %4966 = vrot.lane.b32.xlu1 %v7459_v34, %s6478_s10 }
 0x2e5   : > { %v2987_v29 = vpop.permute.xlu0 %2986  ;;  %v7832_v55 = vpop.permute.xlu1 %4164 }
 0x2e6   : > { %8924 = vst [vmem:[#allocation42_spill] sm:$0xff] %v7832_v55  ;;  %v5208_v55 = vld [vmem:[%s8825_s4] sm:$0xff] }
 0x2e7   : > { %4948 = vrot.lane.b32.xlu0 %v7485_v35, %s6478_s10  ;;  %4950 = vrot.lane.b32.xlu1 %v7474_v61, %s6478_s10 }
 0x2e9   : > { %v7838_v62 = vpop.permute.xlu0 %3428  ;;  %v7840_v32 = vpop.permute.xlu1 %2917 }
 0x2eb   : > { %4946 = vrot.lane.b32.xlu0 %v7471_v2, %s6478_s10  ;;  %4942 = vrot.lane.b32.xlu1 %v7422_v50, %s6478_s10  ;;  %v5209_v2 = vld [vmem:[%s8825_s4 + $0x8] sm:$0xff] }
 0x2ed   : > { %v7846_v9 = vpop.permute.xlu0 %4160  ;;  %v7848_v39 = vpop.permute.xlu1 %3696 }
 0x2ee   : > { %8925 = vst [vmem:[#allocation43_spill] sm:$0xff] %v7846_v9 }
 0x2ef   : > { %4944 = vrot.lane.b32.xlu0 %v7395_v59, %s6478_s10  ;;  %4940 = vrot.lane.b32.xlu1 %v7398_v56, %s6478_s10  ;;  %v3019_v59 = vsel %vm399_vm1, %v2964_v43, %v2987_v29  ;;  %v5210_v56 = vld [vmem:[%s8825_s4 + $0x10] sm:$0xff] }
 0x2f1   : > { %v7860_v61 = vpop.permute.xlu0 %4142  ;;  %v2989_v50 = vpop.permute.xlu1 %2988 }
 0x2f2   : > { %v2998_v9 = vsel %vm399_vm1, %v2987_v29, %v2989_v50  ;;  %v2999_v35 = vsel %vm399_vm1, %v2989_v50, %v2964_v43  ;;  %v2997_v50 = vsel %vm399_vm1, %v2985_v25, %v7763_v21  ;;  %v5211_v43 = vld [vmem:[%s8825_s4 + $0x18] sm:$0xff] }
 0x2f3   : > { %5214 = vperm.xlu0 %6459, %v5208_v55   ;;  %5219 = vperm.xlu1 %6460, %v5209_v2   ;;  %v3018_v2 = vsel %vm399_vm1, %v7763_v21, %v2983_v37  ;;  %v2995_v21 = vsel %vm399_vm1, %v7714_v48, %v7694_v36 }
 0x2f4   : > { %3059 = vmatprep.subr.mxu0 %v2998_v9  ;;  %6014 = vmatprep.subr.mxu1 %v2999_v35 }
 0x2f5   : > { %3060 = vmatpush1.msra.mxu0 %v3019_v59  ;;  %6015 = vmatpush3.msra.mxu1 %v2999_v35  ;;  %v7868_v34 = vpop.permute.xlu0 %4150  ;;  %v4157_v0 = vpop.permute.xlu1 %4156  ;;  %v2994_v35 = vsel %vm399_vm1, %v7736_v4, %v7714_v48 }
 0x2f6   : > { %v7880_v9 = vsel %vm1662_vm6, %v7775_v18, %v4157_v0  ;;  %3061 = vmatprep.subr.mxu0 %v2996_v17  ;;  %6016 = vmatprep.subr.mxu1 %v2997_v50  ;;  %v7883_v59 = vsel %vm1662_vm6, %v4157_v0, %v4159_v31  ;;  %v3017_v17 = vsel %vm399_vm1, %v7694_v36, %v7736_v4 }
 0x2f7   : > { %5224 = vperm.xlu0 %6459, %v5210_v56   ;;  %3062 = vmatpush1.msra.mxu0 %v3018_v2  ;;  %v2992_v56 = vsel %vm399_vm1, %v7680_v51, %v7662_v8  ;;  %v2993_v31 = vsel %vm399_vm1, %v7662_v8, %v7648_v54  ;;  %v3016_v4 = vsel %vm399_vm1, %v7648_v54, %v7680_v51  ;;  %v5513_v51 = vld [vmem:[%s8823_s2 + $0x28] sm:$0xff] }
 0x2f8   : > { %6017 = vmatpush3.msra.mxu1 %v2997_v50  ;;  %5229 = vperm.xlu1 %6460, %v5211_v43   ;;  %v2990_v36 = vsel %vm399_vm1, %v7630_v33, %v7609_v16  ;;  %v2991_v8 = vsel %vm399_vm1, %v7609_v16, %v7591_v49  ;;  %v3015_v18 = vsel %vm399_vm1, %v7591_v49, %v7630_v33  ;;  %v5514_v49 = vld [vmem:[%s8823_s2 + $0x30] sm:$0xff]  ;;  %v8926_v33 = vmov 0.0  }
 0x2f9   : > { %3063 = vmatprep.subr.mxu0 %v2994_v35  ;;  %6018 = vmatprep.subr.mxu1 %v2995_v21  ;;  %v4141_v37 = vpop.permute.xlu0 %4140  ;;  %v4147_v0 = vpop.permute.xlu1 %4146 }
 0x2fa   : > { %3064 = vmatpush1.msra.mxu0 %v3017_v17  ;;  %6019 = vmatpush3.msra.mxu1 %v2995_v21  ;;  %v7902_v48 = vsel %vm1662_vm6, %v4147_v0, %v7860_v61  ;;  %v2950_v17 = vsel %vm328_vm3, %v7818_v45, %v7840_v32 }
 0x2fb   : > { %3065 = vmatprep.subr.mxu0 %v2992_v56  ;;  %6020 = vmatprep.subr.mxu1 %v2993_v31 }
 0x2fc   : > { %3066 = vmatpush1.msra.mxu0 %v3016_v4  ;;  %6021 = vmatpush3.msra.mxu1 %v2993_v31  ;;  %v2948_v31 = vsel %vm328_vm3, %v7702_v44, %v7696_v53  ;;  %v2924_v44 = vsel %vm328_vm3, %v7670_v57, %v7656_v58 }
 0x2fd   : > { %3067 = vmatprep.subr.mxu0 %v2990_v36  ;;  %6022 = vmatprep.subr.mxu1 %v2991_v8  ;;  %v4139_v25 = vpop.permute.xlu0 %4138  ;;  %v4137_v29 = vpop.permute.xlu1 %4136  ;;  %v2921_v36 = vsel %vm328_vm3, %v7593_v41, %v7624_v46 }
 0x2fe   : > { %3068 = vmatpush1.msra.mxu0 %v3015_v18  ;;  %6023 = vmatpush3.msra.mxu1 %v2991_v8  ;;  %v7917_v54 = vsel %vm1662_vm6, %v4137_v29, %v4139_v25  ;;  %v7923_v55 = vsel %vm1662_vm6, %v4141_v37, %v4137_v29  ;;  %v7926_v16 = vsel %vm1662_vm6, %v4139_v25, %v4141_v37 }
 0x2ff   : > { %5516 = vmatmul.mubr.msk.f32.vlgmr.msra.gmra.mxu0 %vm436_vm2, %v7618_v38  ;;  %6025 = vmatmul.mubr.msk.f32.vlgmr.msra.gmra.mxu1 %vm436_vm2, %v5513_v51  ;;  %v2928_v37 = vsel %vm328_vm3, %v7790_v20, %v7769_v30  ;;  %v2922_v8 = vsel %vm328_vm3, %v7624_v46, %v7599_v5  ;;  %v2952_v46 = vld [vmem:[%s8823_s2 + $0x8] sm:$0xff] }
 0x300   : > { %3107 = vmatprep.mubr.f32.mxu0 %v8926_v33  ;;  %6027 = vmatprep.mubr.msk.f32.mxu1 %vm436_vm2, %v5514_v49 }
 0x301   : > { %v2920_v50 = vpop.permute.xlu0 %2919  ;;  %v4145_v43 = vpop.permute.xlu1 %4144 }
 0x302   : > { %v7938_v2 = vsel %vm1662_vm6, %v7860_v61, %v4145_v43  ;;  %v2929_v35 = vsel %vm328_vm3, %v7840_v32, %v2920_v50  ;;  %v2930_v38 = vsel %vm328_vm3, %v2920_v50, %v7818_v45  ;;  %v7945_v21 = vsel %vm1662_vm6, %v4145_v43, %v4147_v0  ;;  %v2953_v50 = vld [vmem:[%s8823_s2 + $0x10] sm:$0xff] }
 0x303   : > { %5517 = vmatmul.mubr.msk.f32.gmra.mxu0 %vm436_vm2, %v5513_v51  ;;  %3245 = vmatprep.subr.mxu1 %v2929_v35  ;;  %v2927_v61 = vsel %vm328_vm3, %v7761_v27, %v7790_v20  ;;  %v2949_v45 = vsel %vm328_vm3, %v7769_v30, %v7761_v27  ;;  %v2925_v20 = vsel %vm328_vm3, %v7696_v53, %v7725_v23  ;;  %v5515_v27 = vld [vmem:[%s8823_s2 + $0x38] sm:$0xff] }
 0x304   : > { %6030 = vmatprep.subr.mxu0 %v2930_v38  ;;  %3246 = vmatpush1.msra.mxu1 %v2950_v17  ;;  %v2923_v23 = vsel %vm328_vm3, %v7646_v10, %v7670_v57  ;;  %v2951_v57 = vld [vmem:[%s8823_s2] sm:$0xff]  ;;  %v3461_v43 = vsel %vm872_vm4, %v7824_v22, %v7838_v62  ;;  %v2954_v35 = vld [vmem:[%s8823_s2 + $0x18] sm:$0xff] }
 0x305   : > { %6031 = vmatpush3.msra.mxu0 %v2930_v38  ;;  %3113 = vmatprep.mubr.f32.mxu0 %v8926_v33  ;;  %v7958_v0 = vpop.permute.xlu0 %4432  ;;  %v7960_v56 = vpop.permute.xlu1 %4428  ;;  %v3438_v38 = vsel %vm872_vm4, %v7806_v3, %v7800_v12 }
 0x306   : > { %3247 = vmatprep.subr.mxu1 %v2927_v61  ;;  %6032 = vmatprep.subr.mxu0 %v2928_v37  ;;  %v7968_v32 = vsel %vm1949_vm7, %v7958_v0, %v7960_v56  ;;  %v3460_v61 = vsel %vm872_vm4, %v7777_v40, %v7806_v3  ;;  %v3434_v3 = vsel %vm872_vm4, %v7688_v19, %v7678_v28 }
 0x307   : > { %5518 = vmatmul.mubr.msk.f32.gmra.mxu0 %vm436_vm2, %v5514_v49  ;;  %3248 = vmatpush1.msra.mxu1 %v2949_v45 }
 0x308   : > { %6033 = vmatpush3.msra.mxu0 %v2928_v37  ;;  %3249 = vmatprep.subr.mxu1 %v2925_v20 }
 0x309   : > { %6034 = vmatprep.subr.mxu0 %v7730_v7  ;;  %3250 = vmatpush1.msra.mxu1 %v2948_v31  ;;  %v4425_v30 = vpop.permute.xlu0 %4424  ;;  %v4427_v4 = vpop.permute.xlu1 %4426 }
 0x30a   : > { %6035 = vmatpush3.msra.mxu0 %v7730_v7  ;;  %3119 = vmatprep.mubr.f32.mxu0 %v8926_v33  ;;  %v7987_v53 = vsel %vm1949_vm7, %v4425_v30, %v4427_v4  ;;  %v2947_v7 = vsel %vm328_vm3, %v7656_v58, %v7646_v10  ;;  %v2946_v10 = vsel %vm328_vm3, %v7599_v5, %v7593_v41 }
 0x30b   : > { %6028 = vmatmul.mubr.msk.f32.gmra.mxu1 %vm436_vm2, %v5515_v27  ;;  %3251 = vmatprep.subr.mxu1 %v2923_v23 }
 0x30c   : > { %6036 = vmatprep.subr.mxu0 %v2924_v44  ;;  %5519 = vmatmul.mubr.msk.f32.gmra.mxu0 %vm436_vm2, %v5515_v27 }
 0x30d   : > { %3252 = vmatpush1.msra.mxu1 %v2947_v7  ;;  %6037 = vmatpush3.msra.mxu0 %v2924_v44  ;;  %v4423_v18 = vpop.permute.xlu0 %4422  ;;  %v3431_v25 = vpop.permute.xlu1 %3430  ;;  %v8927_v7 = vld [vmem:[#allocation40_spill] sm:$0xff] }
 0x30e   : > { %3253 = vmatprep.subr.mxu1 %v2921_v36  ;;  %6038 = vmatprep.subr.mxu0 %v2922_v8  ;;  %v8010_v58 = vsel %vm1949_vm7, %v4423_v18, %v4425_v30  ;;  %v3440_v29 = vsel %vm872_vm4, %v7838_v62, %v3431_v25  ;;  %v8019_v51 = vsel %vm1949_vm7, %v4427_v4, %v4423_v18  ;;  %v5535_v4 = vld [vmem:[%s8823_s2 + $0x58] sm:$0xff]  ;;  %v8929_v36 = vld [vmem:[#allocation35_spill] sm:$0xff] }
 0x30f   : > { %3254 = vmatpush1.msra.mxu1 %v2946_v10  ;;  %3287 = vmatprep.mubr.f32.mxu1 %v8926_v33  ;;  %v3441_v41 = vsel %vm872_vm4, %v3431_v25, %v7824_v22  ;;  %v3439_v62 = vsel %vm872_vm4, %v7800_v12, %v7777_v40  ;;  %v3458_v40 = vsel %vm872_vm4, %v7664_v24, %v7688_v19  ;;  %v8933_v25 = vld [vmem:[#allocation33_spill] sm:$0xff] }
 0x310   : > { %6039 = vmatpush3.msra.mxu0 %v2922_v8  ;;  %5524 = vmatmul.mubr.msk.f32.vlgmr.msra.gmra.mxu1 %vm436_vm2, %v2951_v57  ;;  %v3729_v30 = vsel %vm1159_vm5, %v7826_v47, %v7848_v39  ;;  %v8931_v8 = vld [vmem:[#allocation34_spill] sm:$0xff] }
 0x311   : > { %6040 = vmatprep.mubr.msk.f32.mxu0 %vm436_vm2, %v2951_v57  ;;  %3293 = vmatprep.mubr.f32.mxu1 %v8926_v33  ;;  %v8026_v5 = vpop.permute.xlu0 %4420  ;;  %v8028_v49 = vpop.permute.xlu1 %4418  ;;  %v8932_v57 = vld [vmem:[#allocation32_spill] sm:$0xff]  ;;  %v3701_v10 = vsel %vm1159_vm5, %v8931_v8, %v8933_v25 }
 0x312   : > { %6041 = vmatmul.mubr.msk.f32.vlgmr.msra.gmra.mxu0 %vm436_vm2, %v2952_v46  ;;  %3501 = vmatprep.subr.mxu0 %v3440_v29  ;;  %v3700_v18 = vsel %vm1159_vm5, %v8932_v57, %v8931_v8  ;;  %v8950_v8 = vld [vmem:[#allocation42_spill] sm:$0xff] }
 0x313   : > { %6046 = vmatprep.subr.mxu1 %v3441_v41  ;;  %3502 = vmatpush1.msra.mxu0 %v3461_v43  ;;  %v5545_v43 = vld [vmem:[%s8823_s2 + $0x68] sm:$0xff] }
 0x314   : > { %5525 = vmatmul.mubr.msk.f32.gmra.mxu1 %vm436_vm2, %v2952_v46  ;;  %6043 = vmatprep.mubr.msk.f32.mxu0 %vm436_vm2, %v2953_v50  ;;  %v5544_v46 = vld [vmem:[%s8823_s2 + $0x60] sm:$0xff] }
 0x315   : > { %6047 = vmatpush3.msra.mxu1 %v3441_v41  ;;  %3503 = vmatprep.subr.mxu0 %v3438_v38  ;;  %v8048_v22 = vpop.permute.xlu0 %4412  ;;  %v8050_v17 = vpop.permute.xlu1 %4416 }
 0x316   : > { %6048 = vmatprep.subr.mxu1 %v3439_v62  ;;  %6044 = vmatmul.mubr.msk.f32.gmra.mxu0 %vm436_vm2, %v2954_v35 }
 0x317   : > { %3504 = vmatpush1.msra.mxu0 %v3460_v61  ;;  %6049 = vmatpush3.msra.mxu1 %v3439_v62  ;;  %v8935_v61 = vld [vmem:[#allocation23_spill] sm:$0xff] }
 0x318   : > { %3299 = vmatprep.mubr.f32.mxu1 %v8926_v33  ;;  %3505 = vmatprep.subr.mxu0 %v7749_v14  ;;  %v3435_v14 = vsel %vm872_vm4, %v7678_v28, %v7664_v24  ;;  %v5532_v28 = vld [vmem:[%s8823_s2 + $0x40] sm:$0xff]  ;;  %v3457_v24 = vsel %vm872_vm4, %v7607_v60, %v7638_v52 }
 0x319   : > { %6050 = vmatprep.subr.mxu1 %v7739_v6  ;;  %5526 = vmatmul.mubr.msk.f32.gmra.mxu1 %vm436_vm2, %v2953_v50  ;;  %v8060_v12 = vpop.permute.xlu0 %4410  ;;  %v8062_v37 = vpop.permute.xlu1 %4414  ;;  %v3725_v50 = vsel %vm1159_vm5, %v8933_v25, %v8932_v57 }
 0x31a   : > { %3506 = vmatpush1.msra.mxu0 %v7746_v11  ;;  %6051 = vmatpush3.msra.mxu1 %v7739_v6  ;;  %v3432_v6 = vsel %vm872_vm4, %v7638_v52, %v7632_v63  ;;  %v3433_v11 = vsel %vm872_vm4, %v7632_v63, %v7607_v60  ;;  %v5533_v63 = vld [vmem:[%s8823_s2 + $0x48] sm:$0xff]  ;;  %v5534_v60 = vld [vmem:[%s8823_s2 + $0x50] sm:$0xff] }
 0x31b   : > { %3507 = vmatprep.subr.mxu0 %v3434_v3  ;;  %6052 = vmatprep.subr.mxu1 %v3435_v14  ;;  %v8936_v3 = vld [vmem:[#allocation24_spill] sm:$0xff] }
 0x31c   : > { %3508 = vmatpush1.msra.mxu0 %v3458_v40  ;;  %6053 = vmatpush3.msra.mxu1 %v3435_v14  ;;  %v5546_v14 = vld [vmem:[%s8823_s2 + $0x70] sm:$0xff]  ;;  %v8937_v40 = vld [vmem:[#allocation22_spill] sm:$0xff] }
 0x31d   : > { %3305 = vmatprep.mubr.f32.mxu1 %v8926_v33  ;;  %3509 = vmatprep.subr.mxu0 %v3432_v6  ;;  %v3699_v45 = vpop.permute.xlu0 %3698  ;;  %v8085_v20 = vpop.permute.xlu1 %4406  ;;  %v8938_v6 = vld [vmem:[#allocation20_spill] sm:$0xff] }
 0x31e   : > { %6054 = vmatprep.subr.mxu1 %v3433_v11  ;;  %5527 = vmatmul.mubr.msk.f32.gmra.mxu1 %vm436_vm2, %v2954_v35  ;;  %v3708_v19 = vsel %vm1159_vm5, %v7848_v39, %v3699_v45  ;;  %v3709_v31 = vsel %vm1159_vm5, %v3699_v45, %v7826_v47  ;;  %v8934_v35 = vld [vmem:[#allocation25_spill] sm:$0xff] }
 0x31f   : > { %3510 = vmatpush1.msra.mxu0 %v3457_v24  ;;  %3543 = vmatprep.mubr.f32.mxu0 %v8926_v33 }
 0x320   : > { %6055 = vmatpush3.msra.mxu1 %v3433_v11  ;;  %5536 = vmatmul.mubr.msk.f32.vlgmr.msra.gmra.mxu0 %vm436_vm2, %v5532_v28  ;;  %v8939_v11 = vld [vmem:[#allocation21_spill] sm:$0xff] }
 0x321   : > { %6056 = vmatprep.mubr.msk.f32.mxu1 %vm436_vm2, %v5532_v28  ;;  %3549 = vmatprep.mubr.f32.mxu0 %v8926_v33  ;;  %v8105_v52 = vpop.permute.xlu0 %4408  ;;  %v8107_v27 = vpop.permute.xlu1 %4404  ;;  %v5547_v28 = vld [vmem:[%s8823_s2 + $0x78] sm:$0xff] }
 0x322   : > { %6057 = vmatmul.mubr.msk.f32.vlgmr.msra.gmra.mxu1 %vm436_vm2, %v5533_v63  ;;  %3769 = vmatprep.subr.mxu1 %v3708_v19  ;;  %v8941_v19 = vld [vmem:[#allocation29_spill] sm:$0xff] }
 0x323   : > { %6062 = vmatprep.subr.mxu0 %v3709_v31  ;;  %6059 = vmatprep.mubr.msk.f32.mxu1 %vm436_vm2, %v5534_v60 }
 0x324   : > { %5537 = vmatmul.mubr.msk.f32.gmra.mxu0 %vm436_vm2, %v5533_v63  ;;  %3770 = vmatpush1.msra.mxu1 %v3729_v30  ;;  %v8940_v63 = vld [vmem:[#allocation31_spill] sm:$0xff]  ;;  %v8943_v30 = vld [vmem:[#allocation28_spill] sm:$0xff] }
 0x325   : > { %6063 = vmatpush3.msra.mxu0 %v3709_v31  ;;  %3555 = vmatprep.mubr.f32.mxu0 %v8926_v33  ;;  %v8119_v23 = vpop.permute.xlu0 %4696  ;;  %v8121_v44 = vpop.permute.xlu1 %4700  ;;  %v8942_v31 = vld [vmem:[#allocation30_spill] sm:$0xff] }
 0x326   : > { %6060 = vmatmul.mubr.msk.f32.gmra.mxu1 %vm436_vm2, %v5535_v4  ;;  %3771 = vmatprep.subr.mxu1 %v7809_v15  ;;  %v8928_v15 = vld [vmem:[#allocation37_spill] sm:$0xff] }
 0x327   : > { %6064 = vmatprep.subr.mxu0 %v7812_v42  ;;  %3772 = vmatpush1.msra.mxu1 %v7784_v26  ;;  %v3702_v26 = vsel %vm1159_vm5, %v8929_v36, %v8928_v15 }
 0x328   : > { %5538 = vmatmul.mubr.msk.f32.gmra.mxu0 %vm436_vm2, %v5534_v60  ;;  %3773 = vmatprep.subr.mxu1 %v7752_v13  ;;  %v8930_v13 = vld [vmem:[#allocation36_spill] sm:$0xff] }
 0x329   : > { %6065 = vmatpush3.msra.mxu0 %v7812_v42  ;;  %3774 = vmatpush1.msra.mxu1 %v7717_v1  ;;  %v8131_v47 = vpop.permute.xlu0 %4690  ;;  %v8133_v39 = vpop.permute.xlu1 %4694  ;;  %v3703_v42 = vsel %vm1159_vm5, %v8928_v15, %v8930_v13  ;;  %v3726_v1 = vsel %vm1159_vm5, %v8930_v13, %v8929_v36  ;;  %v8945_v15 = vld [vmem:[#allocation26_spill] sm:$0xff]  ;;  %v8946_v36 = vld [vmem:[#allocation19_spill] sm:$0xff]  ;;  %v8947_v13 = vld [vmem:[#allocation17_spill] sm:$0xff] }
 0x32a   : > { %6066 = vmatprep.subr.mxu0 %v8927_v7  ;;  %3561 = vmatprep.mubr.f32.mxu0 %v8926_v33 }
 0x32b   : > { %6067 = vmatpush3.msra.mxu0 %v8927_v7  ;;  %3775 = vmatprep.subr.mxu1 %v3702_v26  ;;  %v5556_v26 = vld [vmem:[%s8823_s2 + $0x80] sm:$0xff] }
 0x32c   : > { %6068 = vmatprep.subr.mxu0 %v3703_v42  ;;  %5539 = vmatmul.mubr.msk.f32.gmra.mxu0 %vm436_vm2, %v5535_v4  ;;  %v8944_v4 = vld [vmem:[#allocation27_spill] sm:$0xff] }
 0x32d   : > { %3776 = vmatpush1.msra.mxu1 %v3726_v1  ;;  %6069 = vmatpush3.msra.mxu0 %v3703_v42  ;;  %v8157_v29 = vpop.permute.xlu0 %4688  ;;  %v8159_v41 = vpop.permute.xlu1 %4684  ;;  %v8948_v42 = vld [vmem:[#allocation18_spill] sm:$0xff]  ;;  %v8949_v1 = vld [vmem:[#allocation43_spill] sm:$0xff] }
 0x32e   : > { %3777 = vmatprep.subr.mxu1 %v3700_v18  ;;  %6070 = vmatprep.subr.mxu0 %v3701_v10  ;;  %v4200_v57 = vsel %vm1662_vm6, %v8950_v8, %v8949_v1 }
 0x32f   : > { %3778 = vmatpush1.msra.mxu1 %v3725_v50  ;;  %3811 = vmatprep.mubr.f32.mxu1 %v8926_v33  ;;  %v8951_v50 = vld [vmem:[#allocation41_spill] sm:$0xff] }
 0x330   : > { %6071 = vmatpush3.msra.mxu0 %v3701_v10  ;;  %5548 = vmatmul.mubr.msk.f32.vlgmr.msra.gmra.mxu1 %vm436_vm2, %v5544_v46 }
 0x331   : > { %6072 = vmatprep.mubr.msk.f32.mxu0 %vm436_vm2, %v5544_v46  ;;  %3972 = vmatprep.subr.mxu0 %v8934_v35  ;;  %v8171_v38 = vpop.permute.xlu0 %4678  ;;  %v8173_v62 = vpop.permute.xlu1 %4692  ;;  %v5557_v46 = vld [vmem:[%s8823_s2 + $0x88] sm:$0xff] }
 0x332   : > { %6078 = vmatprep.subr.mxu1 %v8935_v61  ;;  %6073 = vmatmul.mubr.msk.f32.vlgmr.msra.gmra.mxu0 %vm436_vm2, %v5545_v43  ;;  %v8953_v35 = vld [vmem:[#allocation39_spill] sm:$0xff] }
 0x333   : > { %3973 = vmatpush1.msra.mxu0 %v8936_v3  ;;  %6079 = vmatpush3.msra.mxu1 %v8935_v61 }
 0x334   : > { %3974 = vmatprep.subr.mxu0 %v8937_v40  ;;  %6080 = vmatprep.subr.mxu1 %v8938_v6  ;;  %v5558_v40 = vld [vmem:[%s8823_s2 + $0x90] sm:$0xff] }
 0x335   : > { %3817 = vmatprep.mubr.f32.mxu1 %v8926_v33  ;;  %3975 = vmatpush1.msra.mxu0 %v8939_v11  ;;  %v4163_v45 = vpop.permute.xlu0 %4162  ;;  %v8189_v24 = vpop.permute.xlu1 %4682  ;;  %v5559_v11 = vld [vmem:[%s8823_s2 + $0x98] sm:$0xff] }
 0x336   : > { %6081 = vmatpush3.msra.mxu1 %v8938_v6  ;;  %6075 = vmatprep.mubr.msk.f32.mxu0 %vm436_vm2, %v5546_v14  ;;  %v4175_v25 = vsel %vm1662_vm6, %v4163_v45, %v8950_v8 }
 0x337   : > { %5549 = vmatmul.mubr.msk.f32.gmra.mxu1 %vm436_vm2, %v5545_v43  ;;  %3976 = vmatprep.subr.mxu0 %v8940_v63  ;;  %v8952_v43 = vld [vmem:[#allocation38_spill] sm:$0xff]  ;;  %v4437_v63 = vsel %vm1949_vm7, %v8048_v22, %v8062_v37 }
 0x338   : > { %6082 = vmatprep.subr.mxu1 %v8941_v19  ;;  %6076 = vmatmul.mubr.msk.f32.gmra.mxu0 %vm436_vm2, %v5547_v28  ;;  %v4198_v61 = vsel %vm1662_vm6, %v8953_v35, %v8952_v43 }
 0x339   : > { %3977 = vmatpush1.msra.mxu0 %v8942_v31  ;;  %6083 = vmatpush3.msra.mxu1 %v8941_v19  ;;  %v8199_v60 = vpop.permute.xlu0 %4686  ;;  %v8203_v7 = vpop.permute.xlu1 %4672  ;;  %v4436_v19 = vsel %vm1949_vm7, %v8060_v12, %v8048_v22  ;;  %v4434_v22 = vsel %vm1949_vm7, %v8107_v27, %v8085_v20 }
 0x33a   : > { %3978 = vmatprep.subr.mxu0 %v8943_v30  ;;  %6084 = vmatprep.subr.mxu1 %v8944_v4  ;;  %v4734_v30 = vsel %vm2236_vm8, %v8157_v29, %v8159_v41 }
 0x33b   : > { %3823 = vmatprep.mubr.f32.mxu1 %v8926_v33  ;;  %3979 = vmatpush1.msra.mxu0 %v8945_v15 }
 0x33c   : > { %6085 = vmatpush3.msra.mxu1 %v8944_v4  ;;  %3980 = vmatprep.subr.mxu0 %v8946_v36 }
 0x33d   : > { %5550 = vmatmul.mubr.msk.f32.gmra.mxu1 %vm436_vm2, %v5546_v14  ;;  %6086 = vmatprep.subr.mxu1 %v8947_v13  ;;  %v8221_v18 = vpop.permute.xlu0 %4676  ;;  %v4431_v10 = vpop.permute.xlu1 %4430  ;;  %v4174_v14 = vsel %vm1662_vm6, %v8949_v1, %v4163_v45  ;;  %v4709_v1 = vsel %vm2236_vm8, %v8173_v62, %v8133_v39 }
 0x33e   : > { %3981 = vmatpush1.msra.mxu0 %v8948_v42  ;;  %4014 = vmatprep.mubr.f32.mxu0 %v8926_v33  ;;  %v5582_v42 = vld [vmem:[%s8823_s2 + $0xd0] sm:$0xff] }
 0x33f   : > { %6087 = vmatpush3.msra.mxu1 %v8947_v13  ;;  %5560 = vmatmul.mubr.msk.f32.vlgmr.msra.gmra.mxu0 %vm436_vm2, %v5556_v26  ;;  %v4733_v13 = vsel %vm2236_vm8, %v8189_v24, %v8171_v38 }
 0x340   : > { %6094 = vmatprep.subr.mxu0 %v4200_v57  ;;  %3829 = vmatprep.mubr.f32.mxu1 %v8926_v33 }
 0x341   : > { %6095 = vmatpush3.msra.mxu0 %v4200_v57  ;;  %5551 = vmatmul.mubr.msk.f32.gmra.mxu1 %vm436_vm2, %v5547_v28  ;;  %v8238_v3 = vpop.permute.xlu0 %4674  ;;  %v8247_v6 = vpop.permute.xlu1 %4680  ;;  %v4171_v28 = vsel %vm1662_vm6, %v7868_v34, %v8953_v35 }
 0x342   : > { %6096 = vmatprep.subr.mxu0 %v8951_v50  ;;  %4020 = vmatprep.mubr.f32.mxu0 %v8926_v33  ;;  %v4702_v35 = vsel %vm2236_vm8, %v8203_v7, %v8238_v3 }
 0x343   : > { %6097 = vmatpush3.msra.mxu0 %v8951_v50  ;;  %4240 = vmatprep.subr.mxu1 %v4175_v25  ;;  %v4706_v50 = vsel %vm2236_vm8, %v8159_v41, %v8199_v60 }
 0x344   : > { %5561 = vmatmul.mubr.msk.f32.gmra.mxu0 %vm436_vm2, %v5557_v46  ;;  %6098 = vmatprep.subr.mxu0 %v4198_v61 }
 0x345   : > { %6088 = vmatprep.mubr.msk.f32.mxu1 %vm436_vm2, %v5556_v26  ;;  %6099 = vmatpush3.msra.mxu0 %v4198_v61  ;;  %v8272_v45 = vpop.permute.xlu1 %4964 }
 0x346   : > { %6089 = vmatmul.mubr.msk.f32.vlgmr.msra.gmra.mxu1 %vm436_vm2, %v5557_v46  ;;  %6100 = vmatprep.subr.mxu0 %v7902_v48  ;;  %v5592_v46 = vld [vmem:[%s8823_s2 + $0xe0] sm:$0xff] }
 0x347   : > { %4241 = vmatpush1.msra.mxu1 %v4174_v14  ;;  %4026 = vmatprep.mubr.f32.mxu0 %v8926_v33  ;;  %v5595_v14 = vld [vmem:[%s8823_s2 + $0xf8] sm:$0xff] }
 0x348   : > { %4242 = vmatprep.subr.mxu1 %v7883_v59  ;;  %6101 = vmatpush3.msra.mxu0 %v7902_v48  ;;  %v4443_v59 = vsel %vm1949_vm7, %v4431_v10, %v7958_v0  ;;  %v8265_v48 = vpop.permute.xlu0 %4968 }
 0x349   : > { %5562 = vmatmul.mubr.msk.f32.gmra.mxu0 %vm436_vm2, %v5558_v40  ;;  %4243 = vmatpush1.msra.mxu1 %v7880_v9  ;;  %v4170_v9 = vsel %vm1662_vm6, %v8952_v43, %v7868_v34  ;;  %v5569_v34 = vld [vmem:[%s8823_s2 + $0xa8] sm:$0xff]  ;;  %v4703_v43 = vsel %vm2236_vm8, %v8238_v3, %v8221_v18  ;;  %v5004_v61 = vsel %vm2523_vm9, %v8265_v48, %v8272_v45 }
 0x34a   : > { %6102 = vmatprep.subr.mxu0 %v7923_v55  ;;  %6091 = vmatprep.mubr.msk.f32.mxu1 %vm436_vm2, %v5558_v40 }
 0x34b   : > { %4244 = vmatprep.subr.mxu1 %v4171_v28  ;;  %6103 = vmatpush3.msra.mxu0 %v7923_v55  ;;  %v5568_v55 = vld [vmem:[%s8823_s2 + $0xa0] sm:$0xff] }
 0x34c   : > { %6092 = vmatmul.mubr.msk.f32.gmra.mxu1 %vm436_vm2, %v5559_v11  ;;  %4032 = vmatprep.mubr.f32.mxu0 %v8926_v33  ;;  %v8288_v0 = vpop.permute.xlu0 %4960 }
 0x34d   : > { %4245 = vmatpush1.msra.mxu1 %v4170_v9  ;;  %5563 = vmatmul.mubr.msk.f32.gmra.mxu0 %vm436_vm2, %v5559_v11 }
 0x34e   : > { %4246 = vmatprep.subr.mxu1 %v7945_v21  ;;  %4508 = vmatprep.subr.mxu0 %v4443_v59  ;;  %v4442_v21 = vsel %vm1949_vm7, %v7960_v56, %v4431_v10  ;;  %v4439_v56 = vsel %vm1949_vm7, %v8028_v49, %v8026_v5  ;;  %v4708_v10 = vsel %vm2236_vm8, %v8131_v47, %v8173_v62 }
 0x34f   : > { %4247 = vmatpush1.msra.mxu1 %v7938_v2  ;;  %4282 = vmatprep.mubr.f32.mxu1 %v8926_v33  ;;  %v8294_v2 = vpop.permute.xlu1 %4962  ;;  %v4705_v62 = vsel %vm2236_vm8, %v8247_v6, %v8189_v24 }
 0x350   : > { %4248 = vmatprep.subr.mxu1 %v7926_v16  ;;  %6104 = vmatprep.mubr.msk.f32.mxu0 %vm436_vm2, %v5568_v55  ;;  %v5571_v16 = vld [vmem:[%s8823_s2 + $0xb8] sm:$0xff] }
 0x351   : > { %4249 = vmatpush1.msra.mxu1 %v7917_v54  ;;  %6105 = vmatmul.mubr.msk.f32.vlgmr.msra.gmra.mxu0 %vm436_vm2, %v5569_v34  ;;  %v5570_v54 = vld [vmem:[%s8823_s2 + $0xb0] sm:$0xff] }
 0x352   : > { %5572 = vmatmul.mubr.msk.f32.vlgmr.msra.gmra.mxu1 %vm436_vm2, %v5568_v55  ;;  %6110 = vmatprep.subr.mxu1 %v7968_v32 }
 0x353   : > { %4509 = vmatpush1.msra.mxu0 %v4442_v21  ;;  %6111 = vmatpush3.msra.mxu1 %v7968_v32  ;;  %v4466_v32 = vsel %vm1949_vm7, %v8026_v5, %v8050_v17  ;;  %v4465_v5 = vsel %vm1949_vm7, %v8062_v37, %v8060_v12  ;;  %v5580_v37 = vld [vmem:[%s8823_s2 + $0xc0] sm:$0xff] }
 0x354   : > { %4510 = vmatprep.subr.mxu0 %v7987_v53  ;;  %6112 = vmatprep.subr.mxu1 %v8019_v51  ;;  %v8316_v53 = vpop.permute.xlu0 %4958 }
 0x355   : > { %4288 = vmatprep.mubr.f32.mxu1 %v8926_v33  ;;  %4511 = vmatpush1.msra.mxu0 %v8010_v58  ;;  %v4438_v58 = vsel %vm1949_vm7, %v8050_v17, %v8028_v49  ;;  %v4435_v49 = vsel %vm1949_vm7, %v8085_v20, %v8105_v52  ;;  %v4464_v17 = vsel %vm1949_vm7, %v8105_v52, %v8107_v27  ;;  %v5581_v27 = vld [vmem:[%s8823_s2 + $0xc8] sm:$0xff] }
 0x356   : > { %6113 = vmatpush3.msra.mxu1 %v8019_v51  ;;  %6107 = vmatprep.mubr.msk.f32.mxu0 %vm436_vm2, %v5570_v54  ;;  %v8322_v51 = vpop.permute.xlu1 %4954  ;;  %v4736_v52 = vsel %vm2236_vm8, %v8121_v44, %v8119_v23  ;;  %v4735_v20 = vsel %vm2236_vm8, %v8133_v39, %v8131_v47  ;;  %v4707_v39 = vsel %vm2236_vm8, %v8199_v60, %v8157_v29  ;;  %v5593_v47 = vld [vmem:[%s8823_s2 + $0xe8] sm:$0xff] }
 0x357   : > { %5573 = vmatmul.mubr.msk.f32.gmra.mxu1 %vm436_vm2, %v5569_v34  ;;  %4512 = vmatprep.subr.mxu0 %v4439_v56  ;;  %v4704_v29 = vsel %vm2236_vm8, %v8171_v38, %v8247_v6  ;;  %v4977_v38 = vsel %vm2523_vm9, %v8288_v0, %v8294_v2  ;;  %v5003_v40 = vsel %vm2523_vm9, %v8294_v2, %v8316_v53  ;;  %v5605_v2 = vld [vmem:[%s8823_s2 + $0x108] sm:$0xff] }
 0x358   : > { %6114 = vmatprep.subr.mxu1 %v4466_v32  ;;  %6108 = vmatmul.mubr.msk.f32.gmra.mxu0 %vm436_vm2, %v5571_v16  ;;  %v4699_v12 = vpop.permute.xlu0 %4698 }
 0x359   : > { %4513 = vmatpush1.msra.mxu0 %v4438_v58  ;;  %6115 = vmatpush3.msra.mxu1 %v4466_v32  ;;  %v4711_v15 = vsel %vm2236_vm8, %v4699_v12, %v8121_v44  ;;  %v4710_v26 = vsel %vm2236_vm8, %v8119_v23, %v4699_v12  ;;  %v4732_v23 = vsel %vm2236_vm8, %v8221_v18, %v8203_v7  ;;  %v5583_v44 = vld [vmem:[%s8823_s2 + $0xd8] sm:$0xff]  ;;  %v5594_v18 = vld [vmem:[%s8823_s2 + $0xf0] sm:$0xff] }
 0x35a   : > { %4514 = vmatprep.subr.mxu0 %v4437_v63  ;;  %6116 = vmatprep.subr.mxu1 %v4465_v5  ;;  %v8348_v31 = vpop.permute.xlu1 %4952  ;;  %v4976_v7 = vsel %vm2523_vm9, %v8316_v53, %v8288_v0  ;;  %v5604_v0 = vld [vmem:[%s8823_s2 + $0x100] sm:$0xff] }
 0x35b   : > { %4294 = vmatprep.mubr.f32.mxu1 %v8926_v33  ;;  %4515 = vmatpush1.msra.mxu0 %v4436_v19  ;;  %v4974_v28 = vsel %vm2523_vm9, %v8348_v31, %v8322_v51 }
 0x35c   : > { %6117 = vmatpush3.msra.mxu1 %v4465_v5  ;;  %4516 = vmatprep.subr.mxu0 %v4435_v49  ;;  %v8367_v4 = vpop.permute.xlu0 %4956 }
 0x35d   : > { %5574 = vmatmul.mubr.msk.f32.gmra.mxu1 %vm436_vm2, %v5570_v54  ;;  %6118 = vmatprep.subr.mxu1 %v4464_v17  ;;  %v4975_v3 = vsel %vm2523_vm9, %v8322_v51, %v8367_v4  ;;  %v5606_v54 = vld [vmem:[%s8823_s2 + $0x110] sm:$0xff] }
 0x35e   : > { %4517 = vmatpush1.msra.mxu0 %v4434_v22  ;;  %4550 = vmatprep.mubr.f32.mxu0 %v8926_v33  ;;  %v4967_v36 = vpop.permute.xlu1 %4966 }
 0x35f   : > { %6119 = vmatpush3.msra.mxu1 %v4464_v17  ;;  %5584 = vmatmul.mubr.msk.f32.vlgmr.msra.gmra.mxu0 %vm436_vm2, %v5580_v37  ;;  %v4979_v57 = vsel %vm2523_vm9, %v4967_v36, %v8265_v48  ;;  %v4978_v60 = vsel %vm2523_vm9, %v8272_v45, %v4967_v36  ;;  %v5002_v48 = vsel %vm2523_vm9, %v8367_v4, %v8348_v31 }
 0x360   : > { %6126 = vmatprep.subr.mxu0 %v4736_v52  ;;  %4300 = vmatprep.mubr.f32.mxu1 %v8926_v33  ;;  %v4949_v8 = vpop.permute.xlu0 %4948 }
 0x361   : > { %6127 = vmatpush3.msra.mxu0 %v4736_v52  ;;  %5575 = vmatmul.mubr.msk.f32.gmra.mxu1 %vm436_vm2, %v5571_v16  ;;  %v5607_v16 = vld [vmem:[%s8823_s2 + $0x118] sm:$0xff] }
 0x362   : > { %6128 = vmatprep.subr.mxu0 %v4735_v20  ;;  %4556 = vmatprep.mubr.f32.mxu0 %v8926_v33  ;;  %v4951_v25 = vpop.permute.xlu1 %4950 }
 0x363   : > { %6129 = vmatpush3.msra.mxu0 %v4735_v20  ;;  %6120 = vmatprep.mubr.msk.f32.mxu1 %vm436_vm2, %v5580_v37  ;;  %v4973_v59 = vsel %vm2523_vm9, %v4949_v8, %v4951_v25 }
 0x364   : > { %5585 = vmatmul.mubr.msk.f32.gmra.mxu0 %vm436_vm2, %v5581_v27  ;;  %6130 = vmatprep.subr.mxu0 %v4734_v30  ;;  %v4947_v41 = vpop.permute.xlu0 %4946 }
 0x365   : > { %6131 = vmatpush3.msra.mxu0 %v4734_v30  ;;  %6121 = vmatmul.mubr.msk.f32.vlgmr.msra.gmra.mxu1 %vm436_vm2, %v5581_v27  ;;  %v4972_v45 = vsel %vm2523_vm9, %v4947_v41, %v4949_v8  ;;  %v5001_v34 = vsel %vm2523_vm9, %v4951_v25, %v4947_v41 }
 0x366   : > { %6132 = vmatprep.subr.mxu0 %v4733_v13  ;;  %4562 = vmatprep.mubr.f32.mxu0 %v8926_v33  ;;  %v4943_v24 = vpop.permute.xlu1 %4942 }
 0x367   : > { %4776 = vmatprep.subr.mxu1 %v4711_v15  ;;  %6133 = vmatpush3.msra.mxu0 %v4733_v13 }
 0x368   : > { %5586 = vmatmul.mubr.msk.f32.gmra.mxu0 %vm436_vm2, %v5582_v42  ;;  %4777 = vmatpush1.msra.mxu1 %v4710_v26  ;;  %v4945_v6 = vpop.permute.xlu0 %4944 }
 0x369   : > { %6134 = vmatprep.subr.mxu0 %v4732_v23  ;;  %6123 = vmatprep.mubr.msk.f32.mxu1 %vm436_vm2, %v5582_v42  ;;  %v4971_v9 = vsel %vm2523_vm9, %v4943_v24, %v4945_v6 }
 0x36a   : > { %4778 = vmatprep.subr.mxu1 %v4709_v1  ;;  %6135 = vmatpush3.msra.mxu0 %v4732_v23  ;;  %v4941_v11 = vpop.permute.xlu1 %4940 }
 0x36b   : > { %6124 = vmatmul.mubr.msk.f32.gmra.mxu1 %vm436_vm2, %v5583_v44  ;;  %4568 = vmatprep.mubr.f32.mxu0 %v8926_v33  ;;  %v4970_v55 = vsel %vm2523_vm9, %v4941_v11, %v4943_v24  ;;  %v5000_v21 = vsel %vm2523_vm9, %v4945_v6, %v4941_v11 }
 0x36c   : > { %4779 = vmatpush1.msra.mxu1 %v4708_v10  ;;  %5587 = vmatmul.mubr.msk.f32.gmra.mxu0 %vm436_vm2, %v5583_v44 }
 0x36d   : > { %4780 = vmatprep.subr.mxu1 %v4707_v39  ;;  %5044 = vmatprep.subr.mxu0 %v4979_v57 }
 0x36e   : > { %4781 = vmatpush1.msra.mxu1 %v4706_v50  ;;  %6136 = vmatprep.mubr.msk.f32.mxu0 %vm436_vm2, %v5592_v46 }
 0x36f   : > { %4782 = vmatprep.subr.mxu1 %v4705_v62  ;;  %4818 = vmatprep.mubr.f32.mxu1 %v8926_v33 }
 0x370   : > { %4783 = vmatpush1.msra.mxu1 %v4704_v29  ;;  %6137 = vmatmul.mubr.msk.f32.vlgmr.msra.gmra.mxu0 %vm436_vm2, %v5593_v47 }
 0x371   : > { %4784 = vmatprep.subr.mxu1 %v4703_v43  ;;  %5045 = vmatpush1.msra.mxu0 %v4978_v60 }
 0x372   : > { %4785 = vmatpush1.msra.mxu1 %v4702_v35  ;;  %5046 = vmatprep.subr.mxu0 %v4977_v38 }
 0x373   : > { %5596 = vmatmul.mubr.msk.f32.vlgmr.msra.gmra.mxu1 %vm436_vm2, %v5592_v46  ;;  %6142 = vmatprep.subr.mxu1 %v5004_v61 }
 0x374   : > { %5047 = vmatpush1.msra.mxu0 %v4976_v7  ;;  %6143 = vmatpush3.msra.mxu1 %v5004_v61 }
 0x375   : > { %6139 = vmatprep.mubr.msk.f32.mxu0 %vm436_vm2, %v5594_v18  ;;  %5048 = vmatprep.subr.mxu0 %v4975_v3 }
 0x376   : > { %6144 = vmatprep.subr.mxu1 %v5003_v40  ;;  %4824 = vmatprep.mubr.f32.mxu1 %v8926_v33 }
 0x377   : > { %6140 = vmatmul.mubr.msk.f32.gmra.mxu0 %vm436_vm2, %v5595_v14  ;;  %6145 = vmatpush3.msra.mxu1 %v5003_v40 }
 0x378   : > { %5049 = vmatpush1.msra.mxu0 %v4974_v28  ;;  %5597 = vmatmul.mubr.msk.f32.gmra.mxu1 %vm436_vm2, %v5593_v47 }
 0x379   : > { %5050 = vmatprep.subr.mxu0 %v4973_v59  ;;  %6146 = vmatprep.subr.mxu1 %v5002_v48 }
 0x37a   : > { %5051 = vmatpush1.msra.mxu0 %v4972_v45  ;;  %6147 = vmatpush3.msra.mxu1 %v5002_v48 }
 0x37b   : > { %5052 = vmatprep.subr.mxu0 %v4971_v9  ;;  %6148 = vmatprep.subr.mxu1 %v5001_v34 }
 0x37c   : > { %4830 = vmatprep.mubr.f32.mxu1 %v8926_v33  ;;  %5053 = vmatpush1.msra.mxu0 %v4970_v55 }
 0x37d   : > { %5086 = vmatprep.mubr.f32.mxu0 %v8926_v33  ;;  %6149 = vmatpush3.msra.mxu1 %v5001_v34 }
 0x37e   : > { %5598 = vmatmul.mubr.msk.f32.gmra.mxu1 %vm436_vm2, %v5594_v18  ;;  %5608 = vmatmul.mubr.msk.f32.vlgmr.msra.gmra.mxu0 %vm436_vm2, %v5604_v0 }
 0x37f   : > { %6150 = vmatprep.subr.mxu1 %v5000_v21  ;;  %4836 = vmatprep.mubr.f32.mxu1 %v8926_v33 }
 0x380   : > { %6151 = vmatpush3.msra.mxu1 %v5000_v21  ;;  %5092 = vmatprep.mubr.f32.mxu0 %v8926_v33 }
 0x382   : > { %5599 = vmatmul.mubr.msk.f32.gmra.mxu1 %vm436_vm2, %v5595_v14  ;;  %5609 = vmatmul.mubr.msk.f32.gmra.mxu0 %vm436_vm2, %v5605_v2 }
 0x383   : > { %5098 = vmatprep.mubr.f32.mxu0 %v8926_v33  ;;  %6152 = vmatprep.mubr.msk.f32.mxu1 %vm436_vm2, %v5604_v0 }
 0x386   : > { %5610 = vmatmul.mubr.msk.f32.gmra.mxu0 %vm436_vm2, %v5606_v54  ;;  %6153 = vmatmul.mubr.msk.f32.vlgmr.msra.gmra.mxu1 %vm436_vm2, %v5605_v2 }
 0x387   : > { %5104 = vmatprep.mubr.f32.mxu0 %v8926_v33  ;;  %6155 = vmatprep.mubr.msk.f32.mxu1 %vm436_vm2, %v5606_v54 }
 0x38a   : > { %5611 = vmatmul.mubr.msk.f32.gmra.mxu0 %vm436_vm2, %v5607_v16  ;;  %6156 = vmatmul.mubr.msk.f32.gmra.mxu1 %vm436_vm2, %v5607_v16 }
 0x3bf   : > { %v3103_v56 = vpop.f32.mrf.mxu0  ;;  %v6026_v58 = vpop.f32.mrf.mxu1 }
 0x3c1   : > { %v3105_v32 = vpop.f32.mrf.mxu0  ;;  %v3192_v5 = vpop.f32.mrf.mxu1 }
 0x3c3   : > { %v3109_v53 = vpop.f32.mrf.mxu0 }
 0x3c5   : > { %v3111_v51 = vpop.f32.mrf.mxu0 }
 0x3c7   : > { %v3115_v63 = vpop.f32.mrf.mxu0 }
 0x3c9   : > { %v3117_v19 = vpop.f32.mrf.mxu0 }
 0x3cb   : > { %v6029_v49 = vpop.f32.mrf.mxu1 }
 0x3cc   : > { %v3121_v33 = vpop.f32.mrf.mxu0 }
 0x3cd   : > { %v3202_v17 = vpop.f32.mrf.mxu1 }
 0x3ce   : > { %v3123_v37 = vpop.f32.mrf.mxu0 }
 0x3d0   : > { %v3289_v22 = vpop.f32.mrf.mxu1 }
 0x3d1   : > { %v8496_v12 = vadd.f32 %v3289_v22, %v3103_v56 }
 0x3d2   : > { %v6042_v31 = vpop.f32.mrf.mxu0  ;;  %v3291_v52 = vpop.f32.mrf.mxu1 }
 0x3d3   : > { %v8498_v20 = vadd.f32 %v6042_v31, %v6026_v58  ;;  %v8500_v27 = vadd.f32 %v3291_v52, %v3105_v32 }
 0x3d4   : > { %v3378_v30 = vpop.f32.mrf.mxu0  ;;  %v3295_v4 = vpop.f32.mrf.mxu1 }
 0x3d5   : > { %v8502_v15 = vadd.f32 %v3378_v30, %v3192_v5  ;;  %v8504_v36 = vadd.f32 %v3295_v4, %v3109_v53 }
 0x3d6   : > { %v3297_v26 = vpop.f32.mrf.mxu1  ;;  %v6045_v13 = vpop.f32.mrf.mxu0 }
 0x3d7   : > { %v8506_v42 = vadd.f32 %v3297_v26, %v3111_v51  ;;  %v8508_v23 = vadd.f32 %v6045_v13, %v6029_v49 }
 0x3d8   : > { %v3388_v44 = vpop.f32.mrf.mxu0 }
 0x3d9   : > { %v3301_v1 = vpop.f32.mrf.mxu1  ;;  %v8510_v8 = vadd.f32 %v3388_v44, %v3202_v17 }
 0x3da   : > { %v8512_v57 = vadd.f32 %v3301_v1, %v3115_v63 }
 0x3db   : > { %v3303_v25 = vpop.f32.mrf.mxu1 }
 0x3dc   : > { %v8514_v10 = vadd.f32 %v3303_v25, %v3117_v19 }
 0x3de   : > { %v3307_v46 = vpop.f32.mrf.mxu1 }
 0x3df   : > { %v8516_v39 = vadd.f32 %v3307_v46, %v3121_v33 }
 0x3e0   : > { %v8518_v50 = vpop.f32.mrf.mxu0  ;;  %v3309_v47 = vpop.f32.mrf.mxu1 }
 0x3e1   : > { %v8520_v62 = vadd.f32 %v3309_v47, %v3123_v37 }
 0x3e2   : > { %v8522_v29 = vpop.f32.mrf.mxu0  ;;  %v8524_v41 = vpop.f32.mrf.mxu1 }
 0x3e4   : > { %v8526_v60 = vpop.f32.mrf.mxu0  ;;  %v8528_v43 = vpop.f32.mrf.mxu1 }
 0x3e6   : > { %v8530_v24 = vpop.f32.mrf.mxu0  ;;  %v8534_v38 = vpop.f32.mrf.mxu1 }
 0x3e8   : > { %v8532_v35 = vpop.f32.mrf.mxu0  ;;  %v8540_v7 = vpop.f32.mrf.mxu1 }
 0x3ea   : > { %v8536_v61 = vpop.f32.mrf.mxu0 }
 0x3ec   : > { %v8538_v18 = vpop.f32.mrf.mxu0 }
 0x3ee   : > { %v8542_v3 = vpop.f32.mrf.mxu0 }
 0x3f0   : > { %v8544_v14 = vpop.f32.mrf.mxu1 }
 0x3f2   : > { %v8546_v40 = vpop.f32.mrf.mxu0  ;;  %v8548_v6 = vpop.f32.mrf.mxu1 }
 0x3f4   : > { %v8550_v11 = vpop.f32.mrf.mxu0 }
 0x3f7   : > { %v8552_v28 = vpop.f32.mrf.mxu1 }
 0x3f8   : > { %v8554_v59 = vpop.f32.mrf.mxu0 }
 0x3f9   : > { %v8556_v48 = vpop.f32.mrf.mxu1 }
 0x3fa   : > { %v8558_v9 = vpop.f32.mrf.mxu0 }
 0x3fd   : > { %v8560_v45 = vpop.f32.mrf.mxu1 }
 0x3ff   : > { %v8562_v55 = vpop.f32.mrf.mxu1  ;;  %v8564_v34 = vpop.f32.mrf.mxu0 }
 0x401   : > { %v8566_v0 = vpop.f32.mrf.mxu1  ;;  %v8568_v21 = vpop.f32.mrf.mxu0 }
 0x403   : > { %v8570_v2 = vpop.f32.mrf.mxu1 }
 0x404   : > { %v8572_v54 = vpop.f32.mrf.mxu0 }
 0x405   : > { %8954 = vst [vmem:[#allocation40_spill] sm:$0xff] %v8572_v54 }
 0x406   : > { %v8574_v16 = vpop.f32.mrf.mxu0  ;;  %v8576_v56 = vpop.f32.mrf.mxu1 }
 0x407   : > { %8955 = vst [vmem:[#allocation37_spill] sm:$0xff] %v8574_v16  ;;  %8956 = vst [vmem:[#allocation35_spill] sm:$0xff] %v8576_v56  ;;  %v8999_v16 = vld [vmem:[#allocation7_spill] sm:$0xff] }
 0x408   : > { %v8578_v32 = vpop.f32.mrf.mxu1 }
 0x409   : > { %8957 = vst [vmem:[#allocation36_spill] sm:$0xff] %v8578_v32  ;;  %v8580_v53 = vpop.f32.mrf.mxu0  ;;  %v8994_v32 = vld [vmem:[#allocation13_spill] sm:$0xff] }
 0x40a   : > { %8958 = vst [vmem:[#allocation34_spill] sm:$0xff] %v8580_v53  ;;  %v8995_v53 = vld [vmem:[#allocation4_spill] sm:$0xff] }
 0x40b   : > { %v8582_v58 = vpop.f32.mrf.mxu0 }
 0x40c   : > { %8959 = vst [vmem:[#allocation32_spill] sm:$0xff] %v8582_v58  ;;  %v8584_v51 = vpop.f32.mrf.mxu1 }
 0x40d   : > { %8960 = vst [vmem:[#allocation33_spill] sm:$0xff] %v8584_v51  ;;  %v8586_v63 = vpop.f32.mrf.mxu0 }
 0x40e   : > { %8961 = vst [vmem:[#allocation25_spill] sm:$0xff] %v8586_v63  ;;  %v8588_v5 = vpop.f32.mrf.mxu1 }
 0x40f   : > { %8962 = vst [vmem:[#allocation23_spill] sm:$0xff] %v8588_v5  ;;  %v8590_v19 = vpop.f32.mrf.mxu0 }
 0x410   : > { %8963 = vst [vmem:[#allocation24_spill] sm:$0xff] %v8590_v19 }
 0x411   : > { %v8592_v49 = vpop.f32.mrf.mxu0 }
 0x412   : > { %8964 = vst [vmem:[#allocation22_spill] sm:$0xff] %v8592_v49  ;;  %v8594_v33 = vpop.f32.mrf.mxu1  ;;  %v8985_v49 = vld [vmem:[#allocation12_spill] sm:$0xff] }
 0x413   : > { %v8598_v37 = vpop.f32.mrf.mxu0  ;;  %v5246_v19 = vrot.slane %v8985_v49, 4 }
 0x414   : > { %v8596_v17 = vpop.f32.mrf.mxu1  ;;  %8966 = vst [vmem:[#allocation21_spill] sm:$0xff] %v8598_v37 }
 0x415   : > { %8965 = vst [vmem:[#allocation20_spill] sm:$0xff] %v8596_v17  ;;  %v8997_v17 = vld [vmem:[#allocation2_spill] sm:$0xff] }
 0x417   : > { %v8600_v22 = vpop.f32.mrf.mxu1 }
 0x418   : > { %8967 = vst [vmem:[#allocation31_spill] sm:$0xff] %v8600_v22  ;;  %v8602_v31 = vpop.f32.mrf.mxu0 }
 0x419   : > { %8968 = vst [vmem:[#allocation29_spill] sm:$0xff] %v8602_v31  ;;  %v8604_v52 = vpop.f32.mrf.mxu1 }
 0x41a   : > { %8969 = vst [vmem:[#allocation30_spill] sm:$0xff] %v8604_v52  ;;  %v8606_v30 = vpop.f32.mrf.mxu0 }
 0x41b   : > { %8970 = vst [vmem:[#allocation28_spill] sm:$0xff] %v8606_v30 }
 0x41d   : > { %v8608_v4 = vpop.f32.mrf.mxu1 }
 0x41e   : > { %8971 = vst [vmem:[#allocation27_spill] sm:$0xff] %v8608_v4 }
 0x41f   : > { %v8610_v26 = vpop.f32.mrf.mxu1  ;;  %v8612_v13 = vpop.f32.mrf.mxu0 }
 0x420   : > { %8972 = vst [vmem:[#allocation26_spill] sm:$0xff] %v8610_v26  ;;  %8973 = vst [vmem:[#allocation19_spill] sm:$0xff] %v8612_v13  ;;  %v8996_v13 = vld [vmem:[#allocation16_spill] sm:$0xff] }
 0x421   : > { %v8614_v44 = vpop.f32.mrf.mxu1  ;;  %v8616_v1 = vpop.f32.mrf.mxu0 }
 0x422   : > { %8974 = vst [vmem:[#allocation17_spill] sm:$0xff] %v8614_v44  ;;  %8975 = vst [vmem:[#allocation18_spill] sm:$0xff] %v8616_v1  ;;  %v8984_v44 = vld [vmem:[#allocation14_spill] sm:$0xff] }
 0x423   : > { %v8618_v25 = vpop.f32.mrf.mxu1  ;;  %v5245_v37 = vrot.slane %v8984_v44, 4  ;;  %v8882_v44 = vrot.slane %v8994_v32, 4  ;;  %v9001_v32 = vld [vmem:[#allocation3_spill] sm:$0xff] }
 0x424   : > { %8976 = vst [vmem:[#allocation43_spill] sm:$0xff] %v8618_v25  ;;  %v8620_v46 = vpop.f32.mrf.mxu0 }
 0x425   : > { %8977 = vst [vmem:[#allocation42_spill] sm:$0xff] %v8620_v46  ;;  %v8622_v47 = vpop.f32.mrf.mxu1  ;;  %v8987_v46 = vld [vmem:[#allocation15_spill] sm:$0xff] }
 0x426   : > { %8978 = vst [vmem:[#allocation41_spill] sm:$0xff] %v8622_v47  ;;  %v8624_v31 = vpop.f32.mrf.mxu0  ;;  %v5248_v5 = vrot.slane %v8987_v46, 4  ;;  %v8988_v47 = vld [vmem:[#allocation10_spill] sm:$0xff]  ;;  %v5266_v46 = vrot.slane %v8997_v17, 4 }
 0x427   : > { %8979 = vst [vmem:[#allocation38_spill] sm:$0xff] %v8624_v31  ;;  %v8628_v30 = vpop.f32.mrf.mxu1  ;;  %v5249_v1 = vrot.slane %v8988_v47, 4  ;;  %v8989_v31 = vld [vmem:[#allocation8_spill] sm:$0xff]  ;;  %v8998_v47 = vld [vmem:[#allocation5_spill] sm:$0xff] }
 0x428   : > { %v8626_v52 = vpop.f32.mrf.mxu0  ;;  %8981 = vst [vmem:[#allocation44_spill] sm:$0xff] %v8628_v30  ;;  %v5254_v22 = vrot.slane %v8989_v31, 4 }
 0x429   : > { %8980 = vst [vmem:[#allocation39_spill] sm:$0xff] %v8626_v52  ;;  %v8990_v52 = vld [vmem:[#allocation9_spill] sm:$0xff] }
 0x42a   : > { %v8630_v4 = vpop.f32.mrf.mxu0  ;;  %v5256_v63 = vrot.slane %v8990_v52, 4  ;;  %v5270_v52 = vrot.slane %v8999_v16, 4  ;;  %v8663_v49 = vsel %vm5244_vm10, %v5246_v19, %v5254_v22 }
 0x42b   : > { %8982 = vst [vmem:[#allocation45_spill] sm:$0xff] %v8630_v4  ;;  %v8636_v25 = vpop.f32.mrf.mxu1  ;;  %v8992_v4 = vld [vmem:[#allocation6_spill] sm:$0xff] }
 0x42c   : > { %v8632_v26 = vpop.f32.mrf.mxu0  ;;  %8986 = vst [vmem:[#allocation14_spill] sm:$0xff] %v8636_v25  ;;  %v5260_v51 = vrot.slane %v8992_v4, 4  ;;  %v5251_v25 = vrot.slane %v8996_v13, 4  ;;  %v8657_v4 = vsel %vm5244_vm10, %v5245_v37, %v5246_v19  ;;  %v8666_v13 = vsel %vm5244_vm10, %v5249_v1, %v5256_v63 }
 0x42d   : > { %8983 = vst [vmem:[#allocation46_spill] sm:$0xff] %v8632_v26  ;;  %v8993_v26 = vld [vmem:[#allocation11_spill] sm:$0xff]  ;;  %v8654_v54 = vpop.f32.mrf.mxu1  ;;  %v9000_v37 = vrot.slane %v8995_v53, 4  ;;  %v3654_v53 = vadd.f32 %v8522_v29, %v8500_v27  ;;  %v3664_v27 = vadd.f32 %v8534_v38, %v8508_v23 }
 0x42e   : > { %v8642_v30 = vpop.f32.mrf.mxu0  ;;  %v5252_v58 = vrot.slane %v8993_v26, 4  ;;  %v8660_v26 = vsel %vm5244_vm10, %v5248_v5, %v5249_v1  ;;  %v8669_v17 = vsel %vm5244_vm10, %v5254_v22, %v5260_v51  ;;  %v3653_v5 = vadd.f32 %v8518_v50, %v8496_v12 }
 0x42f   : > { %8991 = vst [vmem:[#allocation12_spill] sm:$0xff] %v8642_v30  ;;  %v8679_v31 = vsel %vm5244_vm10, %v5256_v63, %v9000_v37  ;;  %v8689_v22 = vsel %vm5244_vm10, %v5260_v51, %v5266_v46  ;;  %v3658_v63 = vadd.f32 %v8524_v41, %v8498_v20  ;;  %v3656_v12 = vadd.f32 %v8526_v60, %v8504_v36 }
 0x430   : > { %v8650_v56 = vpop.f32.mrf.mxu0  ;;  %v8674_v16 = vsel %vm5244_vm10, %v5252_v58, %v8882_v44  ;;  %v8686_v1 = vsel %vm5244_vm10, %v5251_v25, %v5252_v58  ;;  %v5268_v44 = vrot.slane %v9001_v32, 4  ;;  %v9002_v50 = vrot.slane %v8998_v47, 4 }
 0x431   : > { %v3655_v58 = vadd.f32 %v8528_v43, %v8502_v15  ;;  %v3657_v51 = vadd.f32 %v8530_v24, %v8506_v42  ;;  %v3921_v29 = vadd.f32 %v8544_v14, %v3653_v5  ;;  %v3659_v36 = vadd.f32 %v8532_v35, %v8512_v57 }
 0x432   : > { %v8683_v30 = vpop.f32.mrf.mxu0  ;;  %v8701_v37 = vsel %vm5244_vm10, %v9002_v50, %v5270_v52  ;;  %v3661_v41 = vadd.f32 %v8540_v7, %v8510_v8  ;;  %v3660_v60 = vadd.f32 %v8536_v61, %v8514_v10  ;;  %v3662_v15 = vadd.f32 %v8538_v18, %v8516_v39  ;;  %v9012_v50 = vld [vmem:[#allocation25_spill] sm:$0xff] }
 0x433   : > { %v4820_v19 = vpop.f32.mrf.mxu1  ;;  %v3663_v42 = vadd.f32 %v8542_v3, %v8520_v62  ;;  %v3926_v23 = vadd.f32 %v8546_v40, %v3658_v63  ;;  %v3922_v43 = vadd.f32 %v8548_v6, %v3654_v53  ;;  %v4124_v24 = vadd.f32 %v8564_v34, %v3921_v29  ;;  %v9003_v6 = vld [vmem:[#allocation40_spill] sm:$0xff]  ;;  %v9014_v29 = vld [vmem:[#allocation18_spill] sm:$0xff] }
 0x434   : > { %v3923_v57 = vadd.f32 %v8550_v11, %v3655_v58  ;;  %v3924_v8 = vadd.f32 %v8552_v28, %v3656_v12  ;;  %v3932_v10 = vadd.f32 %v8554_v59, %v3664_v27  ;;  %v3925_v35 = vadd.f32 %v8556_v48, %v3657_v51  ;;  %v9004_v48 = vld [vmem:[#allocation37_spill] sm:$0xff]  ;;  %v9013_v51 = vld [vmem:[#allocation31_spill] sm:$0xff] }
 0x435   : > { %v4822_v20 = vpop.f32.mrf.mxu1  ;;  %v3929_v61 = vadd.f32 %v8558_v9, %v3661_v41  ;;  %v3927_v62 = vadd.f32 %v8560_v45, %v3659_v36  ;;  %v4125_v18 = vadd.f32 %v8568_v21, %v3922_v43  ;;  %v4392_v7 = vadd.f32 %v8594_v33, %v4124_v24  ;;  %v9005_v9 = vld [vmem:[#allocation35_spill] sm:$0xff]  ;;  %v9006_v45 = vld [vmem:[#allocation20_spill] sm:$0xff]  ;;  %v9008_v33 = vld [vmem:[#allocation34_spill] sm:$0xff] }
 0x436   : > { %v3928_v3 = vadd.f32 %v8562_v55, %v3660_v60  ;;  %v3930_v14 = vadd.f32 %v8566_v0, %v3662_v15  ;;  %v3931_v40 = vadd.f32 %v8570_v2, %v3663_v42  ;;  %v4127_v11 = vadd.f32 %v9003_v6, %v3924_v8  ;;  %v9007_v21 = vld [vmem:[#allocation19_spill] sm:$0xff]  ;;  %v9009_v55 = vld [vmem:[#allocation36_spill] sm:$0xff]  ;;  %v9011_v2 = vld [vmem:[#allocation33_spill] sm:$0xff] }
 0x437   : > { %v8723_v38 = vpop.f32.mrf.mxu0  ;;  %v4128_v34 = vadd.f32 %v9004_v48, %v3925_v35  ;;  %v4129_v53 = vadd.f32 %v9005_v9, %v3926_v23  ;;  %v4393_v25 = vadd.f32 %v9006_v45, %v4125_v18  ;;  %v4660_v46 = vadd.f32 %v9007_v21, %v4392_v7  ;;  %v9010_v0 = vld [vmem:[#allocation32_spill] sm:$0xff]  ;;  %v9015_v60 = vld [vmem:[#allocation23_spill] sm:$0xff]  ;;  %v9017_v43 = vld [vmem:[#allocation22_spill] sm:$0xff]  ;;  %v8754_v18 = vpop.permute.xlu0 %5214 }
 0x438   : > { %v4826_v39 = vpop.f32.mrf.mxu1  ;;  %v4130_v52 = vadd.f32 %v9008_v33, %v3927_v62  ;;  %v4126_v5 = vadd.f32 %v9009_v55, %v3923_v57  ;;  %v4131_v63 = vadd.f32 %v9010_v0, %v3928_v3  ;;  %v4135_v12 = vadd.f32 %v9011_v2, %v3932_v10  ;;  %v9016_v42 = vld [vmem:[#allocation24_spill] sm:$0xff]  ;;  %v9018_v8 = vld [vmem:[#allocation21_spill] sm:$0xff]  ;;  %v9020_v3 = vld [vmem:[#allocation42_spill] sm:$0xff] }
 0x439   : > { %v8737_v28 = vpop.f32.mrf.mxu0  ;;  %v4133_v58 = vadd.f32 %v9012_v50, %v3930_v14  ;;  %v4395_v27 = vadd.f32 %v9013_v51, %v4127_v11  ;;  %v4661_v36 = vadd.f32 %v9014_v29, %v4393_v25  ;;  %v4928_v41 = vadd.f32 %v4820_v19, %v4660_v46  ;;  %v9019_v10 = vld [vmem:[#allocation29_spill] sm:$0xff]  ;;  %v9021_v19 = vld [vmem:[#allocation30_spill] sm:$0xff]  ;;  %v9022_v9 = vld [vmem:[#allocation28_spill] sm:$0xff] }
 0x43a   : > { %v4828_v59 = vpop.f32.mrf.mxu1  ;;  %v4132_v15 = vadd.f32 %v9015_v60, %v3929_v61  ;;  %v4134_v23 = vadd.f32 %v9016_v42, %v3931_v40  ;;  %v4397_v24 = vadd.f32 %v9017_v43, %v4129_v53  ;;  %v4394_v57 = vadd.f32 %v9018_v8, %v4126_v5  ;;  %v9023_v45 = vld [vmem:[#allocation27_spill] sm:$0xff]  ;;  %v9024_v25 = vld [vmem:[#allocation26_spill] sm:$0xff]  ;;  %v9025_v33 = vld [vmem:[#allocation17_spill] sm:$0xff] }
 0x43b   : > { %v4403_v7 = vadd.f32 %v9019_v10, %v4135_v12  ;;  %v4663_v14 = vadd.f32 %v9020_v3, %v4395_v27  ;;  %v4929_v6 = vadd.f32 %v4822_v20, %v4661_v36  ;;  %v4396_v48 = vadd.f32 %v9021_v19, %v4128_v34  ;;  %v9026_v12 = vld [vmem:[#allocation43_spill] sm:$0xff]  ;;  %v9027_v50 = vld [vmem:[#allocation38_spill] sm:$0xff]  ;;  %v9028_v34 = vld [vmem:[#allocation41_spill] sm:$0xff] }
 0x43c   : > { %v4400_v61 = vadd.f32 %v9022_v9, %v4132_v15  ;;  %v4398_v40 = vadd.f32 %v9023_v45, %v4130_v52  ;;  %v4399_v53 = vadd.f32 %v9024_v25, %v4131_v63  ;;  %v4401_v55 = vadd.f32 %v9025_v33, %v4133_v58  ;;  %v9029_v29 = vld [vmem:[#allocation44_spill] sm:$0xff]  ;;  %v5220_v63 = vpop.permute.xlu1 %5219  ;;  %v9030_v60 = vld [vmem:[#allocation39_spill] sm:$0xff]  ;;  %v9031_v43 = vld [vmem:[#allocation45_spill] sm:$0xff] }
 0x43d   : > { %v4931_v5 = vadd.f32 %v4826_v39, %v4663_v14  ;;  %v4402_v20 = vadd.f32 %v9026_v12, %v4134_v23  ;;  %v4664_v51 = vadd.f32 %v9027_v50, %v4396_v48  ;;  %v4665_v27 = vadd.f32 %v9028_v34, %v4397_v24  ;;  %v9033_v19 = vld [vmem:[#allocation46_spill] sm:$0xff]  ;;  %v9034_v33 = vld [vmem:[#allocation12_spill] sm:$0xff] }
 0x43e   : > { %v4832_v35 = vpop.f32.mrf.mxu1  ;;  %v5088_v62 = vpop.f32.mrf.mxu0  ;;  %v4662_v36 = vadd.f32 %v9029_v29, %v4394_v57  ;;  %v4666_v15 = vadd.f32 %v9030_v60, %v4398_v40  ;;  %v4667_v8 = vadd.f32 %v9031_v43, %v4399_v53  ;;  %v4669_v48 = vadd.f32 %v9033_v19, %v4401_v55 }
 0x43f   : > { %v5196_v11 = vadd.f32 %v5088_v62, %v4928_v41  ;;  %v9032_v62 = vld [vmem:[#allocation14_spill] sm:$0xff]  ;;  %v4933_v10 = vadd.f32 %v8650_v56, %v4665_v27  ;;  %v4932_v3 = vadd.f32 %v4828_v59, %v4664_v51  ;;  %v5225_v40 = vpop.permute.xlu0 %5224 }
 0x440   : > { %v4834_v21 = vpop.f32.mrf.mxu1  ;;  %v5090_v46 = vpop.f32.mrf.mxu0  ;;  %v4671_v23 = vadd.f32 %v9032_v62, %v4403_v7  ;;  %v4934_v14 = vadd.f32 %v4832_v35, %v4666_v15  ;;  %v4668_v7 = vadd.f32 %v8654_v54, %v4400_v61 }
 0x441   : > { %v5232_v0 = vadd.f32 %v8754_v18, %v5196_v11  ;;  %v5197_v2 = vadd.f32 %v5090_v46, %v4929_v6  ;;  %v4935_v9 = vadd.f32 %v4834_v21, %v4667_v8 }
 0x442   : > { %v4838_v52 = vpop.f32.mrf.mxu1  ;;  %v5094_v41 = vpop.f32.mrf.mxu0  ;;  %v4939_v51 = vadd.f32 %v8723_v38, %v4671_v23 }
 0x443   : > { %v5284_v42 = vadd.f32 %v8657_v4, %v5232_v0  ;;  %v5233_v39 = vadd.f32 %v8754_v18, %v5197_v2  ;;  %v5199_v58 = vadd.f32 %v5094_v41, %v4931_v5  ;;  %v4670_v5 = vadd.f32 %v9034_v33, %v4402_v20 }
 0x444   : > { %v4840_v24 = vpop.f32.mrf.mxu1  ;;  %v5096_v57 = vpop.f32.mrf.mxu0  ;;  %v4937_v0 = vadd.f32 %v4838_v52, %v4669_v48 }
 0x445   : > { %v5296_v4 = vmax.f32 %v5284_v42, 0.0  ;;  %v5285_v6 = vadd.f32 %v8660_v26, %v5233_v39  ;;  %v5235_v11 = vadd.f32 %v5220_v63, %v5199_v58  ;;  %v5200_v56 = vadd.f32 %v5096_v57, %v4932_v3  ;;  %v9035_v3 = vld [vmem:[#allocation4_spill] sm:$0xff] }
 0x446   : > { %v5100_v59 = vpop.f32.mrf.mxu0  ;;  %v6154_v45 = vpop.f32.mrf.mxu1  ;;  %v4930_v26 = vadd.f32 %v8683_v30, %v4662_v36  ;;  %v9037_v57 = vrot.slane %v8998_v47, 4 }
 0x447   : > { %5308 = vst [vmem:[%s8778_s25] sm:$0xff] %v5296_v4  ;;  %v5297_v25 = vmax.f32 %v5285_v6, 0.0  ;;  %v5287_v53 = vadd.f32 %v8663_v49, %v5235_v11  ;;  %v5202_v46 = vadd.f32 %v5100_v59, %v4934_v14  ;;  %v5201_v35 = vadd.f32 %v6154_v45, %v4933_v10  ;;  %v5230_v30 = vpop.permute.xlu1 %5229 }
 0x448   : > { %v5236_v55 = vadd.f32 %v5220_v63, %v5200_v56  ;;  %v5102_v54 = vpop.f32.mrf.mxu0  ;;  %v5177_v61 = vpop.f32.mrf.mxu1  ;;  %v4936_v49 = vadd.f32 %v8737_v28, %v4668_v7 }
 0x449   : > { %5309 = vst [vmem:[%s8778_s25 + $0x8] sm:$0xff] %v5297_v25  ;;  %v5299_v21 = vmax.f32 %v5287_v53, 0.0  ;;  %v5238_v2 = vadd.f32 %v5225_v40, %v5202_v46  ;;  %v5237_v12 = vadd.f32 %v5220_v63, %v5201_v35  ;;  %v5203_v50 = vadd.f32 %v5102_v54, %v4935_v9 }
 0x44a   : > { %v5288_v34 = vadd.f32 %v8666_v13, %v5236_v55  ;;  %v5198_v27 = vadd.f32 %v5177_v61, %v4930_v26  ;;  %v5106_v20 = vpop.f32.mrf.mxu0  ;;  %v6157_v29 = vpop.f32.mrf.mxu1  ;;  %v4938_v63 = vadd.f32 %v4840_v24, %v4670_v5 }
 0x44b   : > { %5311 = vst [vmem:[%s8778_s25 + $0x18] sm:$0xff] %v5299_v21  ;;  %v5290_v36 = vadd.f32 %v8669_v17, %v5238_v2  ;;  %v5289_v52 = vadd.f32 %v8674_v16, %v5237_v12  ;;  %v5239_v41 = vadd.f32 %v5225_v40, %v5203_v50  ;;  %v5205_v60 = vadd.f32 %v5106_v20, %v4937_v0 }
 0x44c   : > { %v5300_v38 = vmax.f32 %v5288_v34, 0.0  ;;  %v5234_v28 = vadd.f32 %v8754_v18, %v5198_v27  ;;  %v5207_v15 = vadd.f32 %v6157_v29, %v4939_v51  ;;  %v5108_v13 = vpop.f32.mrf.mxu0  ;;  %v5187_v42 = vpop.f32.mrf.mxu1 }
 0x44d   : > { %v5302_v39 = vmax.f32 %v5290_v36, 0.0  ;;  %v5301_v58 = vmax.f32 %v5289_v52, 0.0  ;;  %v5291_v43 = vadd.f32 %v8679_v31, %v5239_v41  ;;  %v5241_v8 = vadd.f32 %v5230_v30, %v5205_v60 }
 0x44e   : > { %5312 = vst [vmem:[%s8778_s25 + $0x20] sm:$0xff] %v5300_v38  ;;  %v5286_v17 = vadd.f32 %v8686_v1, %v5234_v28  ;;  %v5243_v16 = vadd.f32 %v5230_v30, %v5207_v15  ;;  %v5206_v62 = vadd.f32 %v5108_v13, %v4938_v63  ;;  %v5204_v23 = vadd.f32 %v5187_v42, %v4936_v49  ;;  %v9038_v1 = vld [vmem:[#allocation13_spill] sm:$0xff] }
 0x44f   : > { %5314 = vst [vmem:[%s8778_s25 + $0x30] sm:$0xff] %v5302_v39  ;;  %5313 = vst [vmem:[%s8778_s25 + $0x28] sm:$0xff] %v5301_v58  ;;  %v5303_v18 = vmax.f32 %v5291_v43, 0.0  ;;  %v5293_v10 = vadd.f32 %v8689_v22, %v5241_v8  ;;  %v9036_v31 = vrot.slane %v9035_v3, 4  ;;  %v9039_v14 = vrot.slane %v9038_v1, 4 }
 0x450   : > { %v5298_v6 = vmax.f32 %v5286_v17, 0.0  ;;  %v5295_v11 = vadd.f32 %v8701_v37, %v5243_v16  ;;  %v5242_v19 = vadd.f32 %v5230_v30, %v5206_v62  ;;  %v5240_v48 = vadd.f32 %v5225_v40, %v5204_v23 }
 0x451   : > { %v5269_v24 = vsel %vm5244_vm10, %v9036_v31, %v5268_v44  ;;  %v5265_v4 = vsel %vm5244_vm10, %v9039_v14, %v9037_v57  ;;  %5315 = vst [vmem:[%s8778_s25 + $0x38] sm:$0xff] %v5303_v18  ;;  %v5305_v22 = vmax.f32 %v5293_v10, 0.0 }
 0x452   : > { %5310 = vst [vmem:[%s8778_s25 + $0x10] sm:$0xff] %v5298_v6  ;;  %v5307_v32 = vmax.f32 %v5295_v11, 0.0  ;;  %v5294_v7 = vadd.f32 %v5269_v24, %v5242_v19  ;;  %v5292_v9 = vadd.f32 %v5265_v4, %v5240_v48 }
 0x453   : > { %5317 = vst [vmem:[%s8778_s25 + $0x48] sm:$0xff] %v5305_v22 }
 0x454   : > { %5319 = vst [vmem:[%s8778_s25 + $0x58] sm:$0xff] %v5307_v32  ;;  %v5306_v44 = vmax.f32 %v5294_v7, 0.0  ;;  %v5304_v47 = vmax.f32 %v5292_v9, 0.0 }
 0x456   : > { %5318 = vst [vmem:[%s8778_s25 + $0x50] sm:$0xff] %v5306_v44  ;;  %5316 = vst [vmem:[%s8778_s25 + $0x40] sm:$0xff] %v5304_v47 }
 0x457 PF: > { %s16_s21 = sadd.s32 1, %s6467_s21  }
 0x458   : > { %p13_p4 = scmp.ge.s32.totalorder %s16_s21, 4  }
 0x45a   :  { %15 = sbr.rel (!%p13_p4) target bundleno = 1 (0x1), region = 90 }

</bundles_post_ra>
